<compile_context>
chip_gen: v5e
topology: v5e:2x2
jax: 0.10.0
libtpu: 0.0.40
codegen_flags: <defaults>
</compile_context>

<pallas_src>
import functools

import jax
import jax.numpy as jnp
from jax import lax
from jax.experimental import pallas as pl
from jax.experimental.pallas import tpu as pltpu


def _ceil_to(v, m):
    return ((v + m - 1) // m) * m


# --------------------------------------------------------------------------- #
# Fused kernel: conv1d + LayerNorm + LSTM + GroupNorm + gates + linears.
# One grid step = one chunk of 8 (padded) batches; rows inside a chunk are
# time-major: row r = t*8 + b_local.
# --------------------------------------------------------------------------- #
def _slstm_fused_kernel(
    x_ref,              # (Mc, Cin_p)  f32   chunk input, time-major
    convw_ref,          # (3*Cin_p, Cc_p) bf16  conv taps stacked [t-1; t; t+1]
    convb_ref,          # (1, Cc_p)    f32
    lng_ref, lnb_ref,   # (1, Cc_p)    f32   LayerNorm affine (zero-padded)
    wih_ref,            # (Cc_p, 4Hp)  bf16  LSTM W_ih^T, gate blocks lane-aligned
    whh_ref,            # (Hp, 4Hp)    bf16  LSTM W_hh^T
    lstmb_ref,          # (1, 4Hp)     f32   b_ih + b_hh
    gmat_ref,           # (Hp, Hp)     f32   same-group channel averaging (1/cs)
    gng_ref, gnb_ref,   # (1, Hp)      f32   GroupNorm affine
    wifc_ref,           # (Hp, 3Hp)    bf16  [i | f | c] gate weights
    bifc_ref,           # (1, 3Hp)     f32
    wrl_ref,            # (Hp, Hp)     bf16  right_linear + left_linear combined
    brl_ref,            # (1, Hp)      f32
    wp_ref, bp_ref,     # (Hp, Dp) bf16, (1, Dp) f32   proj
    wfc_ref, bfc_ref,   # (Dp, Dp) bf16, (1, Dp) f32   fc
    o_ref,              # (Mc, Dp)     f32   lane-dense output
    xpad_sc,            # (Mc + 2*Bc, Cin_p) bf16  time-padded input
    xz_sc,              # (T, Bc, 4Hp) f32   hoisted LSTM input projection
    hseq_sc,            # (T, Bc, Hp)  f32   LSTM output sequence
    *, T, Bc, Hp, Cc, ln_eps, gn_eps, unroll,
):
    f32 = jnp.float32
    bf16 = jnp.bfloat16
    Mc = T * Bc
    Cin_p = x_ref.shape[1]
    Cc_p = convb_ref.shape[1]

    # ---- Conv1d(k=3, padding=1): zero only the two edge slabs, 3 tap matmuls --
    xpad_sc[0:Bc, :] = jnp.zeros((Bc, Cin_p), bf16)
    xpad_sc[Bc + Mc:Bc + Mc + Bc, :] = jnp.zeros((Bc, Cin_p), bf16)
    xpad_sc[Bc:Bc + Mc, :] = x_ref[...].astype(bf16)

    y = (jnp.dot(xpad_sc[0:Mc, :], convw_ref[0:Cin_p, :],
                 preferred_element_type=f32)                       # x[t-1]
         + jnp.dot(xpad_sc[Bc:Bc + Mc, :], convw_ref[Cin_p:2 * Cin_p, :],
                   preferred_element_type=f32)                     # x[t]
         + jnp.dot(xpad_sc[2 * Bc:2 * Bc + Mc, :], convw_ref[2 * Cin_p:3 * Cin_p, :],
                   preferred_element_type=f32)                     # x[t+1]
         + convb_ref[...])

    # ---- LayerNorm over the Cc real channels (padded lanes masked to zero) ----
    inv_cc = 1.0 / Cc
    mu = jnp.sum(y, axis=-1, keepdims=True) * inv_cc      # padded lanes of y are 0
    lane = lax.broadcasted_iota(jnp.int32, (1, Cc_p), 1)
    cmask = (lane < Cc).astype(f32)
    dev = (y - mu) * cmask
    var = jnp.sum(dev * dev, axis=-1, keepdims=True) * inv_cc
    xln = dev * lax.rsqrt(var + ln_eps) * lng_ref[...] + lnb_ref[...]

    # ---- LSTM: input projection hoisted out of the recurrence ----
    xz = jnp.dot(xln.astype(bf16), wih_ref[...],
                 preferred_element_type=f32) + lstmb_ref[...]
    xz_sc[...] = xz.reshape(T, Bc, 4 * Hp)

    whh = whh_ref[...]

    def step(t, carry):
        h, c = carry                                           # (Bc, Hp) f32
        z = xz_sc[t] + jnp.dot(h.astype(bf16), whh, preferred_element_type=f32)
        i_g = jax.nn.sigmoid(z[:, 0:Hp])
        f_g = jax.nn.sigmoid(z[:, Hp:2 * Hp])
        g_g = jnp.tanh(z[:, 2 * Hp:3 * Hp])
        o_g = jax.nn.sigmoid(z[:, 3 * Hp:4 * Hp])
        c_new = f_g * c + i_g * g_g
        h_new = o_g * jnp.tanh(c_new)
        hseq_sc[t] = h_new
        return (h_new, c_new)

    h0 = jnp.zeros((Bc, Hp), f32)
    c0 = jnp.zeros((Bc, Hp), f32)
    lax.fori_loop(0, T, step, (h0, c0), unroll=unroll)

    # ---- GroupNorm per (batch, group) over channels x T (mean-subtracted) ----
    hseq = hseq_sc[...]                                        # (T, Bc, Hp) f32
    gmat = gmat_ref[...]
    bmean = jnp.mean(hseq, axis=0)                             # (Bc, Hp) mean over T
    gmean = jnp.dot(bmean, gmat, preferred_element_type=f32)   # per (batch, group)
    dgn = hseq - gmean[None, :, :]
    bvar = jnp.mean(dgn * dgn, axis=0)                         # (Bc, Hp)
    gvar = jnp.dot(bvar, gmat, preferred_element_type=f32)
    xn = (dgn * lax.rsqrt(gvar[None, :, :] + gn_eps)
          * gng_ref[...][None] + gnb_ref[...][None])
    xn2 = xn.reshape(Mc, Hp)

    # ---- gates: fused [i|f|c] matmul (reference's o_gate output is unused) ----
    z = jnp.dot(xn2.astype(bf16), wifc_ref[...],
                preferred_element_type=f32) + bifc_ref[...]
    i_gate = jax.nn.sigmoid(z[:, 0:Hp])
    f_gate = jax.nn.sigmoid(z[:, Hp:2 * Hp])
    c_gate = jnp.tanh(z[:, 2 * Hp:3 * Hp])
    h = f_gate * xn2 + i_gate * c_gate

    # ---- (right_linear + left_linear) pre-summed, proj, fc ----
    h = jnp.dot(h.astype(bf16), wrl_ref[...], preferred_element_type=f32) + brl_ref[...]
    h = jnp.dot(h.astype(bf16), wp_ref[...], preferred_element_type=f32) + bp_ref[...]
    # dropout: identity (eval).
    o_ref[...] = (jnp.dot(h.astype(bf16), wfc_ref[...], preferred_element_type=f32)
                  + bfc_ref[...])


# --------------------------------------------------------------------------- #
# Wrapper: padding / packing (layout plumbing) + pallas_call.
# --------------------------------------------------------------------------- #
def slstm_forward(x, params, num_groups):
    B, T, Cin = x.shape
    Cc = params["conv_b"].shape[1]
    H = params["lstm_whh"].shape[0]
    D = params["proj_w"].shape[1]

    Bc = 8                                   # sublane-tile batch chunk
    Bp = _ceil_to(B, Bc)
    G = Bp // Bc                             # grid: independent batch chunks
    Mc = T * Bc
    Cin_p = _ceil_to(Cin, 128)
    Cc_p = _ceil_to(Cc, 128)
    Hp = _ceil_to(H, 128)
    Dp = _ceil_to(D, 128)
    cs = H // num_groups

    f32 = jnp.float32
    bf16 = jnp.bfloat16

    def pad2(a, r, c, dtype=f32):
        return jnp.pad(a, ((0, r - a.shape[0]), (0, c - a.shape[1]))).astype(dtype)

    # Conv taps, each padded and stacked so the kernel slices at Cin_p offsets.
    conv_w = jnp.concatenate([pad2(params["conv_w0"], Cin_p, Cc_p, bf16),
                              pad2(params["conv_w1"], Cin_p, Cc_p, bf16),
                              pad2(params["conv_w2"], Cin_p, Cc_p, bf16)], axis=0)
    conv_b = pad2(params["conv_b"], 1, Cc_p)
    ln_g = pad2(params["ln_g"], 1, Cc_p)
    ln_b = pad2(params["ln_b"], 1, Cc_p)

    # LSTM weights with 128-lane-aligned gate blocks [i|f|g|o].
    def pack_gates(w, rows_p, dtype):
        blocks = jnp.split(w, 4, axis=1)
        return jnp.concatenate([pad2(b, rows_p, Hp, dtype) for b in blocks], axis=1)

    wih = pack_gates(params["lstm_wih"], Cc_p, bf16)
    whh = pack_gates(params["lstm_whh"], Hp, bf16)
    lstm_b = pack_gates(params["lstm_b"], 1, f32)

    # Group-averaging matrix (Hp, Hp); padded channels are isolated (rows/cols 0).
    ch = jnp.arange(Hp)
    grp = jnp.where(ch < H, ch // cs, -1)
    gmat = ((grp[:, None] == grp[None, :]) & (grp[:, None] >= 0)).astype(f32) / cs
    gn_g = pad2(params["gn_g"], 1, Hp)
    gn_b = pad2(params["gn_b"], 1, Hp)

    w_ifc = jnp.concatenate([pad2(params["i_w"], Hp, Hp, bf16),
                             pad2(params["f_w"], Hp, Hp, bf16),
                             pad2(params["c_w"], Hp, Hp, bf16)], axis=1)
    b_ifc = jnp.concatenate([pad2(params["i_b"], 1, Hp),
                             pad2(params["f_b"], 1, Hp),
                             pad2(params["c_b"], 1, Hp)], axis=1)
    w_rl = pad2(params["r_w"] + params["l_w"], Hp, Hp, bf16)
    b_rl = pad2(params["r_b"] + params["l_b"], 1, Hp)
    w_p = pad2(params["proj_w"], Hp, Dp, bf16)
    b_p = pad2(params["proj_b"], 1, Dp)
    w_fc = pad2(params["fc_w"], Dp, Dp, bf16)
    b_fc = pad2(params["fc_b"], 1, Dp)

    # Input layout: pad batch/channels, chunk-major then time-major-within-chunk
    # (row r = g*Mc + t*Bc + b_local) so every per-step access is a full (8,128) tile.
    xp = jnp.pad(x, ((0, Bp - B), (0, 0), (0, Cin_p - Cin)))
    x2d = xp.reshape(G, Bc, T, Cin_p).transpose(0, 2, 1, 3).reshape(G * Mc, Cin_p)

    weight_args = (conv_w, conv_b, ln_g, ln_b, wih, whh, lstm_b, gmat, gn_g, gn_b,
                   w_ifc, b_ifc, w_rl, b_rl, w_p, b_p, w_fc, b_fc)

    def wspec(shape):
        return pl.BlockSpec(shape, lambda g, _s=len(shape): (0,) * _s)

    in_specs = ([pl.BlockSpec((Mc, Cin_p), lambda g: (g, 0))]
                + [wspec(a.shape) for a in weight_args])

    # VMEM budget: raise the scoped limit only when the footprint needs it.
    block_bytes = (Mc * Cin_p * 4 + Mc * Dp * 4) * 2
    weight_bytes = sum(int(a.size) * a.dtype.itemsize for a in weight_args) * 2
    scratch_bytes = ((Mc + 2 * Bc) * Cin_p * 2
                     + T * Bc * 4 * Hp * 4 + T * Bc * Hp * 4)
    est = block_bytes + weight_bytes + scratch_bytes
    vmem_limit = None
    if est > 24 * 1024 * 1024:
        vmem_limit = int(min(max(est * 5 // 4, 32 * 1024 * 1024), 64 * 1024 * 1024))

    kernel = functools.partial(_slstm_fused_kernel, T=T, Bc=Bc, Hp=Hp, Cc=Cc,
                               ln_eps=1e-5, gn_eps=1e-5,
                               unroll=True if T <= 16 else 8)

    out2d = pl.pallas_call(
        kernel,
        out_shape=jax.ShapeDtypeStruct((G * Mc, Dp), jnp.float32),
        grid=(G,),
        in_specs=in_specs,
        out_specs=pl.BlockSpec((Mc, Dp), lambda g: (g, 0)),
        scratch_shapes=[
            pltpu.VMEM((Mc + 2 * Bc, Cin_p), jnp.bfloat16),
            pltpu.VMEM((T, Bc, 4 * Hp), jnp.float32),
            pltpu.VMEM((T, Bc, Hp), jnp.float32),
        ],
        compiler_params=pltpu.CompilerParams(
            dimension_semantics=("parallel",),   # batch chunks -> both v7x TCs
            vmem_limit_bytes=vmem_limit),
    )(x2d, *weight_args)

    # Undo the chunk/time-major layout and strip padding.
    out = out2d.reshape(G, T, Bc, Dp).transpose(0, 2, 1, 3).reshape(Bp, T, Dp)
    return out[:B, :, :D]


def make_params(key, input_size, conv_channels, hidden_dim):
    keys = iter(jax.random.split(key, 40))

    def w(shape, scale=0.05):
        return (scale * jax.random.normal(next(keys), shape)).astype(jnp.float32)

    H = hidden_dim
    return {
        # Conv1d weight (Cout, Cin, 3) stored as three (Cin, Cout) tap matrices
        "conv_w0": w((input_size, conv_channels)),   # tap k=0 -> x[t-1]
        "conv_w1": w((input_size, conv_channels)),   # tap k=1 -> x[t]
        "conv_w2": w((input_size, conv_channels)),   # tap k=2 -> x[t+1]
        "conv_b": w((1, conv_channels)),
        "ln_g": jnp.ones((1, conv_channels), jnp.float32),
        "ln_b": jnp.zeros((1, conv_channels), jnp.float32),
        # LSTM: W_ih^T (Cc, 4H), W_hh^T (H, 4H), combined bias b_ih + b_hh (1, 4H)
        "lstm_wih": w((conv_channels, 4 * H)),
        "lstm_whh": w((H, 4 * H)),
        "lstm_b": w((1, 4 * H)),
        "gn_g": jnp.ones((1, H), jnp.float32),
        "gn_b": jnp.zeros((1, H), jnp.float32),
        "i_w": w((H, H)), "i_b": w((1, H)),
        "f_w": w((H, H)), "f_b": w((1, H)),
        # o_gate params exist in the module but its output is unused in forward.
        "o_w": w((H, H)), "o_b": w((1, H)),
        "c_w": w((H, H)), "c_b": w((1, H)),
        "r_w": w((H, H)), "r_b": w((1, H)),
        "l_w": w((H, H)), "l_b": w((1, H)),
        "proj_w": w((H, input_size)), "proj_b": w((1, input_size)),
        "fc_w": w((input_size, input_size)), "fc_b": w((1, input_size)),
    }


if __name__ == "__main__":
    B, T = 2, 8
    input_size, conv_channels, hidden_dim, num_groups = 32, 16, 32, 4

    key = jax.random.PRNGKey(0)
    kp, kx = jax.random.split(key)
    params = make_params(kp, input_size, conv_channels, hidden_dim)
    x = jax.random.normal(kx, (B, T, input_size), dtype=jnp.float32)

    out = slstm_forward(x, params, num_groups)
    jax.block_until_ready(out)
    assert out.shape == (B, T, input_size), out.shape
    assert bool(jnp.all(jnp.isfinite(out)))
    print("KERNEL_OK")
</pallas_src>

<mosaic_0001>
module attributes {stable_mosaic.version = 11 : i64} {
  func.func @_slstm_fused_kernel(%arg0: i32, %arg1: memref<64x128xf32, #tpu.memory_space<vmem>>, %arg2: memref<384x128xbf16, #tpu.memory_space<vmem>>, %arg3: memref<1x128xf32, #tpu.memory_space<vmem>>, %arg4: memref<1x128xf32, #tpu.memory_space<vmem>>, %arg5: memref<1x128xf32, #tpu.memory_space<vmem>>, %arg6: memref<128x512xbf16, #tpu.memory_space<vmem>>, %arg7: memref<128x512xbf16, #tpu.memory_space<vmem>>, %arg8: memref<1x512xf32, #tpu.memory_space<vmem>>, %arg9: memref<128x128xf32, #tpu.memory_space<vmem>>, %arg10: memref<1x128xf32, #tpu.memory_space<vmem>>, %arg11: memref<1x128xf32, #tpu.memory_space<vmem>>, %arg12: memref<128x384xbf16, #tpu.memory_space<vmem>>, %arg13: memref<1x384xf32, #tpu.memory_space<vmem>>, %arg14: memref<128x128xbf16, #tpu.memory_space<vmem>>, %arg15: memref<1x128xf32, #tpu.memory_space<vmem>>, %arg16: memref<128x128xbf16, #tpu.memory_space<vmem>>, %arg17: memref<1x128xf32, #tpu.memory_space<vmem>>, %arg18: memref<128x128xbf16, #tpu.memory_space<vmem>>, %arg19: memref<1x128xf32, #tpu.memory_space<vmem>>, %arg20: memref<64x128xf32, #tpu.memory_space<vmem>>, %arg21: memref<80x128xbf16, #tpu.memory_space<vmem>>, %arg22: memref<8x8x512xf32, #tpu.memory_space<vmem>>, %arg23: memref<8x8x128xf32, #tpu.memory_space<vmem>>) attributes {dimension_semantics = [#tpu.dimension_semantics<parallel>], iteration_bounds = array<i64: 1>, scalar_prefetch = 0 : i64, scratch_operands = 3 : i64, tpu.core_type = #tpu.core_type<tc>, window_params = [{transform_indices = @transform_0, window_bounds = array<i64: 64, 128>}, {pipeline_mode = #tpu.pipeline_mode<synchronous>, transform_indices = @transform_1, window_bounds = array<i64: 384, 128>}, {pipeline_mode = #tpu.pipeline_mode<synchronous>, transform_indices = @transform_2, window_bounds = array<i64: 1, 128>}, {pipeline_mode = #tpu.pipeline_mode<synchronous>, transform_indices = @transform_3, window_bounds = array<i64: 1, 128>}, {pipeline_mode = #tpu.pipeline_mode<synchronous>, transform_indices = @transform_4, window_bounds = array<i64: 1, 128>}, {pipeline_mode = #tpu.pipeline_mode<synchronous>, transform_indices = @transform_5, window_bounds = array<i64: 128, 512>}, {pipeline_mode = #tpu.pipeline_mode<synchronous>, transform_indices = @transform_6, window_bounds = array<i64: 128, 512>}, {pipeline_mode = #tpu.pipeline_mode<synchronous>, transform_indices = @transform_7, window_bounds = array<i64: 1, 512>}, {pipeline_mode = #tpu.pipeline_mode<synchronous>, transform_indices = @transform_8, window_bounds = array<i64: 128, 128>}, {pipeline_mode = #tpu.pipeline_mode<synchronous>, transform_indices = @transform_9, window_bounds = array<i64: 1, 128>}, {pipeline_mode = #tpu.pipeline_mode<synchronous>, transform_indices = @transform_10, window_bounds = array<i64: 1, 128>}, {pipeline_mode = #tpu.pipeline_mode<synchronous>, transform_indices = @transform_11, window_bounds = array<i64: 128, 384>}, {pipeline_mode = #tpu.pipeline_mode<synchronous>, transform_indices = @transform_12, window_bounds = array<i64: 1, 384>}, {pipeline_mode = #tpu.pipeline_mode<synchronous>, transform_indices = @transform_13, window_bounds = array<i64: 128, 128>}, {pipeline_mode = #tpu.pipeline_mode<synchronous>, transform_indices = @transform_14, window_bounds = array<i64: 1, 128>}, {pipeline_mode = #tpu.pipeline_mode<synchronous>, transform_indices = @transform_15, window_bounds = array<i64: 128, 128>}, {pipeline_mode = #tpu.pipeline_mode<synchronous>, transform_indices = @transform_16, window_bounds = array<i64: 1, 128>}, {pipeline_mode = #tpu.pipeline_mode<synchronous>, transform_indices = @transform_17, window_bounds = array<i64: 128, 128>}, {pipeline_mode = #tpu.pipeline_mode<synchronous>, transform_indices = @transform_18, window_bounds = array<i64: 1, 128>}, {transform_indices = @transform_19, window_bounds = array<i64: 64, 128>}]} {
    %cst = arith.constant 0.000000e+00 : bf16
    %0 = vector.broadcast %cst : bf16 to vector<8x128xbf16>
    %c0 = arith.constant 0 : index
    %c0_0 = arith.constant 0 : index
    %1 = vector.load %arg21[%c0, %c0_0] : memref<80x128xbf16, #tpu.memory_space<vmem>>, vector<8x128xbf16>
    tpu.vector_store %arg21[%c0, %c0_0], %0 {strides = array<i32>} : memref<80x128xbf16, #tpu.memory_space<vmem>>, vector<8x128xbf16>,
    %cst_1 = arith.constant 0.000000e+00 : bf16
    %2 = vector.broadcast %cst_1 : bf16 to vector<8x128xbf16>
    %c72 = arith.constant 72 : index
    %c0_2 = arith.constant 0 : index
    %3 = vector.load %arg21[%c72, %c0_2] : memref<80x128xbf16, #tpu.memory_space<vmem>>, vector<8x128xbf16>
    tpu.vector_store %arg21[%c72, %c0_2], %2 {strides = array<i32>} : memref<80x128xbf16, #tpu.memory_space<vmem>>, vector<8x128xbf16>,
    %c0_3 = arith.constant 0 : index
    %c0_4 = arith.constant 0 : index
    %4 = vector.load %arg1[%c0_3, %c0_4] : memref<64x128xf32, #tpu.memory_space<vmem>>, vector<64x128xf32>
    %5 = arith.truncf %4 : vector<64x128xf32> to vector<64x128xbf16>
    %c8 = arith.constant 8 : index
    %c0_5 = arith.constant 0 : index
    %6 = vector.load %arg21[%c8, %c0_5] : memref<80x128xbf16, #tpu.memory_space<vmem>>, vector<64x128xbf16>
    tpu.vector_store %arg21[%c8, %c0_5], %5 {strides = array<i32>} : memref<80x128xbf16, #tpu.memory_space<vmem>>, vector<64x128xbf16>,
    %c0_6 = arith.constant 0 : index
    %c0_7 = arith.constant 0 : index
    %7 = vector.load %arg21[%c0_6, %c0_7] : memref<80x128xbf16, #tpu.memory_space<vmem>>, vector<64x128xbf16>
    %c0_8 = arith.constant 0 : index
    %c0_9 = arith.constant 0 : index
    %8 = vector.load %arg2[%c0_8, %c0_9] : memref<384x128xbf16, #tpu.memory_space<vmem>>, vector<128x128xbf16>
    %cst_10 = arith.constant dense<0.000000e+00> : vector<64x128xf32>
    %9 = tpu.matmul %7, %8, %cst_10 {dimension_numbers = #tpu.dot_dimension_numbers<[1], [0], [0], [1], [0, 0, 1, 1], [], []>} : vector<64x128xbf16>, vector<128x128xbf16>, vector<64x128xf32> -> vector<64x128xf32>
    %c8_11 = arith.constant 8 : index
    %c0_12 = arith.constant 0 : index
    %10 = vector.load %arg21[%c8_11, %c0_12] : memref<80x128xbf16, #tpu.memory_space<vmem>>, vector<64x128xbf16>
    %c128 = arith.constant 128 : index
    %c0_13 = arith.constant 0 : index
    %11 = vector.load %arg2[%c128, %c0_13] : memref<384x128xbf16, #tpu.memory_space<vmem>>, vector<128x128xbf16>
    %cst_14 = arith.constant dense<0.000000e+00> : vector<64x128xf32>
    %12 = tpu.matmul %10, %11, %cst_14 {dimension_numbers = #tpu.dot_dimension_numbers<[1], [0], [0], [1], [0, 0, 1, 1], [], []>} : vector<64x128xbf16>, vector<128x128xbf16>, vector<64x128xf32> -> vector<64x128xf32>
    %13 = arith.addf %9, %12 : vector<64x128xf32>
    %c16 = arith.constant 16 : index
    %c0_15 = arith.constant 0 : index
    %14 = vector.load %arg21[%c16, %c0_15] : memref<80x128xbf16, #tpu.memory_space<vmem>>, vector<64x128xbf16>
    %c256 = arith.constant 256 : index
    %c0_16 = arith.constant 0 : index
    %15 = vector.load %arg2[%c256, %c0_16] : memref<384x128xbf16, #tpu.memory_space<vmem>>, vector<128x128xbf16>
    %cst_17 = arith.constant dense<0.000000e+00> : vector<64x128xf32>
    %16 = tpu.matmul %14, %15, %cst_17 {dimension_numbers = #tpu.dot_dimension_numbers<[1], [0], [0], [1], [0, 0, 1, 1], [], []>} : vector<64x128xbf16>, vector<128x128xbf16>, vector<64x128xf32> -> vector<64x128xf32>
    %17 = arith.addf %13, %16 : vector<64x128xf32>
    %c0_18 = arith.constant 0 : index
    %c0_19 = arith.constant 0 : index
    %18 = vector.load %arg3[%c0_18, %c0_19] : memref<1x128xf32, #tpu.memory_space<vmem>>, vector<1x128xf32>
    %19 = vector.broadcast %18 : vector<1x128xf32> to vector<64x128xf32>
    %20 = arith.addf %17, %19 : vector<64x128xf32>
    %cst_20 = arith.constant dense<0.000000e+00> : vector<64xf32>
    %21 = vector.multi_reduction <add>, %20, %cst_20 [1] : vector<64x128xf32> to vector<64xf32>
    %22 = vector.shape_cast %21 : vector<64xf32> to vector<64x1xf32>
    %cst_21 = arith.constant 6.250000e-02 : f32
    %23 = vector.broadcast %cst_21 : f32 to vector<64x1xf32>
    %24 = arith.mulf %22, %23 : vector<64x1xf32>
    %25 = tpu.iota {dimensions = array<i32: 1>} : vector<1x128xi32>
    %c16_i32 = arith.constant 16 : i32
    %26 = vector.broadcast %c16_i32 : i32 to vector<1x128xi32>
    %27 = arith.cmpi slt, %25, %26 : vector<1x128xi32>
    %28 = arith.extui %27 : vector<1x128xi1> to vector<1x128xi32>
    %29 = arith.sitofp %28 : vector<1x128xi32> to vector<1x128xf32>
    %30 = vector.broadcast %24 : vector<64x1xf32> to vector<64x128xf32>
    %31 = arith.subf %20, %30 : vector<64x128xf32>
    %32 = vector.broadcast %29 : vector<1x128xf32> to vector<64x128xf32>
    %33 = arith.mulf %31, %32 : vector<64x128xf32>
    %34 = arith.mulf %33, %33 : vector<64x128xf32>
    %cst_22 = arith.constant dense<0.000000e+00> : vector<64xf32>
    %35 = vector.multi_reduction <add>, %34, %cst_22 [1] : vector<64x128xf32> to vector<64xf32>
    %36 = vector.shape_cast %35 : vector<64xf32> to vector<64x1xf32>
    %cst_23 = arith.constant 6.250000e-02 : f32
    %37 = vector.broadcast %cst_23 : f32 to vector<64x1xf32>
    %38 = arith.mulf %36, %37 : vector<64x1xf32>
    %cst_24 = arith.constant 9.99999974E-6 : f32
    %39 = vector.broadcast %cst_24 : f32 to vector<64x1xf32>
    %40 = arith.addf %38, %39 : vector<64x1xf32>
    %41 = math.rsqrt %40 : vector<64x1xf32>
    %42 = vector.broadcast %41 : vector<64x1xf32> to vector<64x128xf32>
    %43 = arith.mulf %33, %42 : vector<64x128xf32>
    %c0_25 = arith.constant 0 : index
    %c0_26 = arith.constant 0 : index
    %44 = vector.load %arg4[%c0_25, %c0_26] : memref<1x128xf32, #tpu.memory_space<vmem>>, vector<1x128xf32>
    %45 = vector.broadcast %44 : vector<1x128xf32> to vector<64x128xf32>
    %46 = arith.mulf %43, %45 : vector<64x128xf32>
    %c0_27 = arith.constant 0 : index
    %c0_28 = arith.constant 0 : index
    %47 = vector.load %arg5[%c0_27, %c0_28] : memref<1x128xf32, #tpu.memory_space<vmem>>, vector<1x128xf32>
    %48 = vector.broadcast %47 : vector<1x128xf32> to vector<64x128xf32>
    %49 = arith.addf %46, %48 : vector<64x128xf32>
    %50 = arith.truncf %49 : vector<64x128xf32> to vector<64x128xbf16>
    %c0_29 = arith.constant 0 : index
    %c0_30 = arith.constant 0 : index
    %51 = vector.load %arg6[%c0_29, %c0_30] : memref<128x512xbf16, #tpu.memory_space<vmem>>, vector<128x512xbf16>
    %cst_31 = arith.constant dense<0.000000e+00> : vector<64x512xf32>
    %52 = tpu.matmul %50, %51, %cst_31 {dimension_numbers = #tpu.dot_dimension_numbers<[1], [0], [0], [1], [0, 0, 1, 1], [], []>} : vector<64x128xbf16>, vector<128x512xbf16>, vector<64x512xf32> -> vector<64x512xf32>
    %c0_32 = arith.constant 0 : index
    %c0_33 = arith.constant 0 : index
    %53 = vector.load %arg8[%c0_32, %c0_33] : memref<1x512xf32, #tpu.memory_space<vmem>>, vector<1x512xf32>
    %54 = vector.broadcast %53 : vector<1x512xf32> to vector<64x512xf32>
    %55 = arith.addf %52, %54 : vector<64x512xf32>
    %56 = vector.shape_cast %55 : vector<64x512xf32> to vector<8x8x512xf32>
    %c0_34 = arith.constant 0 : index
    %c0_35 = arith.constant 0 : index
    %c0_36 = arith.constant 0 : index
    %57 = vector.load %arg22[%c0_34, %c0_35, %c0_36] : memref<8x8x512xf32, #tpu.memory_space<vmem>>, vector<8x8x512xf32>
    tpu.vector_store %arg22[%c0_34, %c0_35, %c0_36], %56 {strides = array<i32>} : memref<8x8x512xf32, #tpu.memory_space<vmem>>, vector<8x8x512xf32>,
    %c0_37 = arith.constant 0 : index
    %c0_38 = arith.constant 0 : index
    %58 = vector.load %arg7[%c0_37, %c0_38] : memref<128x512xbf16, #tpu.memory_space<vmem>>, vector<128x512xbf16>
    %cst_39 = arith.constant 0.000000e+00 : f32
    %59 = vector.broadcast %cst_39 : f32 to vector<8x128xf32>
    %cst_40 = arith.constant 0.000000e+00 : f32
    %60 = vector.broadcast %cst_40 : f32 to vector<8x128xf32>
    %c0_i32 = arith.constant 0 : i32
    %61 = arith.index_cast %c0_i32 : i32 to index
    %c0_41 = arith.constant 0 : index
    %c0_42 = arith.constant 0 : index
    %62 = vector.load %arg22[%61, %c0_41, %c0_42] : memref<8x8x512xf32, #tpu.memory_space<vmem>>, vector<1x8x512xf32>
    %63 = vector.shape_cast %62 : vector<1x8x512xf32> to vector<8x512xf32>
    %64 = arith.truncf %59 : vector<8x128xf32> to vector<8x128xbf16>
    %cst_43 = arith.constant dense<0.000000e+00> : vector<8x512xf32>
    %65 = tpu.matmul %64, %58, %cst_43 {dimension_numbers = #tpu.dot_dimension_numbers<[1], [0], [0], [1], [0, 0, 1, 1], [], []>} : vector<8x128xbf16>, vector<128x512xbf16>, vector<8x512xf32> -> vector<8x512xf32>
    %66 = arith.addf %63, %65 : vector<8x512xf32>
    %67 = vector.extract_strided_slice %66 {offsets = [0, 0], sizes = [8, 128], strides = [1, 1]} : vector<8x512xf32> to vector<8x128xf32>
    %68 = arith.negf %67 : vector<8x128xf32>
    %69 = math.exp %68 : vector<8x128xf32>
    %cst_44 = arith.constant 1.000000e+00 : f32
    %70 = vector.broadcast %cst_44 : f32 to vector<8x128xf32>
    %71 = arith.addf %70, %69 : vector<8x128xf32>
    %72 = arith.divf %70, %71 : vector<8x128xf32>
    %73 = vector.extract_strided_slice %66 {offsets = [0, 128], sizes = [8, 128], strides = [1, 1]} : vector<8x512xf32> to vector<8x128xf32>
    %74 = arith.negf %73 : vector<8x128xf32>
    %75 = math.exp %74 : vector<8x128xf32>
    %cst_45 = arith.constant 1.000000e+00 : f32
    %76 = vector.broadcast %cst_45 : f32 to vector<8x128xf32>
    %77 = arith.addf %76, %75 : vector<8x128xf32>
    %78 = arith.divf %76, %77 : vector<8x128xf32>
    %79 = vector.extract_strided_slice %66 {offsets = [0, 256], sizes = [8, 128], strides = [1, 1]} : vector<8x512xf32> to vector<8x128xf32>
    %80 = math.tanh %79 : vector<8x128xf32>
    %81 = vector.extract_strided_slice %66 {offsets = [0, 384], sizes = [8, 128], strides = [1, 1]} : vector<8x512xf32> to vector<8x128xf32>
    %82 = arith.negf %81 : vector<8x128xf32>
    %83 = math.exp %82 : vector<8x128xf32>
    %cst_46 = arith.constant 1.000000e+00 : f32
    %84 = vector.broadcast %cst_46 : f32 to vector<8x128xf32>
    %85 = arith.addf %84, %83 : vector<8x128xf32>
    %86 = arith.divf %84, %85 : vector<8x128xf32>
    %87 = arith.mulf %78, %60 : vector<8x128xf32>
    %88 = arith.mulf %72, %80 : vector<8x128xf32>
    %89 = arith.addf %87, %88 : vector<8x128xf32>
    %90 = math.tanh %89 : vector<8x128xf32>
    %91 = arith.mulf %86, %90 : vector<8x128xf32>
    %92 = arith.index_cast %c0_i32 : i32 to index
    %c0_47 = arith.constant 0 : index
    %c0_48 = arith.constant 0 : index
    %93 = vector.load %arg23[%92, %c0_47, %c0_48] : memref<8x8x128xf32, #tpu.memory_space<vmem>>, vector<1x8x128xf32>
    %94 = vector.shape_cast %93 : vector<1x8x128xf32> to vector<8x128xf32>
    %95 = vector.shape_cast %91 : vector<8x128xf32> to vector<1x8x128xf32>
    tpu.vector_store %arg23[%92, %c0_47, %c0_48], %95 {strides = array<i32>} : memref<8x8x128xf32, #tpu.memory_space<vmem>>, vector<1x8x128xf32>,
    %c1_i32 = arith.constant 1 : i32
    %96 = arith.index_cast %c1_i32 : i32 to index
    %c0_49 = arith.constant 0 : index
    %c0_50 = arith.constant 0 : index
    %97 = vector.load %arg22[%96, %c0_49, %c0_50] : memref<8x8x512xf32, #tpu.memory_space<vmem>>, vector<1x8x512xf32>
    %98 = vector.shape_cast %97 : vector<1x8x512xf32> to vector<8x512xf32>
    %99 = arith.truncf %91 : vector<8x128xf32> to vector<8x128xbf16>
    %cst_51 = arith.constant dense<0.000000e+00> : vector<8x512xf32>
    %100 = tpu.matmul %99, %58, %cst_51 {dimension_numbers = #tpu.dot_dimension_numbers<[1], [0], [0], [1], [0, 0, 1, 1], [], []>} : vector<8x128xbf16>, vector<128x512xbf16>, vector<8x512xf32> -> vector<8x512xf32>
    %101 = arith.addf %98, %100 : vector<8x512xf32>
    %102 = vector.extract_strided_slice %101 {offsets = [0, 0], sizes = [8, 128], strides = [1, 1]} : vector<8x512xf32> to vector<8x128xf32>
    %103 = arith.negf %102 : vector<8x128xf32>
    %104 = math.exp %103 : vector<8x128xf32>
    %cst_52 = arith.constant 1.000000e+00 : f32
    %105 = vector.broadcast %cst_52 : f32 to vector<8x128xf32>
    %106 = arith.addf %105, %104 : vector<8x128xf32>
    %107 = arith.divf %105, %106 : vector<8x128xf32>
    %108 = vector.extract_strided_slice %101 {offsets = [0, 128], sizes = [8, 128], strides = [1, 1]} : vector<8x512xf32> to vector<8x128xf32>
    %109 = arith.negf %108 : vector<8x128xf32>
    %110 = math.exp %109 : vector<8x128xf32>
    %cst_53 = arith.constant 1.000000e+00 : f32
    %111 = vector.broadcast %cst_53 : f32 to vector<8x128xf32>
    %112 = arith.addf %111, %110 : vector<8x128xf32>
    %113 = arith.divf %111, %112 : vector<8x128xf32>
    %114 = vector.extract_strided_slice %101 {offsets = [0, 256], sizes = [8, 128], strides = [1, 1]} : vector<8x512xf32> to vector<8x128xf32>
    %115 = math.tanh %114 : vector<8x128xf32>
    %116 = vector.extract_strided_slice %101 {offsets = [0, 384], sizes = [8, 128], strides = [1, 1]} : vector<8x512xf32> to vector<8x128xf32>
    %117 = arith.negf %116 : vector<8x128xf32>
    %118 = math.exp %117 : vector<8x128xf32>
    %cst_54 = arith.constant 1.000000e+00 : f32
    %119 = vector.broadcast %cst_54 : f32 to vector<8x128xf32>
    %120 = arith.addf %119, %118 : vector<8x128xf32>
    %121 = arith.divf %119, %120 : vector<8x128xf32>
    %122 = arith.mulf %113, %89 : vector<8x128xf32>
    %123 = arith.mulf %107, %115 : vector<8x128xf32>
    %124 = arith.addf %122, %123 : vector<8x128xf32>
    %125 = math.tanh %124 : vector<8x128xf32>
    %126 = arith.mulf %121, %125 : vector<8x128xf32>
    %127 = arith.index_cast %c1_i32 : i32 to index
    %c0_55 = arith.constant 0 : index
    %c0_56 = arith.constant 0 : index
    %128 = vector.load %arg23[%127, %c0_55, %c0_56] : memref<8x8x128xf32, #tpu.memory_space<vmem>>, vector<1x8x128xf32>
    %129 = vector.shape_cast %128 : vector<1x8x128xf32> to vector<8x128xf32>
    %130 = vector.shape_cast %126 : vector<8x128xf32> to vector<1x8x128xf32>
    tpu.vector_store %arg23[%127, %c0_55, %c0_56], %130 {strides = array<i32>} : memref<8x8x128xf32, #tpu.memory_space<vmem>>, vector<1x8x128xf32>,
    %c2_i32 = arith.constant 2 : i32
    %131 = arith.index_cast %c2_i32 : i32 to index
    %c0_57 = arith.constant 0 : index
    %c0_58 = arith.constant 0 : index
    %132 = vector.load %arg22[%131, %c0_57, %c0_58] : memref<8x8x512xf32, #tpu.memory_space<vmem>>, vector<1x8x512xf32>
    %133 = vector.shape_cast %132 : vector<1x8x512xf32> to vector<8x512xf32>
    %134 = arith.truncf %126 : vector<8x128xf32> to vector<8x128xbf16>
    %cst_59 = arith.constant dense<0.000000e+00> : vector<8x512xf32>
    %135 = tpu.matmul %134, %58, %cst_59 {dimension_numbers = #tpu.dot_dimension_numbers<[1], [0], [0], [1], [0, 0, 1, 1], [], []>} : vector<8x128xbf16>, vector<128x512xbf16>, vector<8x512xf32> -> vector<8x512xf32>
    %136 = arith.addf %133, %135 : vector<8x512xf32>
    %137 = vector.extract_strided_slice %136 {offsets = [0, 0], sizes = [8, 128], strides = [1, 1]} : vector<8x512xf32> to vector<8x128xf32>
    %138 = arith.negf %137 : vector<8x128xf32>
    %139 = math.exp %138 : vector<8x128xf32>
    %cst_60 = arith.constant 1.000000e+00 : f32
    %140 = vector.broadcast %cst_60 : f32 to vector<8x128xf32>
    %141 = arith.addf %140, %139 : vector<8x128xf32>
    %142 = arith.divf %140, %141 : vector<8x128xf32>
    %143 = vector.extract_strided_slice %136 {offsets = [0, 128], sizes = [8, 128], strides = [1, 1]} : vector<8x512xf32> to vector<8x128xf32>
    %144 = arith.negf %143 : vector<8x128xf32>
    %145 = math.exp %144 : vector<8x128xf32>
    %cst_61 = arith.constant 1.000000e+00 : f32
    %146 = vector.broadcast %cst_61 : f32 to vector<8x128xf32>
    %147 = arith.addf %146, %145 : vector<8x128xf32>
    %148 = arith.divf %146, %147 : vector<8x128xf32>
    %149 = vector.extract_strided_slice %136 {offsets = [0, 256], sizes = [8, 128], strides = [1, 1]} : vector<8x512xf32> to vector<8x128xf32>
    %150 = math.tanh %149 : vector<8x128xf32>
    %151 = vector.extract_strided_slice %136 {offsets = [0, 384], sizes = [8, 128], strides = [1, 1]} : vector<8x512xf32> to vector<8x128xf32>
    %152 = arith.negf %151 : vector<8x128xf32>
    %153 = math.exp %152 : vector<8x128xf32>
    %cst_62 = arith.constant 1.000000e+00 : f32
    %154 = vector.broadcast %cst_62 : f32 to vector<8x128xf32>
    %155 = arith.addf %154, %153 : vector<8x128xf32>
    %156 = arith.divf %154, %155 : vector<8x128xf32>
    %157 = arith.mulf %148, %124 : vector<8x128xf32>
    %158 = arith.mulf %142, %150 : vector<8x128xf32>
    %159 = arith.addf %157, %158 : vector<8x128xf32>
    %160 = math.tanh %159 : vector<8x128xf32>
    %161 = arith.mulf %156, %160 : vector<8x128xf32>
    %162 = arith.index_cast %c2_i32 : i32 to index
    %c0_63 = arith.constant 0 : index
    %c0_64 = arith.constant 0 : index
    %163 = vector.load %arg23[%162, %c0_63, %c0_64] : memref<8x8x128xf32, #tpu.memory_space<vmem>>, vector<1x8x128xf32>
    %164 = vector.shape_cast %163 : vector<1x8x128xf32> to vector<8x128xf32>
    %165 = vector.shape_cast %161 : vector<8x128xf32> to vector<1x8x128xf32>
    tpu.vector_store %arg23[%162, %c0_63, %c0_64], %165 {strides = array<i32>} : memref<8x8x128xf32, #tpu.memory_space<vmem>>, vector<1x8x128xf32>,
    %c3_i32 = arith.constant 3 : i32
    %166 = arith.index_cast %c3_i32 : i32 to index
    %c0_65 = arith.constant 0 : index
    %c0_66 = arith.constant 0 : index
    %167 = vector.load %arg22[%166, %c0_65, %c0_66] : memref<8x8x512xf32, #tpu.memory_space<vmem>>, vector<1x8x512xf32>
    %168 = vector.shape_cast %167 : vector<1x8x512xf32> to vector<8x512xf32>
    %169 = arith.truncf %161 : vector<8x128xf32> to vector<8x128xbf16>
    %cst_67 = arith.constant dense<0.000000e+00> : vector<8x512xf32>
    %170 = tpu.matmul %169, %58, %cst_67 {dimension_numbers = #tpu.dot_dimension_numbers<[1], [0], [0], [1], [0, 0, 1, 1], [], []>} : vector<8x128xbf16>, vector<128x512xbf16>, vector<8x512xf32> -> vector<8x512xf32>
    %171 = arith.addf %168, %170 : vector<8x512xf32>
    %172 = vector.extract_strided_slice %171 {offsets = [0, 0], sizes = [8, 128], strides = [1, 1]} : vector<8x512xf32> to vector<8x128xf32>
    %173 = arith.negf %172 : vector<8x128xf32>
    %174 = math.exp %173 : vector<8x128xf32>
    %cst_68 = arith.constant 1.000000e+00 : f32
    %175 = vector.broadcast %cst_68 : f32 to vector<8x128xf32>
    %176 = arith.addf %175, %174 : vector<8x128xf32>
    %177 = arith.divf %175, %176 : vector<8x128xf32>
    %178 = vector.extract_strided_slice %171 {offsets = [0, 128], sizes = [8, 128], strides = [1, 1]} : vector<8x512xf32> to vector<8x128xf32>
    %179 = arith.negf %178 : vector<8x128xf32>
    %180 = math.exp %179 : vector<8x128xf32>
    %cst_69 = arith.constant 1.000000e+00 : f32
    %181 = vector.broadcast %cst_69 : f32 to vector<8x128xf32>
    %182 = arith.addf %181, %180 : vector<8x128xf32>
    %183 = arith.divf %181, %182 : vector<8x128xf32>
    %184 = vector.extract_strided_slice %171 {offsets = [0, 256], sizes = [8, 128], strides = [1, 1]} : vector<8x512xf32> to vector<8x128xf32>
    %185 = math.tanh %184 : vector<8x128xf32>
    %186 = vector.extract_strided_slice %171 {offsets = [0, 384], sizes = [8, 128], strides = [1, 1]} : vector<8x512xf32> to vector<8x128xf32>
    %187 = arith.negf %186 : vector<8x128xf32>
    %188 = math.exp %187 : vector<8x128xf32>
    %cst_70 = arith.constant 1.000000e+00 : f32
    %189 = vector.broadcast %cst_70 : f32 to vector<8x128xf32>
    %190 = arith.addf %189, %188 : vector<8x128xf32>
    %191 = arith.divf %189, %190 : vector<8x128xf32>
    %192 = arith.mulf %183, %159 : vector<8x128xf32>
    %193 = arith.mulf %177, %185 : vector<8x128xf32>
    %194 = arith.addf %192, %193 : vector<8x128xf32>
    %195 = math.tanh %194 : vector<8x128xf32>
    %196 = arith.mulf %191, %195 : vector<8x128xf32>
    %197 = arith.index_cast %c3_i32 : i32 to index
    %c0_71 = arith.constant 0 : index
    %c0_72 = arith.constant 0 : index
    %198 = vector.load %arg23[%197, %c0_71, %c0_72] : memref<8x8x128xf32, #tpu.memory_space<vmem>>, vector<1x8x128xf32>
    %199 = vector.shape_cast %198 : vector<1x8x128xf32> to vector<8x128xf32>
    %200 = vector.shape_cast %196 : vector<8x128xf32> to vector<1x8x128xf32>
    tpu.vector_store %arg23[%197, %c0_71, %c0_72], %200 {strides = array<i32>} : memref<8x8x128xf32, #tpu.memory_space<vmem>>, vector<1x8x128xf32>,
    %c4_i32 = arith.constant 4 : i32
    %201 = arith.index_cast %c4_i32 : i32 to index
    %c0_73 = arith.constant 0 : index
    %c0_74 = arith.constant 0 : index
    %202 = vector.load %arg22[%201, %c0_73, %c0_74] : memref<8x8x512xf32, #tpu.memory_space<vmem>>, vector<1x8x512xf32>
    %203 = vector.shape_cast %202 : vector<1x8x512xf32> to vector<8x512xf32>
    %204 = arith.truncf %196 : vector<8x128xf32> to vector<8x128xbf16>
    %cst_75 = arith.constant dense<0.000000e+00> : vector<8x512xf32>
    %205 = tpu.matmul %204, %58, %cst_75 {dimension_numbers = #tpu.dot_dimension_numbers<[1], [0], [0], [1], [0, 0, 1, 1], [], []>} : vector<8x128xbf16>, vector<128x512xbf16>, vector<8x512xf32> -> vector<8x512xf32>
    %206 = arith.addf %203, %205 : vector<8x512xf32>
    %207 = vector.extract_strided_slice %206 {offsets = [0, 0], sizes = [8, 128], strides = [1, 1]} : vector<8x512xf32> to vector<8x128xf32>
    %208 = arith.negf %207 : vector<8x128xf32>
    %209 = math.exp %208 : vector<8x128xf32>
    %cst_76 = arith.constant 1.000000e+00 : f32
    %210 = vector.broadcast %cst_76 : f32 to vector<8x128xf32>
    %211 = arith.addf %210, %209 : vector<8x128xf32>
    %212 = arith.divf %210, %211 : vector<8x128xf32>
    %213 = vector.extract_strided_slice %206 {offsets = [0, 128], sizes = [8, 128], strides = [1, 1]} : vector<8x512xf32> to vector<8x128xf32>
    %214 = arith.negf %213 : vector<8x128xf32>
    %215 = math.exp %214 : vector<8x128xf32>
    %cst_77 = arith.constant 1.000000e+00 : f32
    %216 = vector.broadcast %cst_77 : f32 to vector<8x128xf32>
    %217 = arith.addf %216, %215 : vector<8x128xf32>
    %218 = arith.divf %216, %217 : vector<8x128xf32>
    %219 = vector.extract_strided_slice %206 {offsets = [0, 256], sizes = [8, 128], strides = [1, 1]} : vector<8x512xf32> to vector<8x128xf32>
    %220 = math.tanh %219 : vector<8x128xf32>
    %221 = vector.extract_strided_slice %206 {offsets = [0, 384], sizes = [8, 128], strides = [1, 1]} : vector<8x512xf32> to vector<8x128xf32>
    %222 = arith.negf %221 : vector<8x128xf32>
    %223 = math.exp %222 : vector<8x128xf32>
    %cst_78 = arith.constant 1.000000e+00 : f32
    %224 = vector.broadcast %cst_78 : f32 to vector<8x128xf32>
    %225 = arith.addf %224, %223 : vector<8x128xf32>
    %226 = arith.divf %224, %225 : vector<8x128xf32>
    %227 = arith.mulf %218, %194 : vector<8x128xf32>
    %228 = arith.mulf %212, %220 : vector<8x128xf32>
    %229 = arith.addf %227, %228 : vector<8x128xf32>
    %230 = math.tanh %229 : vector<8x128xf32>
    %231 = arith.mulf %226, %230 : vector<8x128xf32>
    %232 = arith.index_cast %c4_i32 : i32 to index
    %c0_79 = arith.constant 0 : index
    %c0_80 = arith.constant 0 : index
    %233 = vector.load %arg23[%232, %c0_79, %c0_80] : memref<8x8x128xf32, #tpu.memory_space<vmem>>, vector<1x8x128xf32>
    %234 = vector.shape_cast %233 : vector<1x8x128xf32> to vector<8x128xf32>
    %235 = vector.shape_cast %231 : vector<8x128xf32> to vector<1x8x128xf32>
    tpu.vector_store %arg23[%232, %c0_79, %c0_80], %235 {strides = array<i32>} : memref<8x8x128xf32, #tpu.memory_space<vmem>>, vector<1x8x128xf32>,
    %c5_i32 = arith.constant 5 : i32
    %236 = arith.index_cast %c5_i32 : i32 to index
    %c0_81 = arith.constant 0 : index
    %c0_82 = arith.constant 0 : index
    %237 = vector.load %arg22[%236, %c0_81, %c0_82] : memref<8x8x512xf32, #tpu.memory_space<vmem>>, vector<1x8x512xf32>
    %238 = vector.shape_cast %237 : vector<1x8x512xf32> to vector<8x512xf32>
    %239 = arith.truncf %231 : vector<8x128xf32> to vector<8x128xbf16>
    %cst_83 = arith.constant dense<0.000000e+00> : vector<8x512xf32>
    %240 = tpu.matmul %239, %58, %cst_83 {dimension_numbers = #tpu.dot_dimension_numbers<[1], [0], [0], [1], [0, 0, 1, 1], [], []>} : vector<8x128xbf16>, vector<128x512xbf16>, vector<8x512xf32> -> vector<8x512xf32>
    %241 = arith.addf %238, %240 : vector<8x512xf32>
    %242 = vector.extract_strided_slice %241 {offsets = [0, 0], sizes = [8, 128], strides = [1, 1]} : vector<8x512xf32> to vector<8x128xf32>
    %243 = arith.negf %242 : vector<8x128xf32>
    %244 = math.exp %243 : vector<8x128xf32>
    %cst_84 = arith.constant 1.000000e+00 : f32
    %245 = vector.broadcast %cst_84 : f32 to vector<8x128xf32>
    %246 = arith.addf %245, %244 : vector<8x128xf32>
    %247 = arith.divf %245, %246 : vector<8x128xf32>
    %248 = vector.extract_strided_slice %241 {offsets = [0, 128], sizes = [8, 128], strides = [1, 1]} : vector<8x512xf32> to vector<8x128xf32>
    %249 = arith.negf %248 : vector<8x128xf32>
    %250 = math.exp %249 : vector<8x128xf32>
    %cst_85 = arith.constant 1.000000e+00 : f32
    %251 = vector.broadcast %cst_85 : f32 to vector<8x128xf32>
    %252 = arith.addf %251, %250 : vector<8x128xf32>
    %253 = arith.divf %251, %252 : vector<8x128xf32>
    %254 = vector.extract_strided_slice %241 {offsets = [0, 256], sizes = [8, 128], strides = [1, 1]} : vector<8x512xf32> to vector<8x128xf32>
    %255 = math.tanh %254 : vector<8x128xf32>
    %256 = vector.extract_strided_slice %241 {offsets = [0, 384], sizes = [8, 128], strides = [1, 1]} : vector<8x512xf32> to vector<8x128xf32>
    %257 = arith.negf %256 : vector<8x128xf32>
    %258 = math.exp %257 : vector<8x128xf32>
    %cst_86 = arith.constant 1.000000e+00 : f32
    %259 = vector.broadcast %cst_86 : f32 to vector<8x128xf32>
    %260 = arith.addf %259, %258 : vector<8x128xf32>
    %261 = arith.divf %259, %260 : vector<8x128xf32>
    %262 = arith.mulf %253, %229 : vector<8x128xf32>
    %263 = arith.mulf %247, %255 : vector<8x128xf32>
    %264 = arith.addf %262, %263 : vector<8x128xf32>
    %265 = math.tanh %264 : vector<8x128xf32>
    %266 = arith.mulf %261, %265 : vector<8x128xf32>
    %267 = arith.index_cast %c5_i32 : i32 to index
    %c0_87 = arith.constant 0 : index
    %c0_88 = arith.constant 0 : index
    %268 = vector.load %arg23[%267, %c0_87, %c0_88] : memref<8x8x128xf32, #tpu.memory_space<vmem>>, vector<1x8x128xf32>
    %269 = vector.shape_cast %268 : vector<1x8x128xf32> to vector<8x128xf32>
    %270 = vector.shape_cast %266 : vector<8x128xf32> to vector<1x8x128xf32>
    tpu.vector_store %arg23[%267, %c0_87, %c0_88], %270 {strides = array<i32>} : memref<8x8x128xf32, #tpu.memory_space<vmem>>, vector<1x8x128xf32>,
    %c6_i32 = arith.constant 6 : i32
    %271 = arith.index_cast %c6_i32 : i32 to index
    %c0_89 = arith.constant 0 : index
    %c0_90 = arith.constant 0 : index
    %272 = vector.load %arg22[%271, %c0_89, %c0_90] : memref<8x8x512xf32, #tpu.memory_space<vmem>>, vector<1x8x512xf32>
    %273 = vector.shape_cast %272 : vector<1x8x512xf32> to vector<8x512xf32>
    %274 = arith.truncf %266 : vector<8x128xf32> to vector<8x128xbf16>
    %cst_91 = arith.constant dense<0.000000e+00> : vector<8x512xf32>
    %275 = tpu.matmul %274, %58, %cst_91 {dimension_numbers = #tpu.dot_dimension_numbers<[1], [0], [0], [1], [0, 0, 1, 1], [], []>} : vector<8x128xbf16>, vector<128x512xbf16>, vector<8x512xf32> -> vector<8x512xf32>
    %276 = arith.addf %273, %275 : vector<8x512xf32>
    %277 = vector.extract_strided_slice %276 {offsets = [0, 0], sizes = [8, 128], strides = [1, 1]} : vector<8x512xf32> to vector<8x128xf32>
    %278 = arith.negf %277 : vector<8x128xf32>
    %279 = math.exp %278 : vector<8x128xf32>
    %cst_92 = arith.constant 1.000000e+00 : f32
    %280 = vector.broadcast %cst_92 : f32 to vector<8x128xf32>
    %281 = arith.addf %280, %279 : vector<8x128xf32>
    %282 = arith.divf %280, %281 : vector<8x128xf32>
    %283 = vector.extract_strided_slice %276 {offsets = [0, 128], sizes = [8, 128], strides = [1, 1]} : vector<8x512xf32> to vector<8x128xf32>
    %284 = arith.negf %283 : vector<8x128xf32>
    %285 = math.exp %284 : vector<8x128xf32>
    %cst_93 = arith.constant 1.000000e+00 : f32
    %286 = vector.broadcast %cst_93 : f32 to vector<8x128xf32>
    %287 = arith.addf %286, %285 : vector<8x128xf32>
    %288 = arith.divf %286, %287 : vector<8x128xf32>
    %289 = vector.extract_strided_slice %276 {offsets = [0, 256], sizes = [8, 128], strides = [1, 1]} : vector<8x512xf32> to vector<8x128xf32>
    %290 = math.tanh %289 : vector<8x128xf32>
    %291 = vector.extract_strided_slice %276 {offsets = [0, 384], sizes = [8, 128], strides = [1, 1]} : vector<8x512xf32> to vector<8x128xf32>
    %292 = arith.negf %291 : vector<8x128xf32>
    %293 = math.exp %292 : vector<8x128xf32>
    %cst_94 = arith.constant 1.000000e+00 : f32
    %294 = vector.broadcast %cst_94 : f32 to vector<8x128xf32>
    %295 = arith.addf %294, %293 : vector<8x128xf32>
    %296 = arith.divf %294, %295 : vector<8x128xf32>
    %297 = arith.mulf %288, %264 : vector<8x128xf32>
    %298 = arith.mulf %282, %290 : vector<8x128xf32>
    %299 = arith.addf %297, %298 : vector<8x128xf32>
    %300 = math.tanh %299 : vector<8x128xf32>
    %301 = arith.mulf %296, %300 : vector<8x128xf32>
    %302 = arith.index_cast %c6_i32 : i32 to index
    %c0_95 = arith.constant 0 : index
    %c0_96 = arith.constant 0 : index
    %303 = vector.load %arg23[%302, %c0_95, %c0_96] : memref<8x8x128xf32, #tpu.memory_space<vmem>>, vector<1x8x128xf32>
    %304 = vector.shape_cast %303 : vector<1x8x128xf32> to vector<8x128xf32>
    %305 = vector.shape_cast %301 : vector<8x128xf32> to vector<1x8x128xf32>
    tpu.vector_store %arg23[%302, %c0_95, %c0_96], %305 {strides = array<i32>} : memref<8x8x128xf32, #tpu.memory_space<vmem>>, vector<1x8x128xf32>,
    %c7_i32 = arith.constant 7 : i32
    %306 = arith.index_cast %c7_i32 : i32 to index
    %c0_97 = arith.constant 0 : index
    %c0_98 = arith.constant 0 : index
    %307 = vector.load %arg22[%306, %c0_97, %c0_98] : memref<8x8x512xf32, #tpu.memory_space<vmem>>, vector<1x8x512xf32>
    %308 = vector.shape_cast %307 : vector<1x8x512xf32> to vector<8x512xf32>
    %309 = arith.truncf %301 : vector<8x128xf32> to vector<8x128xbf16>
    %cst_99 = arith.constant dense<0.000000e+00> : vector<8x512xf32>
    %310 = tpu.matmul %309, %58, %cst_99 {dimension_numbers = #tpu.dot_dimension_numbers<[1], [0], [0], [1], [0, 0, 1, 1], [], []>} : vector<8x128xbf16>, vector<128x512xbf16>, vector<8x512xf32> -> vector<8x512xf32>
    %311 = arith.addf %308, %310 : vector<8x512xf32>
    %312 = vector.extract_strided_slice %311 {offsets = [0, 0], sizes = [8, 128], strides = [1, 1]} : vector<8x512xf32> to vector<8x128xf32>
    %313 = arith.negf %312 : vector<8x128xf32>
    %314 = math.exp %313 : vector<8x128xf32>
    %cst_100 = arith.constant 1.000000e+00 : f32
    %315 = vector.broadcast %cst_100 : f32 to vector<8x128xf32>
    %316 = arith.addf %315, %314 : vector<8x128xf32>
    %317 = arith.divf %315, %316 : vector<8x128xf32>
    %318 = vector.extract_strided_slice %311 {offsets = [0, 128], sizes = [8, 128], strides = [1, 1]} : vector<8x512xf32> to vector<8x128xf32>
    %319 = arith.negf %318 : vector<8x128xf32>
    %320 = math.exp %319 : vector<8x128xf32>
    %cst_101 = arith.constant 1.000000e+00 : f32
    %321 = vector.broadcast %cst_101 : f32 to vector<8x128xf32>
    %322 = arith.addf %321, %320 : vector<8x128xf32>
    %323 = arith.divf %321, %322 : vector<8x128xf32>
    %324 = vector.extract_strided_slice %311 {offsets = [0, 256], sizes = [8, 128], strides = [1, 1]} : vector<8x512xf32> to vector<8x128xf32>
    %325 = math.tanh %324 : vector<8x128xf32>
    %326 = vector.extract_strided_slice %311 {offsets = [0, 384], sizes = [8, 128], strides = [1, 1]} : vector<8x512xf32> to vector<8x128xf32>
    %327 = arith.negf %326 : vector<8x128xf32>
    %328 = math.exp %327 : vector<8x128xf32>
    %cst_102 = arith.constant 1.000000e+00 : f32
    %329 = vector.broadcast %cst_102 : f32 to vector<8x128xf32>
    %330 = arith.addf %329, %328 : vector<8x128xf32>
    %331 = arith.divf %329, %330 : vector<8x128xf32>
    %332 = arith.mulf %323, %299 : vector<8x128xf32>
    %333 = arith.mulf %317, %325 : vector<8x128xf32>
    %334 = arith.addf %332, %333 : vector<8x128xf32>
    %335 = math.tanh %334 : vector<8x128xf32>
    %336 = arith.mulf %331, %335 : vector<8x128xf32>
    %337 = arith.index_cast %c7_i32 : i32 to index
    %c0_103 = arith.constant 0 : index
    %c0_104 = arith.constant 0 : index
    %338 = vector.load %arg23[%337, %c0_103, %c0_104] : memref<8x8x128xf32, #tpu.memory_space<vmem>>, vector<1x8x128xf32>
    %339 = vector.shape_cast %338 : vector<1x8x128xf32> to vector<8x128xf32>
    %340 = vector.shape_cast %336 : vector<8x128xf32> to vector<1x8x128xf32>
    tpu.vector_store %arg23[%337, %c0_103, %c0_104], %340 {strides = array<i32>} : memref<8x8x128xf32, #tpu.memory_space<vmem>>, vector<1x8x128xf32>,
    %c8_i32 = arith.constant 8 : i32
    %c0_105 = arith.constant 0 : index
    %c0_106 = arith.constant 0 : index
    %c0_107 = arith.constant 0 : index
    %341 = vector.load %arg23[%c0_105, %c0_106, %c0_107] : memref<8x8x128xf32, #tpu.memory_space<vmem>>, vector<8x8x128xf32>
    %c0_108 = arith.constant 0 : index
    %c0_109 = arith.constant 0 : index
    %342 = vector.load %arg9[%c0_108, %c0_109] : memref<128x128xf32, #tpu.memory_space<vmem>>, vector<128x128xf32>
    %cst_110 = arith.constant dense<0.000000e+00> : vector<8x128xf32>
    %343 = vector.multi_reduction <add>, %341, %cst_110 [0] : vector<8x8x128xf32> to vector<8x128xf32>
    %cst_111 = arith.constant 8.000000e+00 : f32
    %344 = vector.broadcast %cst_111 : f32 to vector<8x128xf32>
    %345 = arith.divf %343, %344 : vector<8x128xf32>
    %cst_112 = arith.constant dense<0.000000e+00> : vector<8x128xf32>
    %346 = tpu.matmul %345, %342, %cst_112 {dimension_numbers = #tpu.dot_dimension_numbers<[1], [0], [0], [1], [0, 0, 1, 1], [], []>} : vector<8x128xf32>, vector<128x128xf32>, vector<8x128xf32> -> vector<8x128xf32>
    %347 = vector.shape_cast %346 : vector<8x128xf32> to vector<1x8x128xf32>
    %348 = vector.broadcast %347 : vector<1x8x128xf32> to vector<8x8x128xf32>
    %349 = arith.subf %341, %348 : vector<8x8x128xf32>
    %350 = arith.mulf %349, %349 : vector<8x8x128xf32>
    %cst_113 = arith.constant dense<0.000000e+00> : vector<8x128xf32>
    %351 = vector.multi_reduction <add>, %350, %cst_113 [0] : vector<8x8x128xf32> to vector<8x128xf32>
    %cst_114 = arith.constant 8.000000e+00 : f32
    %352 = vector.broadcast %cst_114 : f32 to vector<8x128xf32>
    %353 = arith.divf %351, %352 : vector<8x128xf32>
    %cst_115 = arith.constant dense<0.000000e+00> : vector<8x128xf32>
    %354 = tpu.matmul %353, %342, %cst_115 {dimension_numbers = #tpu.dot_dimension_numbers<[1], [0], [0], [1], [0, 0, 1, 1], [], []>} : vector<8x128xf32>, vector<128x128xf32>, vector<8x128xf32> -> vector<8x128xf32>
    %355 = vector.shape_cast %354 : vector<8x128xf32> to vector<1x8x128xf32>
    %cst_116 = arith.constant 9.99999974E-6 : f32
    %356 = vector.broadcast %cst_116 : f32 to vector<1x8x128xf32>
    %357 = arith.addf %355, %356 : vector<1x8x128xf32>
    %358 = math.rsqrt %357 : vector<1x8x128xf32>
    %359 = vector.broadcast %358 : vector<1x8x128xf32> to vector<8x8x128xf32>
    %360 = arith.mulf %349, %359 : vector<8x8x128xf32>
    %c0_117 = arith.constant 0 : index
    %c0_118 = arith.constant 0 : index
    %361 = vector.load %arg10[%c0_117, %c0_118] : memref<1x128xf32, #tpu.memory_space<vmem>>, vector<1x128xf32>
    %362 = vector.shape_cast %361 : vector<1x128xf32> to vector<1x1x128xf32>
    %363 = vector.broadcast %362 : vector<1x1x128xf32> to vector<8x8x128xf32>
    %364 = arith.mulf %360, %363 : vector<8x8x128xf32>
    %c0_119 = arith.constant 0 : index
    %c0_120 = arith.constant 0 : index
    %365 = vector.load %arg11[%c0_119, %c0_120] : memref<1x128xf32, #tpu.memory_space<vmem>>, vector<1x128xf32>
    %366 = vector.shape_cast %365 : vector<1x128xf32> to vector<1x1x128xf32>
    %367 = vector.broadcast %366 : vector<1x1x128xf32> to vector<8x8x128xf32>
    %368 = arith.addf %364, %367 : vector<8x8x128xf32>
    %369 = vector.shape_cast %368 : vector<8x8x128xf32> to vector<64x128xf32>
    %370 = arith.truncf %369 : vector<64x128xf32> to vector<64x128xbf16>
    %c0_121 = arith.constant 0 : index
    %c0_122 = arith.constant 0 : index
    %371 = vector.load %arg12[%c0_121, %c0_122] : memref<128x384xbf16, #tpu.memory_space<vmem>>, vector<128x384xbf16>
    %cst_123 = arith.constant dense<0.000000e+00> : vector<64x384xf32>
    %372 = tpu.matmul %370, %371, %cst_123 {dimension_numbers = #tpu.dot_dimension_numbers<[1], [0], [0], [1], [0, 0, 1, 1], [], []>} : vector<64x128xbf16>, vector<128x384xbf16>, vector<64x384xf32> -> vector<64x384xf32>
    %c0_124 = arith.constant 0 : index
    %c0_125 = arith.constant 0 : index
    %373 = vector.load %arg13[%c0_124, %c0_125] : memref<1x384xf32, #tpu.memory_space<vmem>>, vector<1x384xf32>
    %374 = vector.broadcast %373 : vector<1x384xf32> to vector<64x384xf32>
    %375 = arith.addf %372, %374 : vector<64x384xf32>
    %376 = vector.extract_strided_slice %375 {offsets = [0, 0], sizes = [64, 128], strides = [1, 1]} : vector<64x384xf32> to vector<64x128xf32>
    %377 = arith.negf %376 : vector<64x128xf32>
    %378 = math.exp %377 : vector<64x128xf32>
    %cst_126 = arith.constant 1.000000e+00 : f32
    %379 = vector.broadcast %cst_126 : f32 to vector<64x128xf32>
    %380 = arith.addf %379, %378 : vector<64x128xf32>
    %381 = arith.divf %379, %380 : vector<64x128xf32>
    %382 = vector.extract_strided_slice %375 {offsets = [0, 128], sizes = [64, 128], strides = [1, 1]} : vector<64x384xf32> to vector<64x128xf32>
    %383 = arith.negf %382 : vector<64x128xf32>
    %384 = math.exp %383 : vector<64x128xf32>
    %cst_127 = arith.constant 1.000000e+00 : f32
    %385 = vector.broadcast %cst_127 : f32 to vector<64x128xf32>
    %386 = arith.addf %385, %384 : vector<64x128xf32>
    %387 = arith.divf %385, %386 : vector<64x128xf32>
    %388 = vector.extract_strided_slice %375 {offsets = [0, 256], sizes = [64, 128], strides = [1, 1]} : vector<64x384xf32> to vector<64x128xf32>
    %389 = math.tanh %388 : vector<64x128xf32>
    %390 = arith.mulf %387, %369 : vector<64x128xf32>
    %391 = arith.mulf %381, %389 : vector<64x128xf32>
    %392 = arith.addf %390, %391 : vector<64x128xf32>
    %393 = arith.truncf %392 : vector<64x128xf32> to vector<64x128xbf16>
    %c0_128 = arith.constant 0 : index
    %c0_129 = arith.constant 0 : index
    %394 = vector.load %arg14[%c0_128, %c0_129] : memref<128x128xbf16, #tpu.memory_space<vmem>>, vector<128x128xbf16>
    %cst_130 = arith.constant dense<0.000000e+00> : vector<64x128xf32>
    %395 = tpu.matmul %393, %394, %cst_130 {dimension_numbers = #tpu.dot_dimension_numbers<[1], [0], [0], [1], [0, 0, 1, 1], [], []>} : vector<64x128xbf16>, vector<128x128xbf16>, vector<64x128xf32> -> vector<64x128xf32>
    %c0_131 = arith.constant 0 : index
    %c0_132 = arith.constant 0 : index
    %396 = vector.load %arg15[%c0_131, %c0_132] : memref<1x128xf32, #tpu.memory_space<vmem>>, vector<1x128xf32>
    %397 = vector.broadcast %396 : vector<1x128xf32> to vector<64x128xf32>
    %398 = arith.addf %395, %397 : vector<64x128xf32>
    %399 = arith.truncf %398 : vector<64x128xf32> to vector<64x128xbf16>
    %c0_133 = arith.constant 0 : index
    %c0_134 = arith.constant 0 : index
    %400 = vector.load %arg16[%c0_133, %c0_134] : memref<128x128xbf16, #tpu.memory_space<vmem>>, vector<128x128xbf16>
    %cst_135 = arith.constant dense<0.000000e+00> : vector<64x128xf32>
    %401 = tpu.matmul %399, %400, %cst_135 {dimension_numbers = #tpu.dot_dimension_numbers<[1], [0], [0], [1], [0, 0, 1, 1], [], []>} : vector<64x128xbf16>, vector<128x128xbf16>, vector<64x128xf32> -> vector<64x128xf32>
    %c0_136 = arith.constant 0 : index
    %c0_137 = arith.constant 0 : index
    %402 = vector.load %arg17[%c0_136, %c0_137] : memref<1x128xf32, #tpu.memory_space<vmem>>, vector<1x128xf32>
    %403 = vector.broadcast %402 : vector<1x128xf32> to vector<64x128xf32>
    %404 = arith.addf %401, %403 : vector<64x128xf32>
    %405 = arith.truncf %404 : vector<64x128xf32> to vector<64x128xbf16>
    %c0_138 = arith.constant 0 : index
    %c0_139 = arith.constant 0 : index
    %406 = vector.load %arg18[%c0_138, %c0_139] : memref<128x128xbf16, #tpu.memory_space<vmem>>, vector<128x128xbf16>
    %cst_140 = arith.constant dense<0.000000e+00> : vector<64x128xf32>
    %407 = tpu.matmul %405, %406, %cst_140 {dimension_numbers = #tpu.dot_dimension_numbers<[1], [0], [0], [1], [0, 0, 1, 1], [], []>} : vector<64x128xbf16>, vector<128x128xbf16>, vector<64x128xf32> -> vector<64x128xf32>
    %c0_141 = arith.constant 0 : index
    %c0_142 = arith.constant 0 : index
    %408 = vector.load %arg19[%c0_141, %c0_142] : memref<1x128xf32, #tpu.memory_space<vmem>>, vector<1x128xf32>
    %409 = vector.broadcast %408 : vector<1x128xf32> to vector<64x128xf32>
    %410 = arith.addf %407, %409 : vector<64x128xf32>
    %c0_143 = arith.constant 0 : index
    %c0_144 = arith.constant 0 : index
    %411 = vector.load %arg20[%c0_143, %c0_144] : memref<64x128xf32, #tpu.memory_space<vmem>>, vector<64x128xf32>
    tpu.vector_store %arg20[%c0_143, %c0_144], %410 {strides = array<i32>} : memref<64x128xf32, #tpu.memory_space<vmem>>, vector<64x128xf32>,
    return
  }
  func.func @transform_0(%arg0: i32) -> (i32, i32) {
    %c0_i32 = arith.constant 0 : i32
    %c0_i32_0 = arith.constant 0 : i32
    return %arg0, %c0_i32 : i32, i32
  }
  func.func @transform_1(%arg0: i32) -> (i32, i32) {
    %c0_i32 = arith.constant 0 : i32
    %c0_i32_0 = arith.constant 0 : i32
    %c0_i32_1 = arith.constant 0 : i32
    return %c0_i32, %c0_i32_0 : i32, i32
  }
  func.func @transform_2(%arg0: i32) -> (i32, i32) {
    %c0_i32 = arith.constant 0 : i32
    %c0_i32_0 = arith.constant 0 : i32
    %c0_i32_1 = arith.constant 0 : i32
    return %c0_i32, %c0_i32_0 : i32, i32
  }
  func.func @transform_3(%arg0: i32) -> (i32, i32) {
    %c0_i32 = arith.constant 0 : i32
    %c0_i32_0 = arith.constant 0 : i32
    %c0_i32_1 = arith.constant 0 : i32
    return %c0_i32, %c0_i32_0 : i32, i32
  }
  func.func @transform_4(%arg0: i32) -> (i32, i32) {
    %c0_i32 = arith.constant 0 : i32
    %c0_i32_0 = arith.constant 0 : i32
    %c0_i32_1 = arith.constant 0 : i32
    return %c0_i32, %c0_i32_0 : i32, i32
  }
  func.func @transform_5(%arg0: i32) -> (i32, i32) {
    %c0_i32 = arith.constant 0 : i32
    %c0_i32_0 = arith.constant 0 : i32
    %c0_i32_1 = arith.constant 0 : i32
    return %c0_i32, %c0_i32_0 : i32, i32
  }
  func.func @transform_6(%arg0: i32) -> (i32, i32) {
    %c0_i32 = arith.constant 0 : i32
    %c0_i32_0 = arith.constant 0 : i32
    %c0_i32_1 = arith.constant 0 : i32
    return %c0_i32, %c0_i32_0 : i32, i32
  }
  func.func @transform_7(%arg0: i32) -> (i32, i32) {
    %c0_i32 = arith.constant 0 : i32
    %c0_i32_0 = arith.constant 0 : i32
    %c0_i32_1 = arith.constant 0 : i32
    return %c0_i32, %c0_i32_0 : i32, i32
  }
  func.func @transform_8(%arg0: i32) -> (i32, i32) {
    %c0_i32 = arith.constant 0 : i32
    %c0_i32_0 = arith.constant 0 : i32
    %c0_i32_1 = arith.constant 0 : i32
    return %c0_i32, %c0_i32_0 : i32, i32
  }
  func.func @transform_9(%arg0: i32) -> (i32, i32) {
    %c0_i32 = arith.constant 0 : i32
    %c0_i32_0 = arith.constant 0 : i32
    %c0_i32_1 = arith.constant 0 : i32
    return %c0_i32, %c0_i32_0 : i32, i32
  }
  func.func @transform_10(%arg0: i32) -> (i32, i32) {
    %c0_i32 = arith.constant 0 : i32
    %c0_i32_0 = arith.constant 0 : i32
    %c0_i32_1 = arith.constant 0 : i32
    return %c0_i32, %c0_i32_0 : i32, i32
  }
  func.func @transform_11(%arg0: i32) -> (i32, i32) {
    %c0_i32 = arith.constant 0 : i32
    %c0_i32_0 = arith.constant 0 : i32
    %c0_i32_1 = arith.constant 0 : i32
    return %c0_i32, %c0_i32_0 : i32, i32
  }
  func.func @transform_12(%arg0: i32) -> (i32, i32) {
    %c0_i32 = arith.constant 0 : i32
    %c0_i32_0 = arith.constant 0 : i32
    %c0_i32_1 = arith.constant 0 : i32
    return %c0_i32, %c0_i32_0 : i32, i32
  }
  func.func @transform_13(%arg0: i32) -> (i32, i32) {
    %c0_i32 = arith.constant 0 : i32
    %c0_i32_0 = arith.constant 0 : i32
    %c0_i32_1 = arith.constant 0 : i32
    return %c0_i32, %c0_i32_0 : i32, i32
  }
  func.func @transform_14(%arg0: i32) -> (i32, i32) {
    %c0_i32 = arith.constant 0 : i32
    %c0_i32_0 = arith.constant 0 : i32
    %c0_i32_1 = arith.constant 0 : i32
    return %c0_i32, %c0_i32_0 : i32, i32
  }
  func.func @transform_15(%arg0: i32) -> (i32, i32) {
    %c0_i32 = arith.constant 0 : i32
    %c0_i32_0 = arith.constant 0 : i32
    %c0_i32_1 = arith.constant 0 : i32
    return %c0_i32, %c0_i32_0 : i32, i32
  }
  func.func @transform_16(%arg0: i32) -> (i32, i32) {
    %c0_i32 = arith.constant 0 : i32
    %c0_i32_0 = arith.constant 0 : i32
    %c0_i32_1 = arith.constant 0 : i32
    return %c0_i32, %c0_i32_0 : i32, i32
  }
  func.func @transform_17(%arg0: i32) -> (i32, i32) {
    %c0_i32 = arith.constant 0 : i32
    %c0_i32_0 = arith.constant 0 : i32
    %c0_i32_1 = arith.constant 0 : i32
    return %c0_i32, %c0_i32_0 : i32, i32
  }
  func.func @transform_18(%arg0: i32) -> (i32, i32) {
    %c0_i32 = arith.constant 0 : i32
    %c0_i32_0 = arith.constant 0 : i32
    %c0_i32_1 = arith.constant 0 : i32
    return %c0_i32, %c0_i32_0 : i32, i32
  }
  func.func @transform_19(%arg0: i32) -> (i32, i32) {
    %c0_i32 = arith.constant 0 : i32
    %c0_i32_0 = arith.constant 0 : i32
    return %arg0, %c0_i32 : i32, i32
  }
}

</mosaic_0001>

<bundles_post_ra>
// kernel: tpu_custom_call.1
= control target key start
LH: loop header
LB: loop body
LE: loop exit
PB: predicated region body
PF: predicated region fallthrough
CT: control target
= control target key end

     0   :  { %s6213_s0 = inlined_call_operand.hbm [shape: f32[64,128], index: 0, kind: input, shape index: {}]   ;;  %s6214_s1 = inlined_call_operand.hbm [shape: bf16[384,128], index: 1, kind: input, shape index: {}]   ;;  %s6215_s2 = inlined_call_operand.hbm [shape: f32[1,128], index: 2, kind: input, shape index: {}]   ;;  %s6216_s3 = inlined_call_operand.hbm [shape: f32[1,128], index: 3, kind: input, shape index: {}]   ;;  %s6217_s4 = inlined_call_operand.hbm [shape: f32[1,128], index: 4, kind: input, shape index: {}]   ;;  %s6218_s5 = inlined_call_operand.hbm [shape: bf16[128,512], index: 5, kind: input, shape index: {}]   ;;  %s6219_s6 = inlined_call_operand.hbm [shape: bf16[128,512], index: 6, kind: input, shape index: {}]   ;;  %s6220_s7 = inlined_call_operand.vmem [shape: f32[1,512], index: 7, kind: input, shape index: {}]   ;;  %s6221_s8 = inlined_call_operand.hbm [shape: f32[128,128], index: 8, kind: input, shape index: {}]   ;;  %s6222_s9 = inlined_call_operand.vmem [shape: f32[1,128], index: 9, kind: input, shape index: {}]   ;;  %s6223_s10 = inlined_call_operand.vmem [shape: f32[1,128], index: 10, kind: input, shape index: {}]   ;;  %s6224_s11 = inlined_call_operand.hbm [shape: bf16[128,384], index: 11, kind: input, shape index: {}]   ;;  %s6225_s12 = inlined_call_operand.vmem [shape: f32[1,384], index: 12, kind: input, shape index: {}]   ;;  %s6226_s13 = inlined_call_operand.hbm [shape: bf16[128,128], index: 13, kind: input, shape index: {}]   ;;  %s6227_s14 = inlined_call_operand.vmem [shape: f32[1,128], index: 14, kind: input, shape index: {}]   ;;  %s6228_s15 = inlined_call_operand.hbm [shape: bf16[128,128], index: 15, kind: input, shape index: {}]   ;;  %s6229_s16 = inlined_call_operand.vmem [shape: f32[1,128], index: 16, kind: input, shape index: {}]   ;;  %s6230_s17 = inlined_call_operand.hbm [shape: bf16[128,128], index: 17, kind: input, shape index: {}]   ;;  %s6231_s18 = inlined_call_operand.vmem [shape: f32[1,128], index: 18, kind: input, shape index: {}]   ;;  %s6232_s19 = inlined_call_operand.hbm [shape: f32[64,128], index: 19, kind: output, shape index: {}]  }
   0x1   :  { %6243 = sst [smem:[#allocation58_spill]] %s6213_s0 }
   0x2   :  { %6244 = sst [smem:[#allocation59_spill]] %s6214_s1 }
   0x3   :  { %6245 = sst [smem:[#allocation60_spill]] %s6215_s2 }
   0x4   :  { %6246 = sst [smem:[#allocation61_spill]] %s6216_s3 }
   0x5   :  { %6247 = sst [smem:[#allocation62_spill]] %s6232_s19 }
   0x6   :  { %24 = vsyncpa [#allocation6], 0 }
   0x7   :  { %25 = vsyncpa [#allocation9], 0 }
   0x8   :  { %26 = vsyncpa [#allocation12], 0 }
   0x9   :  { %27 = vsyncpa [#allocation15], 0 }
   0xa   :  { %28 = vsyncpa [#allocation18], 0 }
   0xb   :  { %29 = vsyncpa [#allocation21], 0 }
   0xc   :  { %30 = vsyncpa [#allocation24], 0  ;;  %s6248_s20 = sld [smem:[#allocation59_spill]] }
  0x12   :  { %s49_s21 = sshll.u32 %s6248_s20, 4  ;;  %s50_s21 = int_to_ptr.hbm [resolvable:$true] %s49_s21 }
  0x13   :  { %31 = vsyncpa [#allocation7], 0  ;;  %s4888_s1 = smov [#allocation8]   ;;  %s6249_s24 = sld [smem:[#allocation61_spill]] }
  0x14   :  { %s51_s22 = sshll.u32 %s4888_s1, 4  ;;  %s4889_s3 = smov 64   ;;  %s52_s22 = int_to_ptr.vmem [resolvable:$true] %s51_s22 }
  0x15   :  { %s4890_s26 = smov 4   ;;  %s4891_s27 = smov [#allocation11]  }
  0x16   :  { %57 = dma.hbm_to_vmem [thread:$0]  %s50_s21, 3072, %s52_s22, [#allocation9], %s4889_s3, %s4889_s3, %s4890_s26  }
  0x17   :  { %s76_s28 = sshll.u32 %s4891_s27, 4  ;;  %s95_s30 = sshll.u32 %s6218_s5, 4  ;;  %s77_s28 = int_to_ptr.vmem [resolvable:$true] %s76_s28  ;;  %s96_s30 = int_to_ptr.hbm [resolvable:$true] %s95_s30 }
  0x18   :  { %s4892_s20 = smov [#allocation14]   ;;  %s6233_s2 = smov 256  }
  0x19   :  { %s74_s25 = sshll.u32 %s6249_s24, 4  ;;  %s97_s1 = sshll.u32 %s4892_s20, 4  ;;  %s75_s25 = int_to_ptr.hbm [resolvable:$true] %s74_s25  ;;  %s98_s1 = int_to_ptr.vmem [resolvable:$true] %s97_s1 }
  0x1a   :  { %79 = dma.hbm_to_vmem [thread:$0]  %s75_s25, 16, %s77_s28, [#allocation12]  }
  0x1b   :  { %s6234_s23 = smov 16   ;;  %s123_s24 = sshll.u32 %s6221_s8, 4  ;;  %s124_s24 = int_to_ptr.hbm [resolvable:$true] %s123_s24 }
  0x1c   :  { %103 = dma.hbm_to_vmem [thread:$0]  %s96_s30, 4096, %s98_s1, [#allocation15], %s6233_s2, %s6233_s2, %s6234_s23  }
  0x1d   :  { %s4895_s27 = smov [#allocation17]   ;;  %s155_s25 = sshll.u32 %s6226_s13, 4  ;;  %s156_s25 = int_to_ptr.hbm [resolvable:$true] %s155_s25 }
  0x1e   :  { %s125_s29 = sshll.u32 %s4895_s27, 4  ;;  %s4896_s28 = smov 128   ;;  %s126_s29 = int_to_ptr.vmem [resolvable:$true] %s125_s29 }
  0x1f   :  { %s4897_s20 = smov 8   ;;  %s6250_s2 = sld [smem:[#allocation58_spill]] }
  0x20   :  { %131 = dma.hbm_to_vmem [thread:$0]  %s124_s24, 2048, %s126_s29, [#allocation18], %s4896_s28, %s4896_s28, %s4897_s20  }
  0x21   :  { %s4898_s8 = smov [#allocation20]   ;;  %s4899_s13 = smov [#allocation5]  }
  0x22   :  { %s157_s22 = sshll.u32 %s4898_s8, 4  ;;  %s38_s27 = sshll.u32 %s4899_s13, 4  ;;  %s158_s22 = int_to_ptr.vmem [resolvable:$true] %s157_s22  ;;  %s39_s27 = int_to_ptr.vmem [resolvable:$true] %s38_s27 }
  0x23   :  { %163 = dma.hbm_to_vmem [thread:$0]  %s156_s25, 1024, %s158_s22, [#allocation21], %s4889_s3, %s4889_s3, %s4890_s26  }
  0x24   :  { %s6251_s23 = sld [smem:[#allocation60_spill]]  ;;  %s85_s29 = sshll.u32 %s6217_s4, 4  ;;  %s86_s29 = int_to_ptr.hbm [resolvable:$true] %s85_s29 }
  0x25   :  { %s36_s21 = sshll.u32 %s6250_s2, 4  ;;  %s4900_s30 = smov [#allocation10]   ;;  %s37_s21 = int_to_ptr.hbm [resolvable:$true] %s36_s21 }
  0x26   :  { %44 = dma.hbm_to_vmem [thread:$0]  %s37_s21, 1024, %s39_s27, [#allocation6], %s4896_s28, %s4896_s28, %s4897_s20  }
  0x27   :  { %s65_s1 = sshll.u32 %s4900_s30, 4  ;;  %s4901_s25 = smov [#allocation13]   ;;  %s66_s1 = int_to_ptr.vmem [resolvable:$true] %s65_s1 }
  0x28   :  { %s87_s8 = sshll.u32 %s4901_s25, 4  ;;  %s140_s27 = sshll.u32 %s6224_s11, 4  ;;  %s88_s8 = int_to_ptr.vmem [resolvable:$true] %s87_s8  ;;  %s141_s27 = int_to_ptr.hbm [resolvable:$true] %s140_s27 }
  0x29   :  { %90 = dma.hbm_to_vmem [thread:$0]  %s86_s29, 16, %s88_s8, [#allocation12]  }
  0x2a   :  { %s63_s19 = sshll.u32 %s6251_s23, 4  ;;  %s108_s23 = sshll.u32 %s6219_s6, 4  ;;  %s64_s19 = int_to_ptr.hbm [resolvable:$true] %s63_s19  ;;  %s109_s23 = int_to_ptr.hbm [resolvable:$true] %s108_s23 }
  0x2b   :  { %68 = dma.hbm_to_vmem [thread:$0]  %s64_s19, 16, %s66_s1, [#allocation9]  }
  0x2c   :  { %s4902_s0 = smov [#allocation16]   ;;  %s6252_s2 = smov 16  }
  0x2d   :  { %s110_s4 = sshll.u32 %s4902_s0, 4  ;;  %s6253_s24 = smov 256   ;;  %s111_s4 = int_to_ptr.vmem [resolvable:$true] %s110_s4 }
  0x2e   :  { %116 = dma.hbm_to_vmem [thread:$0]  %s109_s23, 4096, %s111_s4, [#allocation15], %s6253_s24, %s6253_s24, %s6252_s2  }
  0x2f   :  { %s4903_s19 = smov [#allocation19]   ;;  %s4904_s1 = smov 192  }
  0x30   :  { %s142_s30 = sshll.u32 %s4903_s19, 4  ;;  %s4905_s6 = smov 12   ;;  %s143_s30 = int_to_ptr.vmem [resolvable:$true] %s142_s30 }
  0x31   :  { %148 = dma.hbm_to_vmem [thread:$0]  %s141_s27, 3072, %s143_s30, [#allocation18], %s4904_s1, %s4904_s1, %s4905_s6  }
  0x32   :  { %s170_s8 = sshll.u32 %s6228_s15, 4  ;;  %s4906_s11 = smov [#allocation22]   ;;  %s171_s8 = int_to_ptr.hbm [resolvable:$true] %s170_s8 }
  0x33   :  { %s172_s22 = sshll.u32 %s4906_s11, 4  ;;  %s185_s21 = sshll.u32 %s6230_s17, 4  ;;  %s173_s22 = int_to_ptr.vmem [resolvable:$true] %s172_s22  ;;  %s186_s21 = int_to_ptr.hbm [resolvable:$true] %s185_s21 }
  0x34   :  { %178 = dma.hbm_to_vmem [thread:$0]  %s171_s8, 1024, %s173_s22, [#allocation21], %s4889_s3, %s4889_s3, %s4890_s26  }
  0x35   :  { %s4907_s23 = smov [#allocation23]  }
  0x36   :  { %s187_s0 = sshll.u32 %s4907_s23, 4  ;;  %s188_s0 = int_to_ptr.vmem [resolvable:$true] %s187_s0 }
  0x37   :  { %193 = dma.hbm_to_vmem [thread:$0]  %s186_s21, 1024, %s188_s0, [#allocation24], %s4889_s3, %s4889_s3, %s4890_s26  }
  0x38   :  { %4872 = dma.done.wait [#allocation6], 1024  }
  0x39   :  { %4873 = vsyncadd [#allocation6], 4294966272 }
  0x3a   :  { %4874 = dma.done.wait [#allocation9], 3088  }
  0x3b   :  { %4875 = vsyncadd [#allocation9], 4294964208 }
  0x3c   :  { %4876 = dma.done.wait [#allocation12], 32  }
  0x3d   :  { %4877 = vsyncadd [#allocation12], 4294967264 }
  0x3e   :  { %4878 = dma.done.wait [#allocation15], 8192  }
  0x3f   :  { %4879 = vsyncadd [#allocation15], 4294959104 }
  0x40   :  { %4880 = dma.done.wait [#allocation18], 5120  }
  0x41   :  { %4881 = vsyncadd [#allocation18], 4294962176 }
  0x42   :  { %4882 = dma.done.wait [#allocation21], 2048  }
  0x43   :  { %4883 = vsyncadd [#allocation21], 4294965248 }
  0x44   :  { %4884 = dma.done.wait [#allocation24], 1024  }
  0x45   :  { %4885 = vsyncadd [#allocation24], 4294966272  ;;  %v4094_v0 = vld [vmem:[#allocation8 + $0x78] sm:$0xff]  ;;  %v4093_v2 = vld [vmem:[#allocation8 + $0x70] sm:$0xff]  ;;  %v4908_v27 = vmov 0   ;;  %s6342_s6 = sld [smem:[#allocation62_spill]] }
  0x46   :  { %v4086_v1 = vld [vmem:[#allocation8 + $0x38] sm:$0xff]  ;;  %4276 = vmatpush.bf16.msra.mxu2 %v4094_v0  ;;  %v4085_v3 = vld [vmem:[#allocation8 + $0x30] sm:$0xff]  ;;  %384 = vmatpush.bf16.msra.mxu0 %v4094_v0  ;;  %v4092_v4 = vld [vmem:[#allocation8 + $0x68] sm:$0xff]  ;;  %245 = vst [vmem:[#allocation2] sm:$0xf] %v4908_v27 }
  0x47   :  { %4284 = vmatpush.bf16.msra.mxu3 %v4086_v1  ;;  %471 = vmatpush.bf16.msra.mxu1 %v4086_v1  ;;  %v250_v5 = vld [vmem:[#allocation5 + $0x18] sm:$0xff]  ;;  %v251_v6 = vld [vmem:[#allocation5 + $0x20] sm:$0xff]  ;;  %v4084_v7 = vld [vmem:[#allocation8 + $0x28] sm:$0xff]  ;;  %246 = vst [vmem:[#allocation2 + $0x24] sm:$0xf] %v4908_v27 }
  0x48   :  { %v252_v8 = vld [vmem:[#allocation5 + $0x28] sm:$0xff]  ;;  %v253_v9 = vld [vmem:[#allocation5 + $0x30] sm:$0xff]  ;;  %v4227_v10 = vpack.c.bf16 %v251_v6, %v250_v5  ;;  %v4091_v12 = vld [vmem:[#allocation8 + $0x60] sm:$0xff] }
  0x49   :  { %v5072_v11 = vpack.c.bf16 %v253_v9, %v252_v8  ;;  %v254_v13 = vld [vmem:[#allocation5 + $0x38] sm:$0xff]  ;;  %v4083_v14 = vld [vmem:[#allocation8 + $0x20] sm:$0xff]  ;;  %v248_v19 = vld [vmem:[#allocation5 + $0x8] sm:$0xff] }
  0x4a   :  { %4277 = vmatpush.bf16.msra.mxu2 %v4093_v2  ;;  %385 = vmatpush.bf16.msra.mxu0 %v4093_v2  ;;  %4251 = vst [vmem:[#allocation2 + $0x10] sm:$0xff] %v4227_v10   ;;  %v262_v15 = vpack.c.bf16 %v254_v13, %v254_v13  ;;  %v4090_v16 = vld [vmem:[#allocation8 + $0x58] sm:$0xff]  ;;  %v247_v18 = vld [vmem:[#allocation5] sm:$0xff]  ;;  %v4089_v20 = vld [vmem:[#allocation8 + $0x50] sm:$0xff] }
  0x4b   :  { %4285 = vmatpush.bf16.msra.mxu3 %v4085_v3  ;;  %472 = vmatpush.bf16.msra.mxu1 %v4085_v3  ;;  %4252 = vst [vmem:[#allocation2 + $0x18] sm:$0xff] %v5072_v11   ;;  %v4082_v17 = vld [vmem:[#allocation8 + $0x18] sm:$0xff]  ;;  %v4081_v21 = vld [vmem:[#allocation8 + $0x10] sm:$0xff]  ;;  %v255_v23 = vpack.c.bf16 %v247_v18, %v247_v18  ;;  %v4088_v25 = vld [vmem:[#allocation8 + $0x48] sm:$0xff]  ;;  %s3459_s25 = sshll.u32 %s6342_s6, 4  ;;  %s3460_s25 = int_to_ptr.hbm [resolvable:$true] %s3459_s25 }
  0x4c   :  { %270 = vst [vmem:[#allocation2 + $0x20] sm:$0xf] %v262_v15  ;;  %v249_v22 = vld [vmem:[#allocation5 + $0x10] sm:$0xff]  ;;  %v4080_v26 = vld [vmem:[#allocation8 + $0x8] sm:$0xff]  ;;  %v4087_v28 = vld [vmem:[#allocation8 + $0x40] sm:$0xff] }
  0x4d   :  { %v4222_v24 = vpack.c.bf16 %v249_v22, %v248_v19  ;;  %263 = vst [vmem:[#allocation2 + $0x4] sm:$0xf] %v255_v23  ;;  %v4079_v29 = vld [vmem:[#allocation8] sm:$0xff]  ;;  %v4106_v30 = vld [vmem:[#allocation8 + $0xb8] sm:$0xff]  ;;  %v4105_v33 = vld [vmem:[#allocation8 + $0xb0] sm:$0xff] }
  0x4e   :  { %4278 = vmatpush.bf16.msra.mxu2 %v4092_v4  ;;  %386 = vmatpush.bf16.msra.mxu0 %v4092_v4  ;;  %v4104_v35 = vld [vmem:[#allocation8 + $0xa8] sm:$0xff]  ;;  %v4103_v36 = vld [vmem:[#allocation8 + $0xa0] sm:$0xff]  ;;  %v4102_v37 = vld [vmem:[#allocation8 + $0x98] sm:$0xff] }
  0x4f   :  { %4286 = vmatpush.bf16.msra.mxu3 %v4084_v7  ;;  %473 = vmatpush.bf16.msra.mxu1 %v4084_v7  ;;  %4250 = vst [vmem:[#allocation2 + $0x8] sm:$0xff] %v4222_v24   ;;  %v4101_v40 = vld [vmem:[#allocation8 + $0x90] sm:$0xff]  ;;  %v4100_v41 = vld [vmem:[#allocation8 + $0x88] sm:$0xff]  ;;  %v4099_v42 = vld [vmem:[#allocation8 + $0x80] sm:$0xff] }
  0x50   :  { %v4324_v55 = vld [vmem:[#allocation10] ss:$0 sm:$0xff] }
  0x51   :  { %v4096_v44 = vld [vmem:[#allocation2 + $0x10] sm:$0xff] }
  0x52   :  { %4279 = vmatpush.bf16.msra.mxu2 %v4091_v12  ;;  %387 = vmatpush.bf16.msra.mxu0 %v4091_v12  ;;  %v4298_v31 = vld [vmem:[#allocation2 + $0x14] sm:$0xff]  }
  0x53   :  { %4287 = vmatpush.bf16.msra.mxu3 %v4083_v14  ;;  %474 = vmatpush.bf16.msra.mxu1 %v4083_v14  ;;  %v4299_v38 = vld [vmem:[#allocation2 + $0x1c] sm:$0xff] }
  0x54   :  { %v4235_v34 = vld [vmem:[#allocation2] sm:$0xff]   ;;  %v4097_v45 = vld [vmem:[#allocation2 + $0x18] sm:$0xff] }
  0x55   :  { %v4098_v46 = vld [vmem:[#allocation2 + $0x20] sm:$0xff] }
  0x56   :  { %4280 = vmatpush.bf16.msra.mxu2 %v4090_v16  ;;  %388 = vmatpush.bf16.msra.mxu0 %v4090_v16  ;;  %v4294_v32 = vld [vmem:[#allocation2 + $0x4] sm:$0xff]   ;;  %v4296_v39 = vld [vmem:[#allocation2 + $0xc] sm:$0xff]  }
  0x57   :  { %4288 = vmatpush.bf16.msra.mxu3 %v4082_v17  ;;  %475 = vmatpush.bf16.msra.mxu1 %v4082_v17  ;;  %v4095_v43 = vld [vmem:[#allocation2 + $0x8] sm:$0xff] }
  0x5a   :  { %4281 = vmatpush.bf16.msra.mxu2 %v4089_v20  ;;  %389 = vmatpush.bf16.msra.mxu0 %v4089_v20 }
  0x5b   :  { %4289 = vmatpush.bf16.msra.mxu3 %v4081_v21  ;;  %476 = vmatpush.bf16.msra.mxu1 %v4081_v21 }
  0x5e   :  { %4282 = vmatpush.bf16.msra.mxu2 %v4088_v25  ;;  %390 = vmatpush.bf16.msra.mxu0 %v4088_v25 }
  0x5f   :  { %4290 = vmatpush.bf16.msra.mxu3 %v4080_v26  ;;  %477 = vmatpush.bf16.msra.mxu1 %v4080_v26 }
  0x62   :  { %4283 = vmatpush.bf16.msra.mxu2 %v4087_v28  ;;  %391 = vmatpush.bf16.msra.mxu0 %v4087_v28 }
  0x63   :  { %4291 = vmatpush.bf16.msra.mxu3 %v4079_v29  ;;  %478 = vmatpush.bf16.msra.mxu1 %v4079_v29 }
  0x65   :  { %402 = vmatmul.bf16.vlgmr.msra.gmra.mxu2 %v4298_v31  ;;  %392 = vmatmul.bf16.vlgmr.msra.gmra.mxu0 %v4294_v32 }
  0x66   :  { %596 = vmatpush.bf16.msrb.mxu2 %v4106_v30  ;;  %489 = vmatmul.bf16.vlgmr.msra.gmra.mxu3 %v4227_v10 }
  0x67   :  { %479 = vmatmul.bf16.vlgmr.msra.gmra.mxu1 %v4235_v34 }
  0x6a   :  { %597 = vmatpush.bf16.msrb.mxu2 %v4105_v33  ;;  %v669_v33 = vlaneseq }
  0x6c   :  { %v670_v34 = vand.u32 127, %v669_v33 }
  0x6e   :  { %598 = vmatpush.bf16.msrb.mxu2 %v4104_v35  ;;  %vm671_vm0 = vcmp.lt.s32.totalorder %v670_v34, 16 }
  0x72   :  { %599 = vmatpush.bf16.msrb.mxu2 %v4103_v36 }
  0x75   :  { %407 = vmatmul.bf16.gmra.mxu2 %v4299_v38  ;;  %397 = vmatmul.bf16.gmra.mxu0 %v4296_v39 }
  0x76   :  { %600 = vmatpush.bf16.msrb.mxu2 %v4102_v37  ;;  %494 = vmatmul.bf16.gmra.mxu3 %v5072_v11  ;;  %v4909_v37 = vmov 0.0  }
  0x77   :  { %484 = vmatmul.bf16.gmra.mxu1 %v4222_v24  ;;  %v3590_v38 = vsel %vm671_vm0, 1.0, %v4909_v37 }
  0x7a   :  { %601 = vmatpush.bf16.msrb.mxu2 %v4101_v40 }
  0x7e   :  { %602 = vmatpush.bf16.msrb.mxu2 %v4100_v41 }
  0x82   :  { %603 = vmatpush.bf16.msrb.mxu2 %v4099_v42 }
  0x85   :  { %604 = vmatmul.bf16.vlgmr.msrb.gmra.mxu2 %v4095_v43 }
  0x95   :  { %609 = vmatmul.bf16.gmra.mxu2 %v4096_v44 }
  0xa5   :  { %614 = vmatmul.bf16.gmra.mxu2 %v4097_v45 }
  0xb5   :  { %619 = vmatmul.bf16.gmra.mxu2 %v4098_v46 }
  0xe2   :  { %v393_v50 = vpop.f32.mrf.mxu0 }
  0xe4   :  { %v480_v51 = vpop.f32.mrf.mxu1 }
  0xe5   :  { %v481_v53 = vadd.f32 %v480_v51, %v393_v50 }
  0xe8   :  { %v403_v47 = vpop.f32.mrf.mxu2 }
  0xe9   :  { %v490_v8 = vpop.f32.mrf.mxu3 }
  0xea   :  { %v395_v54 = vpop.f32.mrf.mxu0  ;;  %v491_v13 = vadd.f32 %v490_v8, %v403_v47 }
  0xec   :  { %v482_v56 = vpop.f32.mrf.mxu1 }
  0xed   :  { %v483_v60 = vadd.f32 %v482_v56, %v395_v54 }
  0xf0   :  { %v405_v48 = vpop.f32.mrf.mxu2 }
  0xf1   :  { %v492_v14 = vpop.f32.mrf.mxu3 }
  0xf2   :  { %v398_v63 = vpop.f32.mrf.mxu0  ;;  %v493_v18 = vadd.f32 %v492_v14, %v405_v48  ;;  %v4137_v14 = vld [vmem:[#allocation14 + $0xec] sm:$0xf0] }
  0xf4   :  { %v485_v0 = vpop.f32.mrf.mxu1 }
  0xf5   :  { %v486_v2 = vadd.f32 %v485_v0, %v398_v63 }
  0xf8   :  { %v408_v49 = vpop.f32.mrf.mxu2 }
  0xf9   :  { %v495_v21 = vpop.f32.mrf.mxu3 }
  0xfa   :  { %v400_v6 = vpop.f32.mrf.mxu0  ;;  %v496_v23 = vadd.f32 %v495_v21, %v408_v49 }
  0xfc   :  { %v487_v7 = vpop.f32.mrf.mxu1 }
  0xfd   :  { %v488_v9 = vadd.f32 %v487_v7, %v400_v6 }
 0x100   :  { %v410_v52 = vpop.f32.mrf.mxu2 }
 0x101   :  { %v497_v28 = vpop.f32.mrf.mxu3 }
 0x102   :  { %v498_v29 = vadd.f32 %v497_v28, %v410_v52  ;;  %v4131_v28 = vld [vmem:[#allocation14 + $0xc4] sm:$0xf] }
 0x108   :  { %v605_v57 = vpop.f32.mrf.mxu2 }
 0x109   :  { %v625_v58 = vadd.f32 %v605_v57, %v481_v53 }
 0x10b   :  { %v637_v59 = vadd.f32 %v4324_v55, %v625_v58 }
 0x10d   :  { %645 = vadd.xlane.f32.xlu0 %v637_v59 }
 0x110   :  { %v607_v61 = vpop.f32.mrf.mxu2 }
 0x111   :  { %v626_v62 = vadd.f32 %v607_v61, %v483_v60 }
 0x113   :  { %v638_v1 = vadd.f32 %v4324_v55, %v626_v62 }
 0x115   :  { %647 = vadd.xlane.f32.xlu0 %v638_v1 }
 0x118   :  { %v610_v3 = vpop.f32.mrf.mxu2 }
 0x119   :  { %v627_v4 = vadd.f32 %v610_v3, %v486_v2 }
 0x11b   :  { %v639_v5 = vadd.f32 %v4324_v55, %v627_v4 }
 0x11d   :  { %649 = vadd.xlane.f32.xlu1 %v639_v5 }
 0x120   :  { %v612_v10 = vpop.f32.mrf.mxu2 }
 0x121   :  { %v628_v11 = vadd.f32 %v612_v10, %v488_v9 }
 0x123   :  { %v640_v12 = vadd.f32 %v4324_v55, %v628_v11 }
 0x125   :  { %651 = vadd.xlane.f32.xlu1 %v640_v12 }
 0x128   :  { %v615_v15 = vpop.f32.mrf.mxu2 }
 0x129   :  { %v629_v16 = vadd.f32 %v615_v15, %v491_v13  ;;  %v3705_v13 = vld [vmem:[#allocation14 + $0xe0] sm:$0xf]  ;;  %v4135_v15 = vld [vmem:[#allocation14 + $0xe4] sm:$0xf] }
 0x12b   :  { %v641_v17 = vadd.f32 %v4324_v55, %v629_v16  ;;  %v3706_v16 = vor.u32 %v4137_v14, %v3705_v13 }
 0x12d   :  { %653 = vadd.xlane.f32.xlu2 %v641_v17  ;;  %1048 = vmatpush.bf16.msrb.mxu3 %v3706_v16  ;;  %v3651_v16 = vld [vmem:[#allocation14 + $0x78] sm:$0xf0] }
 0x130   :  { %v617_v19 = vpop.f32.mrf.mxu2 }
 0x131   :  { %v630_v20 = vadd.f32 %v617_v19, %v493_v18  ;;  %v3713_v18 = vld [vmem:[#allocation14 + $0xe8] sm:$0xf]  ;;  %v4138_v19 = vld [vmem:[#allocation14 + $0xf4] sm:$0xf0] }
 0x132   :  { %v3714_v21 = vor.u32 %v4138_v19, %v3713_v18  ;;  %v3625_v18 = vld [vmem:[#allocation14 + $0x40] sm:$0xf]  ;;  %v4117_v19 = vld [vmem:[#allocation14 + $0x4c] sm:$0xf0] }
 0x133   :  { %v642_v22 = vadd.f32 %v4324_v55, %v630_v20 }
 0x134   :  { %1106 = vmatpush.bf16.msrb.mxu1 %v3714_v21  ;;  %v3626_v21 = vor.u32 %v4117_v19, %v3625_v18  ;;  %v4169_v18 = vld [vmem:[#allocation16 + $0xec] sm:$0xf0] }
 0x135   :  { %655 = vadd.xlane.f32.xlu2 %v642_v22 }
 0x138   :  { %v620_v24 = vpop.f32.mrf.mxu2 }
 0x139   :  { %v631_v25 = vadd.f32 %v620_v24, %v496_v23  ;;  %v3715_v23 = vld [vmem:[#allocation14 + $0xf8] sm:$0xf0] }
 0x13b   :  { %v643_v26 = vadd.f32 %v4324_v55, %v631_v25  ;;  %v3689_v25 = vld [vmem:[#allocation14 + $0xc0] sm:$0xf] }
 0x13d   :  { %657 = vadd.xlane.f32.xlu0 %v643_v26 }
 0x140   :  { %v622_v30 = vpop.f32.mrf.mxu2 }
 0x141   :  { %v632_v31 = vadd.f32 %v622_v30, %v498_v29  ;;  %v3691_v30 = vld [vmem:[#allocation14 + $0xd0] sm:$0xf0] }
 0x142   :  { %v3694_v33 = vor.u32 %v4131_v28, %v3691_v30  ;;  %v4116_v28 = vld [vmem:[#allocation14 + $0x4c] sm:$0xf] }
 0x143   :  { %v644_v32 = vadd.f32 %v4324_v55, %v632_v31  ;;  %v3697_v31 = vld [vmem:[#allocation14 + $0xc8] sm:$0xf] }
 0x145   :  { %659 = vadd.xlane.f32.xlu1 %v644_v32 }
 0x180   :  { %v646_v35 = vpop.xlane.xlu0 %645 }
 0x181   :  { %v661_v36 = vmul.f32 0.0625, %v646_v35  ;;  %v4132_v35 = vld [vmem:[#allocation14 + $0xcc] sm:$0xf] }
 0x183   :  { %v674_v39 = vsub.f32 %v637_v59, %v661_v36  ;;  %v3699_v36 = vld [vmem:[#allocation14 + $0xd8] sm:$0xf0] }
 0x184   :  { %v3702_v37 = vor.u32 %v4132_v35, %v3699_v36  ;;  %v3611_v35 = vld [vmem:[#allocation14 + $0x30] sm:$0xf0]  ;;  %v3617_v36 = vld [vmem:[#allocation14 + $0x28] sm:$0xf] }
 0x185   :  { %v5078_v40 = vmul.f32 %v3590_v38, %v674_v39  ;;  %v4129_v39 = vld [vmem:[#allocation14 + $0xac] sm:$0xf0] }
 0x187   :  { %v690_v41 = vmul.f32 %v5078_v40, %v5078_v40 }
 0x188   :  { %v648_v42 = vpop.xlane.xlu0 %647 }
 0x189   :  { %v662_v43 = vmul.f32 0.0625, %v648_v42  ;;  %698 = vadd.xlane.f32.xlu2 %v690_v41  ;;  %v4127_v41 = vld [vmem:[#allocation14 + $0xa4] sm:$0xf] }
 0x18b   :  { %v675_v44 = vsub.f32 %v638_v1, %v662_v43  ;;  %v3675_v43 = vld [vmem:[#allocation14 + $0xb0] sm:$0xf0] }
 0x18d   :  { %v5082_v45 = vmul.f32 %v3590_v38, %v675_v44  ;;  %v3681_v44 = vld [vmem:[#allocation14 + $0xa8] sm:$0xf] }
 0x18f   :  { %v691_v46 = vmul.f32 %v5082_v45, %v5082_v45 }
 0x190   :  { %v650_v47 = vpop.xlane.xlu1 %649 }
 0x191   :  { %v663_v48 = vmul.f32 0.0625, %v650_v47  ;;  %700 = vadd.xlane.f32.xlu0 %v691_v46  ;;  %v4130_v46 = vld [vmem:[#allocation14 + $0xb4] sm:$0xf0]  ;;  %v3678_v47 = vor.u32 %v4127_v41, %v3675_v43  ;;  %v4112_v41 = vld [vmem:[#allocation14 + $0x2c] sm:$0xf] }
 0x193   :  { %v676_v49 = vsub.f32 %v639_v5, %v663_v48  ;;  %v3682_v48 = vor.u32 %v4130_v46, %v3681_v44 }
 0x195   :  { %v5086_v50 = vmul.f32 %v3590_v38, %v676_v49  ;;  %v4128_v49 = vld [vmem:[#allocation14 + $0xac] sm:$0xf] }
 0x197   :  { %v692_v51 = vmul.f32 %v5086_v50, %v5086_v50 }
 0x198   :  { %v652_v52 = vpop.xlane.xlu1 %651 }
 0x199   :  { %v664_v53 = vmul.f32 0.0625, %v652_v52  ;;  %702 = vadd.xlane.f32.xlu1 %v692_v51  ;;  %v3683_v51 = vld [vmem:[#allocation14 + $0xb8] sm:$0xf0] }
 0x19a   :  { %v3686_v52 = vor.u32 %v4128_v49, %v3683_v51  ;;  %v4107_v51 = vld [vmem:[#allocation14 + $0x4] sm:$0xf] }
 0x19b   :  { %v677_v54 = vsub.f32 %v640_v12, %v664_v53  ;;  %v3657_v53 = vld [vmem:[#allocation14 + $0x80] sm:$0xf] }
 0x19d   :  { %v5090_v55 = vmul.f32 %v3590_v38, %v677_v54  ;;  %v4125_v54 = vld [vmem:[#allocation14 + $0x8c] sm:$0xf0] }
 0x19f   :  { %v693_v56 = vmul.f32 %v5090_v55, %v5090_v55 }
 0x1a0   :  { %v654_v57 = vpop.xlane.xlu2 %653 }
 0x1a1   :  { %v665_v58 = vmul.f32 0.0625, %v654_v57  ;;  %704 = vadd.xlane.f32.xlu2 %v693_v56  ;;  %v4123_v56 = vld [vmem:[#allocation14 + $0x84] sm:$0xf]  ;;  %v3658_v57 = vor.u32 %v4125_v54, %v3657_v53  ;;  %v3601_v53 = vld [vmem:[#allocation14 + $0x8] sm:$0xf] }
 0x1a3   :  { %v678_v59 = vsub.f32 %v641_v17, %v665_v58  ;;  %v3707_v17 = vld [vmem:[#allocation14 + $0xf0] sm:$0xf0] }
 0x1a4   :  { %v3710_v20 = vor.u32 %v4135_v15, %v3707_v17  ;;  %v3659_v58 = vld [vmem:[#allocation14 + $0x90] sm:$0xf0]  ;;  %v4120_v15 = vld [vmem:[#allocation14 + $0x6c] sm:$0xf] }
 0x1a5   :  { %v5094_v60 = vmul.f32 %v3590_v38, %v678_v59  ;;  %v3665_v59 = vld [vmem:[#allocation14 + $0x88] sm:$0xf]  ;;  %v3654_v17 = vor.u32 %v4120_v15, %v3651_v16 }
 0x1a6   :  { %1077 = vmatpush.bf16.msrb.mxu0 %v3710_v20  ;;  %v4115_v20 = vld [vmem:[#allocation14 + $0x44] sm:$0xf] }
 0x1a7   :  { %v694_v61 = vmul.f32 %v5094_v60, %v5094_v60 }
 0x1a8   :  { %v656_v62 = vpop.xlane.xlu2 %655 }
 0x1a9   :  { %v666_v63 = vmul.f32 0.0625, %v656_v62  ;;  %706 = vadd.xlane.f32.xlu0 %v694_v61  ;;  %v4126_v61 = vld [vmem:[#allocation14 + $0x94] sm:$0xf0]  ;;  %v3662_v62 = vor.u32 %v4123_v56, %v3659_v58  ;;  %v4108_v58 = vld [vmem:[#allocation14 + $0xc] sm:$0xf] }
 0x1aa   :  { %1078 = vmatpush.bf16.msrb.mxu0 %v3694_v33  ;;  %v4111_v33 = vld [vmem:[#allocation14 + $0x24] sm:$0xf] }
 0x1ab   :  { %v679_v0 = vsub.f32 %v642_v22, %v666_v63  ;;  %v4136_v22 = vld [vmem:[#allocation14 + $0xec] sm:$0xf]  ;;  %v3666_v63 = vor.u32 %v4126_v61, %v3665_v59  ;;  %v3603_v61 = vld [vmem:[#allocation14 + $0x18] sm:$0xf0] }
 0x1ac   :  { %v3718_v24 = vor.u32 %v4136_v22, %v3715_v23  ;;  %v3627_v22 = vld [vmem:[#allocation14 + $0x50] sm:$0xf0]  ;;  %v3633_v23 = vld [vmem:[#allocation14 + $0x48] sm:$0xf] }
 0x1ad   :  { %v5098_v1 = vmul.f32 %v3590_v38, %v679_v0  ;;  %v4124_v0 = vld [vmem:[#allocation14 + $0x8c] sm:$0xf] }
 0x1ae   :  { %1135 = vmatpush.bf16.msra.mxu2 %v3718_v24  ;;  %1079 = vmatpush.bf16.msrb.mxu0 %v3678_v47  ;;  %v4118_v24 = vld [vmem:[#allocation14 + $0x54] sm:$0xf0]  ;;  %v3593_v47 = vld [vmem:[#allocation14] sm:$0xf] }
 0x1af   :  { %v695_v2 = vmul.f32 %v5098_v1, %v5098_v1 }
 0x1b0   :  { %v658_v3 = vpop.xlane.xlu0 %657 }
 0x1b1   :  { %v667_v4 = vmul.f32 0.0625, %v658_v3  ;;  %708 = vadd.xlane.f32.xlu1 %v695_v2  ;;  %v3667_v2 = vld [vmem:[#allocation14 + $0x98] sm:$0xf0] }
 0x1b2   :  { %1136 = vmatpush.bf16.msra.mxu2 %v3702_v37  ;;  %v3670_v3 = vor.u32 %v4124_v0, %v3667_v2  ;;  %1080 = vmatpush.bf16.msrb.mxu0 %v3662_v62  ;;  %v4114_v37 = vld [vmem:[#allocation14 + $0x34] sm:$0xf0]  ;;  %v3606_v62 = vor.u32 %v4108_v58, %v3603_v61  ;;  %v4157_v58 = vld [vmem:[#allocation16 + $0x8c] sm:$0xf0] }
 0x1b3   :  { %v680_v5 = vsub.f32 %v643_v26, %v667_v4  ;;  %v4133_v26 = vld [vmem:[#allocation14 + $0xcc] sm:$0xf0]  ;;  %v3641_v4 = vld [vmem:[#allocation14 + $0x60] sm:$0xf] }
 0x1b4   :  { %v3690_v29 = vor.u32 %v4133_v26, %v3689_v25  ;;  %v3630_v25 = vor.u32 %v4115_v20, %v3627_v22  ;;  %v3634_v26 = vor.u32 %v4118_v24, %v3633_v23 }
 0x1b5   :  { %v5102_v6 = vmul.f32 %v3590_v38, %v680_v5  ;;  %v4121_v5 = vld [vmem:[#allocation14 + $0x6c] sm:$0xf0] }
 0x1b6   :  { %1049 = vmatpush.bf16.msrb.mxu3 %v3690_v29  ;;  %1137 = vmatpush.bf16.msra.mxu2 %v3686_v52  ;;  %v3635_v29 = vld [vmem:[#allocation14 + $0x58] sm:$0xf0]  ;;  %v3595_v52 = vld [vmem:[#allocation14 + $0x10] sm:$0xf0] }
 0x1b7   :  { %v696_v7 = vmul.f32 %v5102_v6, %v5102_v6  ;;  %v3638_v30 = vor.u32 %v4116_v28, %v3635_v29  ;;  %v3598_v56 = vor.u32 %v4107_v51, %v3595_v52  ;;  %v5122_v29 = vld [vmem:[#allocation11] ss:$0 sm:$0xff] }
 0x1b8   :  { %v660_v8 = vpop.xlane.xlu1 %659 }
 0x1b9   :  { %v668_v9 = vmul.f32 0.0625, %v660_v8  ;;  %710 = vadd.xlane.f32.xlu2 %v696_v7  ;;  %v4119_v7 = vld [vmem:[#allocation14 + $0x64] sm:$0xf]  ;;  %v3642_v8 = vor.u32 %v4121_v5, %v3641_v4 }
 0x1ba   :  { %1138 = vmatpush.bf16.msra.mxu2 %v3670_v3 }
 0x1bb   :  { %v681_v10 = vsub.f32 %v644_v32, %v668_v9  ;;  %v4134_v32 = vld [vmem:[#allocation14 + $0xd4] sm:$0xf0]  ;;  %v3643_v9 = vld [vmem:[#allocation14 + $0x70] sm:$0xf0] }
 0x1bc   :  { %v3698_v34 = vor.u32 %v4134_v32, %v3697_v31  ;;  %v3646_v13 = vor.u32 %v4119_v7, %v3643_v9  ;;  %v3609_v31 = vld [vmem:[#allocation14 + $0x20] sm:$0xf]  ;;  %v4113_v32 = vld [vmem:[#allocation14 + $0x2c] sm:$0xf0] }
 0x1bd   :  { %v5106_v11 = vmul.f32 %v3590_v38, %v681_v10  ;;  %v3673_v38 = vld [vmem:[#allocation14 + $0xa0] sm:$0xf]  ;;  %v3649_v10 = vld [vmem:[#allocation14 + $0x68] sm:$0xf] }
 0x1be   :  { %1107 = vmatpush.bf16.msrb.mxu1 %v3698_v34  ;;  %v3674_v42 = vor.u32 %v4129_v39, %v3673_v38  ;;  %1081 = vmatpush.bf16.msrb.mxu0 %v3646_v13  ;;  %v3610_v34 = vor.u32 %v4113_v32, %v3609_v31  ;;  %v3614_v38 = vor.u32 %v4111_v33, %v3611_v35  ;;  %v3817_v32 = vld [vmem:[#allocation16 + $0xc0] sm:$0xf]  ;;  %v4165_v33 = vld [vmem:[#allocation16 + $0xcc] sm:$0xf0] }
 0x1bf   :  { %v697_v12 = vmul.f32 %v5106_v11, %v5106_v11  ;;  %1139 = vmatpush.bf16.msra.mxu2 %v3654_v17  ;;  %v3618_v39 = vor.u32 %v4114_v37, %v3617_v36  ;;  %v3833_v17 = vld [vmem:[#allocation16 + $0xe0] sm:$0xf]  ;;  %v5128_v36 = vor.u32 %v4165_v33, %v3817_v32 }
 0x1c0   :  { %1050 = vmatpush.bf16.msrb.mxu3 %v3674_v42  ;;  %v3619_v42 = vld [vmem:[#allocation14 + $0x38] sm:$0xf0]  ;;  %v5113_v22 = vor.u32 %v4169_v18, %v3833_v17  ;;  %v4166_v17 = vld [vmem:[#allocation16 + $0xd4] sm:$0xf0] }
 0x1c1   :  { %712 = vadd.xlane.f32.xlu0 %v697_v12  ;;  %v4122_v12 = vld [vmem:[#allocation14 + $0x74] sm:$0xf0]  ;;  %v3622_v44 = vor.u32 %v4112_v41, %v3619_v42 }
 0x1c2   :  { %1108 = vmatpush.bf16.msrb.mxu1 %v3682_v48  ;;  %v3650_v14 = vor.u32 %v4122_v12, %v3649_v10  ;;  %1082 = vmatpush.bf16.msrb.mxu0 %v3630_v25  ;;  %v4109_v48 = vld [vmem:[#allocation14 + $0xc] sm:$0xf0] }
 0x1c3   :  { %1140 = vmatpush.bf16.msra.mxu2 %v3638_v30  ;;  %v3594_v49 = vor.u32 %v4109_v48, %v3593_v47 }
 0x1c4   :  { %1051 = vmatpush.bf16.msrb.mxu3 %v3658_v57  ;;  %v4110_v57 = vld [vmem:[#allocation14 + $0x14] sm:$0xf0] }
 0x1c5   :  { %v3602_v59 = vor.u32 %v4110_v57, %v3601_v53  ;;  %v3785_v57 = vld [vmem:[#allocation16 + $0x80] sm:$0xf] }
 0x1c6   :  { %1109 = vmatpush.bf16.msrb.mxu1 %v3666_v63  ;;  %1083 = vmatpush.bf16.msrb.mxu0 %v3614_v38  ;;  %v5132_v38 = vld [vmem:[#allocation13] ss:$0 sm:$0xff]  ;;  %v5154_v61 = vor.u32 %v4157_v58, %v3785_v57 }
 0x1c7   :  { %1141 = vmatpush.bf16.msra.mxu2 %v3622_v44  ;;  %v3801_v44 = vld [vmem:[#allocation16 + $0xa0] sm:$0xf] }
 0x1c8   :  { %1052 = vmatpush.bf16.msrb.mxu3 %v3642_v8 }
 0x1ca   :  { %1110 = vmatpush.bf16.msrb.mxu1 %v3650_v14  ;;  %1084 = vmatpush.bf16.msrb.mxu0 %v3598_v56 }
 0x1cb   :  { %1142 = vmatpush.bf16.msra.mxu2 %v3606_v62  ;;  %v3841_v62 = vld [vmem:[#allocation16 + $0xe8] sm:$0xf] }
 0x1cc   :  { %1053 = vmatpush.bf16.msrb.mxu3 %v3626_v21 }
 0x1ce   :  { %1111 = vmatpush.bf16.msrb.mxu1 %v3634_v26 }
 0x1cf   :  { %1518 = vmatpush.bf16.msrb.mxu2 %v5113_v22 }
 0x1d0   :  { %1054 = vmatpush.bf16.msrb.mxu3 %v3610_v34 }
 0x1d2   :  { %1112 = vmatpush.bf16.msrb.mxu1 %v3618_v39 }
 0x1d3   :  { %1519 = vmatpush.bf16.msrb.mxu2 %v5128_v36 }
 0x1d4   :  { %1055 = vmatpush.bf16.msrb.mxu3 %v3594_v49 }
 0x1d6   :  { %1113 = vmatpush.bf16.msrb.mxu1 %v3602_v59 }
 0x1d8   :  { %1392 = vmatpush.bf16.msra.mxu3 %v5113_v22 }
 0x1dc   :  { %1393 = vmatpush.bf16.msra.mxu3 %v5128_v36 }
 0x1fc   :  { %v699_v43 = vpop.xlane.xlu2 %698 }
 0x1fd   :  { %v714_v46 = vmul.f32 0.0625, %v699_v43 }
 0x1ff   :  { %v722_v54 = vadd.f32 1e-05, %v714_v46  ;;  %v4161_v46 = vld [vmem:[#allocation16 + $0xac] sm:$0xf0] }
 0x200   :  { %v5137_v48 = vor.u32 %v4161_v46, %v3801_v44 }
 0x201   :  { %4332 = vrsqrt.f32 %v722_v54  ;;  %vm736_vm2 = vweird.f32 %v722_v54 }
 0x202   :  { %1394 = vmatpush.bf16.msra.mxu3 %v5137_v48  ;;  %1520 = vmatpush.bf16.msrb.mxu2 %v5137_v48 }
 0x204   :  { %v701_v63 = vpop.xlane.xlu0 %700 }
 0x205   :  { %v715_v0 = vmul.f32 0.0625, %v701_v63  ;;  %v4170_v63 = vld [vmem:[#allocation16 + $0xf4] sm:$0xf0] }
 0x206   :  { %1395 = vmatpush.bf16.msra.mxu3 %v5154_v61  ;;  %1521 = vmatpush.bf16.msrb.mxu2 %v5154_v61 }
 0x207   :  { %v4333_v2 = vpop.eup %4332  ;;  %v723_v3 = vadd.f32 1e-05, %v715_v0  ;;  %v4168_v0 = vld [vmem:[#allocation16 + $0xec] sm:$0xf] }
 0x208   :  { %v731_v4 = vmul.f32 %v4333_v2, %v722_v54  ;;  %vm737_vm1 = vweird.f32 %v4333_v2 }
 0x209   :  { %4334 = vrsqrt.f32 %v723_v3  ;;  %vm738_vm3 = vmor %vm736_vm2, %vm737_vm1  ;;  %vm746_vm5 = vweird.f32 %v723_v3 }
 0x20a   :  { %v732_v5 = vmul.f32 %v4333_v2, %v731_v4  ;;  %v3843_v4 = vld [vmem:[#allocation16 + $0xf8] sm:$0xf0] }
 0x20c   :  { %v733_v7 = vmul.f32 0.5, %v732_v5  ;;  %v703_v8 = vpop.xlane.xlu1 %702 }
 0x20d   :  { %v716_v9 = vmul.f32 0.0625, %v703_v8 }
 0x20e   :  { %v734_v10 = vsub.f32 1.5, %v733_v7 }
 0x20f   :  { %v4335_v12 = vpop.eup %4334  ;;  %v5110_v13 = vadd.f32 1e-05, %v716_v9  ;;  %v5165_v9 = vor.u32 %v4168_v0, %v3843_v4  ;;  %v4156_v0 = vld [vmem:[#allocation16 + $0x8c] sm:$0xf] }
 0x210   :  { %v735_v14 = vmul.f32 %v4333_v2, %v734_v10  ;;  %v741_v15 = vmul.f32 %v4335_v12, %v723_v3  ;;  %vm747_vm4 = vweird.f32 %v4335_v12  ;;  %v5160_v3 = vor.u32 %v4170_v63, %v3841_v62 }
 0x211   :  { %4336 = vrsqrt.f32 %v5110_v13  ;;  %vm748_vm6 = vmor %vm746_vm5, %vm747_vm4  ;;  %vm756_vm8 = vweird.f32 %v5110_v13  ;;  %1431 = vmatpush.bf16.msra.mxu1 %v5165_v9 }
 0x212   :  { %v742_v16 = vmul.f32 %v4335_v12, %v741_v15  ;;  %v739_v19 = vsel %vm738_vm3, %v4333_v2, %v735_v14  ;;  %1418 = vmatpush.bf16.msra.mxu0 %v5160_v3  ;;  %v3795_v2 = vld [vmem:[#allocation16 + $0x98] sm:$0xf0] }
 0x213   :  { %v810_v26 = vmul.f32 %v739_v19, %v5078_v40 }
 0x214   :  { %v743_v20 = vmul.f32 0.5, %v742_v16  ;;  %v705_v21 = vpop.xlane.xlu2 %704  ;;  %v3825_v16 = vld [vmem:[#allocation16 + $0xc8] sm:$0xf] }
 0x215   :  { %v717_v23 = vmul.f32 0.0625, %v705_v21  ;;  %v822_v37 = vmul.f32 %v5122_v29, %v810_v26  ;;  %v5179_v21 = vor.u32 %v4166_v17, %v3825_v16  ;;  %v4167_v16 = vld [vmem:[#allocation16 + $0xe4] sm:$0xf]  ;;  %v3835_v17 = vld [vmem:[#allocation16 + $0xf0] sm:$0xf0] }
 0x216   :  { %v744_v24 = vsub.f32 1.5, %v743_v20 }
 0x217   :  { %v5117_v25 = vpop.eup %4336  ;;  %v5120_v28 = vadd.f32 1e-05, %v717_v23  ;;  %v834_v51 = vadd.f32 %v5132_v38, %v822_v37  ;;  %v4164_v23 = vld [vmem:[#allocation16 + $0xcc] sm:$0xf]  ;;  %1419 = vmatpush.bf16.msra.mxu0 %v5179_v21 }
 0x218   :  { %v745_v30 = vmul.f32 %v4335_v12, %v744_v24  ;;  %v751_v31 = vmul.f32 %v5117_v25, %v5110_v13  ;;  %vm757_vm7 = vweird.f32 %v5117_v25  ;;  %v4153_v13 = vld [vmem:[#allocation16 + $0x6c] sm:$0xf0]  ;;  %v3827_v24 = vld [vmem:[#allocation16 + $0xd8] sm:$0xf0] }
 0x219   :  { %4338 = vrsqrt.f32 %v5120_v28  ;;  %vm5156_vm9 = vmor %vm756_vm8, %vm757_vm7  ;;  %vm766_vm11 = vweird.f32 %v5120_v28 }
 0x21a   :  { %v749_v34 = vsel %vm748_vm6, %v4335_v12, %v745_v30  ;;  %v752_v35 = vmul.f32 %v5117_v25, %v751_v31  ;;  %v3769_v12 = vld [vmem:[#allocation16 + $0x60] sm:$0xf]  ;;  %v5185_v30 = vor.u32 %v4164_v23, %v3827_v24  ;;  %v4149_v31 = vld [vmem:[#allocation16 + $0x4c] sm:$0xf0]  ;;  %v5240_v23 = vor.u32 %v4167_v16, %v3835_v17  ;;  %v4154_v24 = vld [vmem:[#allocation16 + $0x74] sm:$0xf0] }
 0x21b   :  { %v811_v40 = vmul.f32 %v749_v34, %v5082_v45  ;;  %v5170_v15 = vor.u32 %v4153_v13, %v3769_v12  ;;  %v3809_v34 = vld [vmem:[#allocation16 + $0xa8] sm:$0xf]  ;;  %v3721_v12 = vld [vmem:[#allocation16] sm:$0xf] }
 0x21c   :  { %v753_v39 = vmul.f32 0.5, %v752_v35  ;;  %v707_v41 = vpop.xlane.xlu0 %706  ;;  %1432 = vmatpush.bf16.msra.mxu1 %v5185_v30  ;;  %v4162_v35 = vld [vmem:[#allocation16 + $0xb4] sm:$0xf0] }
 0x21d   :  { %v718_v42 = vmul.f32 0.0625, %v707_v41  ;;  %v823_v43 = vmul.f32 %v5122_v29, %v811_v40  ;;  %1396 = vmatpush.bf16.msra.mxu3 %v5170_v15  ;;  %v4160_v40 = vld [vmem:[#allocation16 + $0xac] sm:$0xf]  ;;  %1522 = vmatpush.bf16.msrb.mxu2 %v5170_v15  ;;  %v5200_v41 = vor.u32 %v4162_v35, %v3809_v34  ;;  %v4163_v35 = vld [vmem:[#allocation16 + $0xc4] sm:$0xf] }
 0x21e   :  { %v754_v47 = vsub.f32 1.5, %v753_v39 }
 0x21f   :  { %v5139_v49 = vpop.eup %4338  ;;  %v5141_v45 = vadd.f32 1e-05, %v718_v42  ;;  %v835_v52 = vadd.f32 %v5132_v38, %v823_v43  ;;  %v3811_v42 = vld [vmem:[#allocation16 + $0xb8] sm:$0xf0]  ;;  %1420 = vmatpush.bf16.msra.mxu0 %v5200_v41 }
 0x220   :  { %v755_v53 = vmul.f32 %v5117_v25, %v754_v47  ;;  %v761_v54 = vmul.f32 %v5139_v49, %v5120_v28  ;;  %vm767_vm10 = vweird.f32 %v5139_v49  ;;  %v5202_v46 = vor.u32 %v4160_v40, %v3811_v42  ;;  %v3819_v40 = vld [vmem:[#allocation16 + $0xd0] sm:$0xf0]  ;;  %v4150_v42 = vld [vmem:[#allocation16 + $0x54] sm:$0xf0] }
 0x221   :  { %4340 = vrsqrt.f32 %v5141_v45  ;;  %v842_v56 = vpack.c.bf16 %v835_v52, %v834_v51  ;;  %vm768_vm12 = vmor %vm766_vm11, %vm767_vm10  ;;  %v3737_v51 = vld [vmem:[#allocation16 + $0x20] sm:$0xf]  ;;  %v4145_v52 = vld [vmem:[#allocation16 + $0x2c] sm:$0xf0]  ;;  %vm776_vm14 = vweird.f32 %v5141_v45 }
 0x222   :  { %v762_v59 = vmul.f32 %v5139_v49, %v761_v54  ;;  %v759_v5 = vsel %vm5156_vm9, %v5117_v25, %v755_v53  ;;  %1433 = vmatpush.bf16.msra.mxu1 %v5202_v46  ;;  %v3793_v54 = vld [vmem:[#allocation16 + $0x88] sm:$0xf] }
 0x223   :  { %1056 = vmatmul.bf16.vlgmr.msrb.gmra.mxu3 %v842_v56  ;;  %1085 = vmatmul.bf16.vlgmr.msrb.gmra.mxu0 %v842_v56  ;;  %v812_v19 = vmul.f32 %v759_v5, %v5086_v50  ;;  %v3753_v50 = vld [vmem:[#allocation16 + $0x40] sm:$0xf] }
 0x224   :  { %v763_v7 = vmul.f32 0.5, %v762_v59  ;;  %1114 = vmatmul.bf16.vlgmr.msrb.gmra.mxu1 %v842_v56  ;;  %1143 = vmatmul.bf16.vlgmr.msra.gmra.mxu2 %v842_v56  ;;  %v709_v8 = vpop.xlane.xlu1 %708  ;;  %v5195_v33 = vor.u32 %v4149_v31, %v3753_v50  ;;  %v4158_v56 = vld [vmem:[#allocation16 + $0x94] sm:$0xf0] }
 0x225   :  { %v719_v10 = vmul.f32 0.0625, %v709_v8  ;;  %v824_v39 = vmul.f32 %v5122_v29, %v812_v19  ;;  %v5218_v63 = vor.u32 %v4158_v56, %v3793_v54  ;;  %v3777_v19 = vld [vmem:[#allocation16 + $0x68] sm:$0xf]  ;;  %v4159_v56 = vld [vmem:[#allocation16 + $0xa4] sm:$0xf] }
 0x226   :  { %v764_v14 = vsub.f32 1.5, %v763_v7  ;;  %1397 = vmatpush.bf16.msra.mxu3 %v5195_v33  ;;  %1523 = vmatpush.bf16.msrb.mxu2 %v5195_v33  ;;  %v5224_v7 = vor.u32 %v4156_v0, %v3795_v2  ;;  %v3745_v2 = vld [vmem:[#allocation16 + $0x28] sm:$0xf]  ;;  %v3747_v8 = vld [vmem:[#allocation16 + $0x38] sm:$0xf0] }
 0x227   :  { %v5174_v18 = vpop.eup %4340  ;;  %v5177_v20 = vadd.f32 1e-05, %v719_v10  ;;  %v836_v59 = vadd.f32 %v5132_v38, %v824_v39  ;;  %1421 = vmatpush.bf16.msra.mxu0 %v5218_v63  ;;  %v3761_v39 = vld [vmem:[#allocation16 + $0x48] sm:$0xf] }
 0x228   :  { %v765_v25 = vmul.f32 %v5139_v49, %v764_v14  ;;  %v771_v26 = vmul.f32 %v5174_v18, %v5141_v45  ;;  %vm777_vm13 = vweird.f32 %v5174_v18  ;;  %v4141_v45 = vld [vmem:[#allocation16 + $0xc] sm:$0xf0]  ;;  %1434 = vmatpush.bf16.msra.mxu1 %v5224_v7 }
 0x229   :  { %4342 = vrsqrt.f32 %v5177_v20  ;;  %vm5228_vm15 = vmor %vm776_vm14, %vm777_vm13  ;;  %v5237_v14 = vor.u32 %v4141_v45, %v3721_v12  ;;  %vm786_vm1 = vweird.f32 %v5177_v20  ;;  %v4155_v45 = vld [vmem:[#allocation16 + $0x84] sm:$0xf] }
 0x22a   :  { %v769_v32 = vsel %vm768_vm12, %v5139_v49, %v765_v25  ;;  %v772_v28 = vmul.f32 %v5174_v18, %v771_v26  ;;  %v4152_v25 = vld [vmem:[#allocation16 + $0x6c] sm:$0xf]  ;;  %v3779_v26 = vld [vmem:[#allocation16 + $0x78] sm:$0xf0] }
 0x22b   :  { %v813_v37 = vmul.f32 %v769_v32, %v5090_v55  ;;  %v5209_v55 = vor.u32 %v4145_v52, %v3737_v51  ;;  %v5247_v34 = vor.u32 %v4152_v25, %v3779_v26 }
 0x22c   :  { %v773_v43 = vmul.f32 0.5, %v772_v28  ;;  %v711_v44 = vpop.xlane.xlu2 %710  ;;  %v5245_v28 = vor.u32 %v4154_v24, %v3777_v19  ;;  %v3787_v19 = vld [vmem:[#allocation16 + $0x90] sm:$0xf0]  ;;  %v3729_v24 = vld [vmem:[#allocation16 + $0x8] sm:$0xf] }
 0x22d   :  { %v720_v47 = vmul.f32 0.0625, %v711_v44  ;;  %v825_v49 = vmul.f32 %v5122_v29, %v813_v37  ;;  %1398 = vmatpush.bf16.msra.mxu3 %v5209_v55  ;;  %1524 = vmatpush.bf16.msrb.mxu2 %v5209_v55  ;;  %v5255_v44 = vor.u32 %v4150_v42, %v3761_v39 }
 0x22e   :  { %v774_v53 = vsub.f32 1.5, %v773_v43  ;;  %1422 = vmatpush.bf16.msra.mxu0 %v5245_v28  ;;  %1435 = vmatpush.bf16.msra.mxu1 %v5247_v34 }
 0x22f   :  { %v5212_v57 = vpop.eup %4342  ;;  %v5214_v58 = vadd.f32 1e-05, %v720_v47  ;;  %v837_v62 = vadd.f32 %v5132_v38, %v825_v49  ;;  %v4148_v47 = vld [vmem:[#allocation16 + $0x4c] sm:$0xf]  ;;  %v3763_v49 = vld [vmem:[#allocation16 + $0x58] sm:$0xf0] }
 0x230   :  { %v775_v4 = vmul.f32 %v5174_v18, %v774_v53  ;;  %v781_v5 = vmul.f32 %v5212_v57, %v5177_v20  ;;  %vm787_vm0 = vweird.f32 %v5212_v57  ;;  %v5263_v54 = vor.u32 %v4148_v47, %v3763_v49 }
 0x231   :  { %4344 = vrsqrt.f32 %v5214_v58  ;;  %v843_v10 = vpack.c.bf16 %v837_v62, %v836_v59  ;;  %1399 = vmatpush.bf16.msra.mxu3 %v5237_v14  ;;  %v3803_v59 = vld [vmem:[#allocation16 + $0xb0] sm:$0xf0]  ;;  %1525 = vmatpush.bf16.msrb.mxu2 %v5237_v14  ;;  %vm788_vm2 = vmor %vm786_vm1, %vm787_vm0  ;;  %vm796_vm4 = vweird.f32 %v5214_v58 }
 0x232   :  { %v782_v13 = vmul.f32 %v5212_v57, %v781_v5  ;;  %v779_v50 = vsel %vm5228_vm15, %v5174_v18, %v775_v4  ;;  %v5253_v18 = vor.u32 %v4163_v35, %v3819_v40  ;;  %v4146_v4 = vld [vmem:[#allocation16 + $0x34] sm:$0xf0]  ;;  %v5274_v5 = vor.u32 %v4159_v56, %v3803_v59  ;;  %1423 = vmatpush.bf16.msra.mxu0 %v5255_v44  ;;  %v3731_v35 = vld [vmem:[#allocation16 + $0x18] sm:$0xf0]  ;;  %v4151_v56 = vld [vmem:[#allocation16 + $0x64] sm:$0xf] }
 0x233   :  { %1061 = vmatmul.bf16.gmra.mxu3 %v843_v10  ;;  %1090 = vmatmul.bf16.gmra.mxu0 %v843_v10  ;;  %v814_v52 = vmul.f32 %v779_v50, %v5094_v60  ;;  %v4144_v60 = vld [vmem:[#allocation16 + $0x2c] sm:$0xf]  ;;  %v5280_v12 = vor.u32 %v4146_v4, %v3745_v2  ;;  %v3771_v59 = vld [vmem:[#allocation16 + $0x70] sm:$0xf0]  ;;  %v4147_v4 = vld [vmem:[#allocation16 + $0x44] sm:$0xf] }
 0x234   :  { %v783_v31 = vmul.f32 0.5, %v782_v13  ;;  %1119 = vmatmul.bf16.gmra.mxu1 %v843_v10  ;;  %1148 = vmatmul.bf16.gmra.mxu2 %v843_v10  ;;  %v713_v32 = vpop.xlane.xlu0 %712  ;;  %v5285_v17 = vor.u32 %v4144_v60, %v3747_v8  ;;  %v3755_v60 = vld [vmem:[#allocation16 + $0x50] sm:$0xf0] }
 0x235   :  { %v721_v37 = vmul.f32 0.0625, %v713_v32  ;;  %1405 = vmatpush.bf16.msrb.mxu3 %v5240_v23  ;;  %1645 = vmatpush.bf16.msra.mxu2 %v5113_v22  ;;  %v826_v16 = vmul.f32 %v5122_v29, %v814_v52  ;;  %v4140_v32 = vld [vmem:[#allocation16 + $0xc] sm:$0xf] }
 0x236   :  { %v784_v43 = vsub.f32 1.5, %v783_v31  ;;  %1436 = vmatpush.bf16.msra.mxu1 %v5263_v54  ;;  %1424 = vmatpush.bf16.msra.mxu0 %v5280_v12  ;;  %v5302_v49 = vor.u32 %v4140_v32, %v3731_v35 }
 0x237   :  { %v5257_v51 = vpop.eup %4344  ;;  %v5260_v53 = vadd.f32 1e-05, %v721_v37  ;;  %v838_v37 = vadd.f32 %v5132_v38, %v826_v16 }
 0x238   :  { %v785_v62 = vmul.f32 %v5212_v57, %v784_v43  ;;  %v791_v0 = vmul.f32 %v5257_v51, %v5214_v58  ;;  %vm797_vm3 = vweird.f32 %v5257_v51 }
 0x239   :  { %4346 = vrsqrt.f32 %v5260_v53  ;;  %1406 = vmatpush.bf16.msrb.mxu3 %v5253_v18  ;;  %1646 = vmatpush.bf16.msra.mxu2 %v5128_v36  ;;  %vm5307_vm5 = vmor %vm796_vm4, %vm797_vm3  ;;  %vm806_vm7 = vweird.f32 %v5260_v53 }
 0x23a   :  { %v789_v10 = vsel %vm788_vm2, %v5212_v57, %v785_v62  ;;  %v792_v20 = vmul.f32 %v5257_v51, %v791_v0  ;;  %v4142_v57 = vld [vmem:[#allocation16 + $0x14] sm:$0xf0]  ;;  %1437 = vmatpush.bf16.msra.mxu1 %v5285_v17  ;;  %v5311_v0 = vor.u32 %v4151_v56, %v3771_v59 }
 0x23b   :  { %v815_v13 = vmul.f32 %v789_v10, %v5098_v1  ;;  %v5291_v1 = vor.u32 %v4155_v45, %v3787_v19  ;;  %v5293_v31 = vor.u32 %v4142_v57, %v3729_v24  ;;  %v5319_v10 = vor.u32 %v4147_v4, %v3755_v60  ;;  %v3739_v45 = vld [vmem:[#allocation16 + $0x30] sm:$0xf0]  ;;  %v4139_v57 = vld [vmem:[#allocation16 + $0x4] sm:$0xf] }
 0x23c   :  { %v793_v25 = vmul.f32 0.5, %v792_v20 }
 0x23d   :  { %v827_v26 = vmul.f32 %v5122_v29, %v815_v13  ;;  %1407 = vmatpush.bf16.msrb.mxu3 %v5274_v5  ;;  %1647 = vmatpush.bf16.msra.mxu2 %v5137_v48 }
 0x23e   :  { %v794_v50 = vsub.f32 1.5, %v793_v25  ;;  %1425 = vmatpush.bf16.msra.mxu0 %v5293_v31  ;;  %1438 = vmatpush.bf16.msra.mxu1 %v5302_v49  ;;  %v3723_v25 = vld [vmem:[#allocation16 + $0x10] sm:$0xf0] }
 0x23f   :  { %v4347_v40 = vpop.eup %4346  ;;  %v839_v39 = vadd.f32 %v5132_v38, %v827_v26  ;;  %v5336_v26 = vor.u32 %v4139_v57, %v3723_v25 }
 0x240   :  { %v795_v42 = vmul.f32 %v5257_v51, %v794_v50  ;;  %v801_v43 = vmul.f32 %v4347_v40, %v5260_v53  ;;  %vm807_vm6 = vweird.f32 %v4347_v40 }
 0x241   :  { %v844_v47 = vpack.c.bf16 %v839_v39, %v838_v37  ;;  %1408 = vmatpush.bf16.msrb.mxu3 %v5291_v1  ;;  %1648 = vmatpush.bf16.msra.mxu2 %v5154_v61  ;;  %vm808_vm8 = vmor %vm806_vm7, %vm807_vm6  ;;  %v878_v39 = vld [vmem:[%s6220_s7] sm:$0xf] }
 0x242   :  { %v802_v52 = vmul.f32 %v4347_v40, %v801_v43  ;;  %v799_v2 = vsel %vm5307_vm5, %v5257_v51, %v795_v42  ;;  %1544 = vmatpush.bf16.msrb.mxu0 %v5160_v3  ;;  %1557 = vmatpush.bf16.msrb.mxu1 %v5165_v9  ;;  %v4143_v51 = vld [vmem:[#allocation16 + $0x24] sm:$0xf]  ;;  %v5402_v42 = vperm.slane %v878_v39, 3  ;;  %v5408_v56 = vperm.slane %v878_v39, 2 }
 0x243   :  { %1066 = vmatmul.bf16.gmra.mxu3 %v844_v47  ;;  %1095 = vmatmul.bf16.gmra.mxu0 %v844_v47  ;;  %v816_v20 = vmul.f32 %v799_v2, %v5102_v6  ;;  %v5327_v19 = vor.u32 %v4143_v51, %v3739_v45  ;;  %v5427_v45 = vperm.slane %v878_v39, 0 }
 0x244   :  { %v803_v58 = vmul.f32 0.5, %v802_v52  ;;  %1124 = vmatmul.bf16.gmra.mxu1 %v844_v47  ;;  %1153 = vmatmul.bf16.gmra.mxu2 %v844_v47  ;;  %v5406_v47 = vperm.slane %v878_v39, 1  ;;  %6260 = vst [vmem:[#allocation34_spill] sm:$0xff] %v5408_v56 }
 0x245   :  { %1409 = vmatpush.bf16.msrb.mxu3 %v5311_v0  ;;  %v828_v24 = vmul.f32 %v5122_v29, %v816_v20  ;;  %1649 = vmatpush.bf16.msra.mxu2 %v5170_v15 }
 0x246   :  { %v804_v8 = vsub.f32 1.5, %v803_v58  ;;  %1545 = vmatpush.bf16.msrb.mxu0 %v5179_v21  ;;  %1558 = vmatpush.bf16.msrb.mxu1 %v5185_v30 }
 0x247   :  { %v840_v50 = vadd.f32 %v5132_v38, %v828_v24 }
 0x248   :  { %v805_v13 = vmul.f32 %v4347_v40, %v804_v8 }
 0x249   :  { %1410 = vmatpush.bf16.msrb.mxu3 %v5319_v10  ;;  %1650 = vmatpush.bf16.msra.mxu2 %v5195_v33 }
 0x24a   :  { %v809_v16 = vsel %vm808_vm8, %v4347_v40, %v805_v13  ;;  %1546 = vmatpush.bf16.msrb.mxu0 %v5200_v41  ;;  %1559 = vmatpush.bf16.msrb.mxu1 %v5202_v46 }
 0x24b   :  { %v817_v6 = vmul.f32 %v809_v16, %v5106_v11 }
 0x24d   :  { %v829_v53 = vmul.f32 %v5122_v29, %v817_v6  ;;  %1411 = vmatpush.bf16.msrb.mxu3 %v5327_v19  ;;  %1651 = vmatpush.bf16.msra.mxu2 %v5209_v55 }
 0x24e   :  { %1547 = vmatpush.bf16.msrb.mxu0 %v5218_v63  ;;  %1560 = vmatpush.bf16.msrb.mxu1 %v5224_v7 }
 0x24f   :  { %v841_v32 = vadd.f32 %v5132_v38, %v829_v53 }
 0x251   :  { %v845_v11 = vpack.c.bf16 %v841_v32, %v840_v50  ;;  %1412 = vmatpush.bf16.msrb.mxu3 %v5336_v26  ;;  %1652 = vmatpush.bf16.msra.mxu2 %v5237_v14 }
 0x252   :  { %1548 = vmatpush.bf16.msrb.mxu0 %v5245_v28  ;;  %1561 = vmatpush.bf16.msrb.mxu1 %v5247_v34 }
 0x253   :  { %1071 = vmatmul.bf16.gmra.mxu3 %v845_v11  ;;  %1100 = vmatmul.bf16.gmra.mxu0 %v845_v11 }
 0x254   :  { %1129 = vmatmul.bf16.gmra.mxu1 %v845_v11  ;;  %1158 = vmatmul.bf16.gmra.mxu2 %v845_v11 }
 0x256   :  { %1549 = vmatpush.bf16.msrb.mxu0 %v5255_v44  ;;  %1562 = vmatpush.bf16.msrb.mxu1 %v5263_v54 }
 0x25a   :  { %1550 = vmatpush.bf16.msrb.mxu0 %v5280_v12  ;;  %1563 = vmatpush.bf16.msrb.mxu1 %v5285_v17 }
 0x25e   :  { %1551 = vmatpush.bf16.msrb.mxu0 %v5293_v31  ;;  %1564 = vmatpush.bf16.msrb.mxu1 %v5302_v49 }
 0x263   :  { %1400 = vmatmul.bf16.vlgmr.msra.gmra.mxu3 %v4908_v27  ;;  %1426 = vmatmul.bf16.vlgmr.msra.gmra.mxu0 %v4908_v27 }
 0x264   :  { %1439 = vmatmul.bf16.vlgmr.msra.gmra.mxu1 %v4908_v27  ;;  %1531 = vmatpush.bf16.msra.mxu3 %v5240_v23 }
 0x265   :  { %1671 = vmatpush.bf16.msra.mxu0 %v5160_v3  ;;  %1684 = vmatpush.bf16.msra.mxu1 %v5165_v9 }
 0x268   :  { %1532 = vmatpush.bf16.msra.mxu3 %v5253_v18 }
 0x269   :  { %1672 = vmatpush.bf16.msra.mxu0 %v5179_v21  ;;  %1685 = vmatpush.bf16.msra.mxu1 %v5185_v30 }
 0x26c   :  { %1533 = vmatpush.bf16.msra.mxu3 %v5274_v5 }
 0x26d   :  { %1673 = vmatpush.bf16.msra.mxu0 %v5200_v41  ;;  %1686 = vmatpush.bf16.msra.mxu1 %v5202_v46 }
 0x270   :  { %1534 = vmatpush.bf16.msra.mxu3 %v5291_v1 }
 0x271   :  { %1674 = vmatpush.bf16.msra.mxu0 %v5218_v63  ;;  %1687 = vmatpush.bf16.msra.mxu1 %v5224_v7 }
 0x273   :  { %1413 = vmatmul.bf16.vlgmr.msrb.gmra.mxu3 %v4908_v27 }
 0x274   :  { %1535 = vmatpush.bf16.msra.mxu3 %v5311_v0 }
 0x275   :  { %1675 = vmatpush.bf16.msra.mxu0 %v5245_v28  ;;  %1688 = vmatpush.bf16.msra.mxu1 %v5247_v34 }
 0x278   :  { %1536 = vmatpush.bf16.msra.mxu3 %v5319_v10 }
 0x279   :  { %1676 = vmatpush.bf16.msra.mxu0 %v5255_v44  ;;  %1689 = vmatpush.bf16.msra.mxu1 %v5263_v54 }
 0x27c   :  { %1537 = vmatpush.bf16.msra.mxu3 %v5327_v19 }
 0x27d   :  { %1677 = vmatpush.bf16.msra.mxu0 %v5280_v12  ;;  %1690 = vmatpush.bf16.msra.mxu1 %v5285_v17 }
 0x280   :  { %1538 = vmatpush.bf16.msra.mxu3 %v5336_v26 }
 0x281   :  { %1678 = vmatpush.bf16.msra.mxu0 %v5293_v31  ;;  %1691 = vmatpush.bf16.msra.mxu1 %v5302_v49 }
 0x284   :  { %1658 = vmatpush.bf16.msrb.mxu3 %v5240_v23 }
 0x288   :  { %1659 = vmatpush.bf16.msrb.mxu3 %v5253_v18 }
 0x28c   :  { %1660 = vmatpush.bf16.msrb.mxu3 %v5274_v5 }
 0x290   :  { %1661 = vmatpush.bf16.msrb.mxu3 %v5291_v1 }
 0x294   :  { %1662 = vmatpush.bf16.msrb.mxu3 %v5311_v0 }
 0x298   :  { %1663 = vmatpush.bf16.msrb.mxu3 %v5319_v10 }
 0x29c   :  { %1664 = vmatpush.bf16.msrb.mxu3 %v5327_v19 }
 0x2a0   :  { %1665 = vmatpush.bf16.msrb.mxu3 %v5336_v26  ;;  %v5391_v27 = vpop.f32.mrf.mxu0 }
 0x2a1   :  { %v5393_v29 = vpop.f32.mrf.mxu1 }
 0x2a6   :  { %v1057_v38 = vpop.f32.mrf.mxu3 }
 0x2a7   :  { %v1144_v35 = vpop.f32.mrf.mxu2 }
 0x2a8   :  { %v5395_v40 = vpop.f32.mrf.mxu0 }
 0x2a9   :  { %v5397_v37 = vpop.f32.mrf.mxu1 }
 0x2ae   :  { %v5404_v43 = vpop.f32.mrf.mxu3 }
 0x2af   :  { %v1146_v52 = vpop.f32.mrf.mxu2 }
 0x2b0   :  { %v5411_v59 = vadd.f32 %v1146_v52, %v5402_v42  ;;  %v1091_v62 = vpop.f32.mrf.mxu0 }
 0x2b1   :  { %v5414_v2 = vadd.f32 %v1091_v62, %v5406_v47  ;;  %v1120_v58 = vpop.f32.mrf.mxu1 }
 0x2b2   :  { %v5417_v4 = vadd.f32 %v1120_v58, %v5408_v56 }
 0x2b3   :  { %6261 = vst [vmem:[#allocation35_spill] sm:$0xff] %v5414_v2 }
 0x2b4   :  { %6262 = vst [vmem:[#allocation36_spill] sm:$0xff] %v5417_v4 }
 0x2b6   :  { %v5419_v60 = vpop.f32.mrf.mxu3 }
 0x2b7   :  { %v5421_v8 = vpop.f32.mrf.mxu2 }
 0x2b8   :  { %v5423_v20 = vpop.f32.mrf.mxu0 }
 0x2b9   :  { %6263 = vst [vmem:[#allocation37_spill] sm:$0xff] %v5423_v20  ;;  %v5425_v51 = vpop.f32.mrf.mxu1 }
 0x2ba   :  { %6264 = vst [vmem:[#allocation38_spill] sm:$0xff] %v5425_v51 }
 0x2be   :  { %v1064_v13 = vpop.f32.mrf.mxu3 }
 0x2bf   :  { %v5430_v16 = vadd.f32 %v1064_v13, %v5427_v45  ;;  %v1151_v24 = vpop.f32.mrf.mxu2 }
 0x2c0   :  { %v5433_v6 = vadd.f32 %v1151_v24, %v5402_v42  ;;  %v1096_v57 = vpop.f32.mrf.mxu0 }
 0x2c1   :  { %6265 = vst [vmem:[#allocation39_spill] sm:$0xff] %v5430_v16  ;;  %v5436_v25 = vadd.f32 %v1096_v57, %v5406_v47  ;;  %v1125_v53 = vpop.f32.mrf.mxu1 }
 0x2c2   :  { %6266 = vst [vmem:[#allocation40_spill] sm:$0xff] %v5433_v6  ;;  %v5439_v50 = vadd.f32 %v1125_v53, %v5408_v56 }
 0x2c3   :  { %6267 = vst [vmem:[#allocation41_spill] sm:$0xff] %v5436_v25 }
 0x2c4   :  { %6268 = vst [vmem:[#allocation42_spill] sm:$0xff] %v5439_v50 }
 0x2c6   :  { %v5441_v32 = vpop.f32.mrf.mxu3 }
 0x2c7   :  { %6269 = vst [vmem:[#allocation43_spill] sm:$0xff] %v5441_v32  ;;  %v5443_v11 = vpop.f32.mrf.mxu2 }
 0x2c8   :  { %6270 = vst [vmem:[#allocation44_spill] sm:$0xff] %v5443_v11  ;;  %v5445_v39 = vpop.f32.mrf.mxu0  ;;  %v1058_v11 = vadd.f32 %v1057_v38, %v5427_v45 }
 0x2c9   :  { %6271 = vst [vmem:[#allocation45_spill] sm:$0xff] %v5445_v39  ;;  %v5447_v52 = vpop.f32.mrf.mxu1 }
 0x2ca   :  { %6272 = vst [vmem:[#allocation46_spill] sm:$0xff] %v5447_v52 }
 0x2ce   :  { %v1069_v62 = vpop.f32.mrf.mxu3 }
 0x2cf   :  { %v5450_v58 = vadd.f32 %v1069_v62, %v5427_v45  ;;  %v1156_v13 = vpop.f32.mrf.mxu2 }
 0x2d0   :  { %v5453_v24 = vadd.f32 %v1156_v13, %v5402_v42  ;;  %v1101_v57 = vpop.f32.mrf.mxu0 }
 0x2d1   :  { %6273 = vst [vmem:[#allocation47_spill] sm:$0xff] %v5450_v58  ;;  %v5456_v53 = vadd.f32 %v1101_v57, %v5406_v47  ;;  %v1130_v50 = vpop.f32.mrf.mxu1 }
 0x2d2   :  { %6274 = vst [vmem:[#allocation48_spill] sm:$0xff] %v5453_v24  ;;  %v5459_v25 = vadd.f32 %v1130_v50, %v5408_v56 }
 0x2d3   :  { %6275 = vst [vmem:[#allocation49_spill] sm:$0xff] %v5456_v53 }
 0x2d4   :  { %6276 = vst [vmem:[#allocation50_spill] sm:$0xff] %v5459_v25  ;;  %v1145_v25 = vadd.f32 %v1144_v35, %v5402_v42 }
 0x2d6   :  { %v5461_v32 = vpop.f32.mrf.mxu3 }
 0x2d7   :  { %6277 = vst [vmem:[#allocation51_spill] sm:$0xff] %v5461_v32 }
 0x2d8   :  { %v5463_v39 = vpop.f32.mrf.mxu0 }
 0x2d9   :  { %6278 = vst [vmem:[#allocation52_spill] sm:$0xff] %v5463_v39  ;;  %v5465_v52 = vpop.f32.mrf.mxu1 }
 0x2da   :  { %6279 = vst [vmem:[#allocation53_spill] sm:$0xff] %v5465_v52 }
 0x2de   :  { %v1074_v62 = vpop.f32.mrf.mxu3 }
 0x2df   :  { %v5468_v58 = vadd.f32 %v1074_v62, %v5427_v45  ;;  %v1087_v62 = vadd.f32 %v5391_v27, %v5406_v47 }
 0x2e0   :  { %v1427_v13 = vpop.f32.mrf.mxu0 }
 0x2e1   :  { %6280 = vst [vmem:[#allocation54_spill] sm:$0xff] %v5468_v58  ;;  %v1440_v24 = vpop.f32.mrf.mxu1 }
 0x2e2   :  { %v1447_v32 = vadd.f32 %v1440_v24, %v1145_v25 }
 0x2e4   :  { %v3849_v52 = vmul.f32 -1.442695, %v1447_v32 }
 0x2e6   :  { %v1401_v57 = vpop.f32.mrf.mxu3 }
 0x2e7   :  { %v1444_v53 = vadd.f32 %v1401_v57, %v1058_v11 }
 0x2e8   :  { %v1429_v51 = vpop.f32.mrf.mxu0 }
 0x2e9   :  { %v3847_v16 = vmul.f32 -1.442695, %v1444_v53  ;;  %v1442_v50 = vpop.f32.mrf.mxu1  ;;  %v1116_v51 = vadd.f32 %v5393_v29, %v5408_v56 }
 0x2eb   :  { %4348 = vpow2.f32 %v3847_v16  ;;  %v1446_v16 = vadd.f32 %v1427_v13, %v1116_v51 }
 0x2ee   :  { %v1403_v39 = vpop.f32.mrf.mxu3 }
 0x2f1   :  { %v4349_v20 = vpop.eup %4348 }
 0x2f2   :  { %v1451_v6 = vadd.f32 1.0, %v4349_v20 }
 0x2f4   :  { %4350 = vrcp.f32 %v1451_v6  ;;  %v1463_v32 = vand.u32 2147483648, %v1451_v6  ;;  %v1461_v27 = vand.u32 2147483647, %v1451_v6  ;;  %vm1457_vm10 = vweird.f32 %v1451_v6 }
 0x2f5   :  { %4352 = vpow2.f32 %v3849_v52 }
 0x2f6   :  { %v1414_v58 = vpop.f32.mrf.mxu3  ;;  %vm1462_vm12 = vcmp.eq.f32.partialorder %v1461_v27, 8.507059e+37 }
 0x2f7   :  { %v1445_v38 = vadd.f32 %v1414_v58, %v1087_v62  ;;  %v1464_v58 = vor.u32 1.1754944e-38, %v1463_v32 }
 0x2f9   :  { %v3848_v11 = vmul.f32 -1.442695, %v1445_v38 }
 0x2fa   :  { %v4351_v53 = vpop.eup %4350 }
 0x2fb   :  { %v1453_v57 = vmul.f32 %v4351_v53, %v1451_v6  ;;  %4354 = vpow2.f32 %v3848_v11  ;;  %v4353_v35 = vpop.eup %4352  ;;  %vm1458_vm9 = vweird.f32 %v4351_v53 }
 0x2fc   :  { %4356 = vtanh.f32 %v1446_v16  ;;  %v1490_v39 = vadd.f32 1.0, %v4353_v35  ;;  %vm1459_vm11 = vmor %vm1457_vm10, %vm1458_vm9 }
 0x2fd   :  { %v1454_v25 = vsub.f32 1.0, %v1453_v57 }
 0x2fe   :  { %v1416_v20 = vpop.f32.mrf.mxu3  ;;  %4358 = vrcp.f32 %v1490_v39  ;;  %vm1496_vm2 = vweird.f32 %v1490_v39 }
 0x2ff   :  { %v1455_v24 = vmul.f32 %v4351_v53, %v1454_v25 }
 0x301   :  { %v4355_v52 = vpop.eup %4354  ;;  %v1456_v50 = vadd.f32 %v4351_v53, %v1455_v24 }
 0x302   :  { %v1470_v29 = vadd.f32 1.0, %v4355_v52  ;;  %v4357_v13 = vpop.eup %4356 }
 0x303   :  { %v1460_v62 = vsel %vm1459_vm11, %v4351_v53, %v1456_v50 }
 0x304   :  { %v1465_v38 = vsel %vm1462_vm12, %v1464_v58, %v1460_v62  ;;  %4360 = vrcp.f32 %v1470_v29  ;;  %v4359_v11 = vpop.eup %4358  ;;  %v1482_v20 = vand.u32 2147483648, %v1470_v29  ;;  %v1480_v24 = vand.u32 2147483647, %v1470_v29 }
 0x305   :  { %v1507_v51 = vmul.f32 %v4357_v13, %v1465_v38  ;;  %v1492_v35 = vmul.f32 %v4359_v11, %v1490_v39  ;;  %vm1476_vm14 = vweird.f32 %v1470_v29  ;;  %vm1497_vm1 = vweird.f32 %v4359_v11 }
 0x306   :  { %v1483_v32 = vor.u32 1.1754944e-38, %v1482_v20  ;;  %vm1481_vm0 = vcmp.eq.f32.partialorder %v1480_v24, 8.507059e+37  ;;  %v1502_v13 = vand.u32 2147483648, %v1490_v39  ;;  %v1500_v38 = vand.u32 2147483647, %v1490_v39  ;;  %vm1498_vm3 = vmor %vm1496_vm2, %vm1497_vm1  ;;  %v5515_v39 = vpop.f32.mrf.mxu2 }
 0x307   :  { %v1493_v6 = vsub.f32 1.0, %v1492_v35  ;;  %6282 = vst [vmem:[#allocation56_spill] sm:$0xff] %v5515_v39 }
 0x308   :  { %vm1501_vm4 = vcmp.eq.f32.partialorder %v1500_v38, 8.507059e+37 }
 0x309   :  { %v1494_v27 = vmul.f32 %v4359_v11, %v1493_v6  ;;  %v1089_v6 = vadd.f32 %v5395_v40, %v5406_v47 }
 0x30a   :  { %v4361_v16 = vpop.eup %4360 }
 0x30b   :  { %v1472_v57 = vmul.f32 %v4361_v16, %v1470_v29  ;;  %vm1477_vm13 = vweird.f32 %v4361_v16  ;;  %v1495_v62 = vadd.f32 %v4359_v11, %v1494_v27 }
 0x30c   :  { %vm1478_vm15 = vmor %vm1476_vm14, %vm1477_vm13 }
 0x30d   :  { %v1473_v25 = vsub.f32 1.0, %v1472_v57  ;;  %v1499_v57 = vsel %vm1498_vm3, %v4359_v11, %v1495_v62 }
 0x30f   :  { %v1474_v4 = vmul.f32 %v4361_v16, %v1473_v25 }
 0x311   :  { %v1475_v2 = vadd.f32 %v4361_v16, %v1474_v4  ;;  %v1503_v4 = vor.u32 1.1754944e-38, %v1502_v13 }
 0x313   :  { %v1479_v53 = vsel %vm1478_vm15, %v4361_v16, %v1475_v2  ;;  %v1504_v35 = vsel %vm1501_vm4, %v1503_v4, %v1499_v57 }
 0x314   :  { %v1484_v52 = vsel %vm1481_vm0, %v1483_v32, %v1479_v53  ;;  %v1060_v32 = vadd.f32 %v5404_v43, %v5427_v45 }
 0x315   :  { %v1506_v50 = vmul.f32 0.0, %v1484_v52 }
 0x317   :  { %v5476_v58 = vadd.f32 %v1507_v51, %v1506_v50  ;;  %v5517_v51 = vpop.f32.mrf.mxu2 }
 0x318   :  { %6283 = vst [vmem:[#allocation57_spill] sm:$0xff] %v5517_v51 }
 0x319   :  { %4362 = vtanh.f32 %v5476_v58 }
 0x31f   :  { %v4363_v29 = vpop.eup %4362 }
 0x320   :  { %v5479_v2 = vmul.f32 %v4363_v29, %v1504_v35 }
 0x322   :  { %6281 = vst [vmem:[#allocation55_spill] sm:$0xff] %v5479_v2  ;;  %v1517_v16 = vpack.c.bf16 %v5479_v2, %v5479_v2 }
 0x324   :  { %1526 = vmatmul.bf16.vlgmr.msrb.gmra.mxu2 %v1517_v16  ;;  %1539 = vmatmul.bf16.vlgmr.msra.gmra.mxu3 %v1517_v16 }
 0x325   :  { %1552 = vmatmul.bf16.vlgmr.msrb.gmra.mxu0 %v1517_v16  ;;  %1565 = vmatmul.bf16.vlgmr.msrb.gmra.mxu1 %v1517_v16 }
 0x326   :  { %1772 = vmatpush.bf16.msrb.mxu2 %v5113_v22  ;;  %1785 = vmatpush.bf16.msra.mxu3 %v5240_v23 }
 0x327   :  { %1798 = vmatpush.bf16.msrb.mxu0 %v5160_v3  ;;  %1811 = vmatpush.bf16.msrb.mxu1 %v5165_v9 }
 0x32a   :  { %1773 = vmatpush.bf16.msrb.mxu2 %v5128_v36  ;;  %1786 = vmatpush.bf16.msra.mxu3 %v5253_v18 }
 0x32b   :  { %1799 = vmatpush.bf16.msrb.mxu0 %v5179_v21  ;;  %1812 = vmatpush.bf16.msrb.mxu1 %v5185_v30 }
 0x32e   :  { %1774 = vmatpush.bf16.msrb.mxu2 %v5137_v48  ;;  %1787 = vmatpush.bf16.msra.mxu3 %v5274_v5 }
 0x32f   :  { %1800 = vmatpush.bf16.msrb.mxu0 %v5200_v41  ;;  %1813 = vmatpush.bf16.msrb.mxu1 %v5202_v46 }
 0x332   :  { %1775 = vmatpush.bf16.msrb.mxu2 %v5154_v61  ;;  %1788 = vmatpush.bf16.msra.mxu3 %v5291_v1 }
 0x333   :  { %1801 = vmatpush.bf16.msrb.mxu0 %v5218_v63  ;;  %1814 = vmatpush.bf16.msrb.mxu1 %v5224_v7 }
 0x336   :  { %1776 = vmatpush.bf16.msrb.mxu2 %v5170_v15  ;;  %1789 = vmatpush.bf16.msra.mxu3 %v5311_v0 }
 0x337   :  { %1802 = vmatpush.bf16.msrb.mxu0 %v5245_v28  ;;  %1815 = vmatpush.bf16.msrb.mxu1 %v5247_v34 }
 0x33a   :  { %1777 = vmatpush.bf16.msrb.mxu2 %v5195_v33  ;;  %1790 = vmatpush.bf16.msra.mxu3 %v5319_v10 }
 0x33b   :  { %1803 = vmatpush.bf16.msrb.mxu0 %v5255_v44  ;;  %1816 = vmatpush.bf16.msrb.mxu1 %v5263_v54 }
 0x33e   :  { %1778 = vmatpush.bf16.msrb.mxu2 %v5209_v55  ;;  %1791 = vmatpush.bf16.msra.mxu3 %v5327_v19 }
 0x33f   :  { %1804 = vmatpush.bf16.msrb.mxu0 %v5280_v12  ;;  %1817 = vmatpush.bf16.msrb.mxu1 %v5285_v17 }
 0x342   :  { %1779 = vmatpush.bf16.msrb.mxu2 %v5237_v14  ;;  %1792 = vmatpush.bf16.msra.mxu3 %v5336_v26 }
 0x343   :  { %1805 = vmatpush.bf16.msrb.mxu0 %v5293_v31  ;;  %1818 = vmatpush.bf16.msrb.mxu1 %v5302_v49 }
 0x3a2   :  { %v1553_v11 = vpop.f32.mrf.mxu0  ;;  %v1566_v25 = vpop.f32.mrf.mxu1 }
 0x3a3   :  { %v1573_v20 = vadd.f32 %v1566_v25, %v5411_v59 }
 0x3a5   :  { %v3852_v24 = vmul.f32 -1.442695, %v1573_v20  ;;  %v1118_v20 = vadd.f32 %v5397_v37, %v5408_v56 }
 0x3a7   :  { %4364 = vpow2.f32 %v3852_v24  ;;  %v1527_v53 = vpop.f32.mrf.mxu2  ;;  %v1540_v27 = vpop.f32.mrf.mxu3 }
 0x3a8   :  { %v1570_v52 = vadd.f32 %v1527_v53, %v1060_v32  ;;  %v1571_v50 = vadd.f32 %v1540_v27, %v1089_v6  ;;  %v1572_v32 = vadd.f32 %v1553_v11, %v1118_v20 }
 0x3aa   :  { %v3850_v62 = vmul.f32 -1.442695, %v1570_v52  ;;  %v3851_v13 = vmul.f32 -1.442695, %v1571_v50  ;;  %v1555_v38 = vpop.f32.mrf.mxu0  ;;  %v1568_v57 = vpop.f32.mrf.mxu1 }
 0x3ac   :  { %4366 = vpow2.f32 %v3850_v62 }
 0x3ad   :  { %v4365_v4 = vpop.eup %4364  ;;  %4368 = vpow2.f32 %v3851_v13 }
 0x3ae   :  { %v1616_v35 = vadd.f32 1.0, %v4365_v4 }
 0x3af   :  { %v1529_v59 = vpop.f32.mrf.mxu2  ;;  %v1542_v29 = vpop.f32.mrf.mxu3 }
 0x3b0   :  { %4370 = vrcp.f32 %v1616_v35  ;;  %vm1622_vm14 = vweird.f32 %v1616_v35 }
 0x3b2   :  { %v4367_v16 = vpop.eup %4366 }
 0x3b3   :  { %v4369_v40 = vpop.eup %4368  ;;  %v1577_v25 = vadd.f32 1.0, %v4367_v16 }
 0x3b4   :  { %v1596_v43 = vadd.f32 1.0, %v4369_v40 }
 0x3b5   :  { %4372 = vrcp.f32 %v1577_v25  ;;  %v1589_v13 = vand.u32 2147483648, %v1577_v25  ;;  %v1587_v4 = vand.u32 2147483647, %v1577_v25  ;;  %vm1583_vm7 = vweird.f32 %v1577_v25 }
 0x3b6   :  { %4374 = vrcp.f32 %v1596_v43  ;;  %v4371_v24 = vpop.eup %4370  ;;  %v1608_v59 = vand.u32 2147483648, %v1596_v43  ;;  %v1606_v16 = vand.u32 2147483647, %v1596_v43  ;;  %vm1602_vm9 = vweird.f32 %v1596_v43 }
 0x3b7   :  { %v1618_v50 = vmul.f32 %v4371_v24, %v1616_v35  ;;  %4376 = vtanh.f32 %v1572_v32  ;;  %v1590_v11 = vor.u32 1.1754944e-38, %v1589_v13  ;;  %vm1588_vm10 = vcmp.eq.f32.partialorder %v1587_v4, 8.507059e+37 }
 0x3b8   :  { %v1609_v32 = vor.u32 1.1754944e-38, %v1608_v59  ;;  %vm1607_vm12 = vcmp.eq.f32.partialorder %v1606_v16, 8.507059e+37  ;;  %vm1623_vm13 = vweird.f32 %v4371_v24  ;;  %v1628_v13 = vand.u32 2147483648, %v1616_v35 }
 0x3b9   :  { %v1619_v40 = vsub.f32 1.0, %v1618_v50  ;;  %vm1624_vm15 = vmor %vm1622_vm14, %vm1623_vm13  ;;  %v1063_v59 = vadd.f32 %v5419_v60, %v5427_v45 }
 0x3bb   :  { %v4373_v6 = vpop.eup %4372  ;;  %v1620_v51 = vmul.f32 %v4371_v24, %v1619_v40 }
 0x3bc   :  { %v4375_v53 = vpop.eup %4374  ;;  %v1579_v27 = vmul.f32 %v4373_v6, %v1577_v25  ;;  %vm1584_vm5 = vweird.f32 %v4373_v6 }
 0x3bd   :  { %v1598_v52 = vmul.f32 %v4375_v53, %v1596_v43  ;;  %vm1603_vm6 = vweird.f32 %v4375_v53  ;;  %vm1585_vm8 = vmor %vm1583_vm7, %vm1584_vm5  ;;  %v1621_v25 = vadd.f32 %v4371_v24, %v1620_v51  ;;  %v1626_v43 = vand.u32 2147483647, %v1616_v35 }
 0x3be   :  { %v1580_v62 = vsub.f32 1.0, %v1579_v27  ;;  %vm1604_vm11 = vmor %vm1602_vm9, %vm1603_vm6  ;;  %v4377_v27 = vpop.eup %4376 }
 0x3bf   :  { %v1599_v38 = vsub.f32 1.0, %v1598_v52  ;;  %vm1627_vm0 = vcmp.eq.f32.partialorder %v1626_v43, 8.507059e+37 }
 0x3c0   :  { %v1581_v57 = vmul.f32 %v4373_v6, %v1580_v62 }
 0x3c1   :  { %v1600_v29 = vmul.f32 %v4375_v53, %v1599_v38 }
 0x3c2   :  { %v1582_v37 = vadd.f32 %v4373_v6, %v1581_v57  ;;  %v1629_v57 = vor.u32 1.1754944e-38, %v1628_v13 }
 0x3c3   :  { %v1601_v20 = vadd.f32 %v4375_v53, %v1600_v29 }
 0x3c4   :  { %v1586_v2 = vsel %vm1585_vm8, %v4373_v6, %v1582_v37  ;;  %v1625_v6 = vsel %vm1624_vm15, %v4371_v24, %v1621_v25  ;;  %v6284_v37 = vld [vmem:[#allocation35_spill] sm:$0xff] }
 0x3c5   :  { %v1591_v52 = vsel %vm1588_vm10, %v1590_v11, %v1586_v2  ;;  %v1605_v62 = vsel %vm1604_vm11, %v4375_v53, %v1601_v20  ;;  %v1630_v53 = vsel %vm1627_vm0, %v1629_v57, %v1625_v6 }
 0x3c6   :  { %v1633_v39 = vmul.f32 %v4377_v27, %v1591_v52  ;;  %v1610_v38 = vsel %vm1607_vm12, %v1609_v32, %v1605_v62 }
 0x3c7   :  { %v1632_v56 = vmul.f32 %v1610_v38, %v5476_v58 }
 0x3c9   :  { %v5527_v50 = vadd.f32 %v1633_v39, %v1632_v56  ;;  %v1150_v56 = vadd.f32 %v5421_v8, %v5402_v42 }
 0x3cb   :  { %4378 = vtanh.f32 %v5527_v50 }
 0x3d1   :  { %v4379_v2 = vpop.eup %4378 }
 0x3d2   :  { %v5530_v4 = vmul.f32 %v4379_v2, %v1630_v53  ;;  %v6285_v53 = vld [vmem:[#allocation36_spill] sm:$0xff] }
 0x3d4   :  { %v1644_v58 = vpack.c.bf16 %v5530_v4, %v5530_v4 }
 0x3d6   :  { %1653 = vmatmul.bf16.vlgmr.msra.gmra.mxu2 %v1644_v58  ;;  %1666 = vmatmul.bf16.vlgmr.msrb.gmra.mxu3 %v1644_v58 }
 0x3d7   :  { %1679 = vmatmul.bf16.vlgmr.msra.gmra.mxu0 %v1644_v58  ;;  %1692 = vmatmul.bf16.vlgmr.msra.gmra.mxu1 %v1644_v58 }
 0x3d8   :  { %1899 = vmatpush.bf16.msra.mxu2 %v5113_v22  ;;  %1912 = vmatpush.bf16.msrb.mxu3 %v5240_v23 }
 0x3d9   :  { %1925 = vmatpush.bf16.msra.mxu0 %v5160_v3  ;;  %1938 = vmatpush.bf16.msra.mxu1 %v5165_v9 }
 0x3dc   :  { %1900 = vmatpush.bf16.msra.mxu2 %v5128_v36  ;;  %1913 = vmatpush.bf16.msrb.mxu3 %v5253_v18 }
 0x3dd   :  { %1926 = vmatpush.bf16.msra.mxu0 %v5179_v21  ;;  %1939 = vmatpush.bf16.msra.mxu1 %v5185_v30 }
 0x3e0   :  { %1901 = vmatpush.bf16.msra.mxu2 %v5137_v48  ;;  %1914 = vmatpush.bf16.msrb.mxu3 %v5274_v5 }
 0x3e1   :  { %1927 = vmatpush.bf16.msra.mxu0 %v5200_v41  ;;  %1940 = vmatpush.bf16.msra.mxu1 %v5202_v46 }
 0x3e4   :  { %1902 = vmatpush.bf16.msra.mxu2 %v5154_v61  ;;  %1915 = vmatpush.bf16.msrb.mxu3 %v5291_v1 }
 0x3e5   :  { %1928 = vmatpush.bf16.msra.mxu0 %v5218_v63  ;;  %1941 = vmatpush.bf16.msra.mxu1 %v5224_v7 }
 0x3e8   :  { %1903 = vmatpush.bf16.msra.mxu2 %v5170_v15  ;;  %1916 = vmatpush.bf16.msrb.mxu3 %v5311_v0 }
 0x3e9   :  { %1929 = vmatpush.bf16.msra.mxu0 %v5245_v28  ;;  %1942 = vmatpush.bf16.msra.mxu1 %v5247_v34 }
 0x3ec   :  { %1904 = vmatpush.bf16.msra.mxu2 %v5195_v33  ;;  %1917 = vmatpush.bf16.msrb.mxu3 %v5319_v10 }
 0x3ed   :  { %1930 = vmatpush.bf16.msra.mxu0 %v5255_v44  ;;  %1943 = vmatpush.bf16.msra.mxu1 %v5263_v54 }
 0x3f0   :  { %1905 = vmatpush.bf16.msra.mxu2 %v5209_v55  ;;  %1918 = vmatpush.bf16.msrb.mxu3 %v5327_v19 }
 0x3f1   :  { %1931 = vmatpush.bf16.msra.mxu0 %v5280_v12  ;;  %1944 = vmatpush.bf16.msra.mxu1 %v5285_v17 }
 0x3f4   :  { %1906 = vmatpush.bf16.msra.mxu2 %v5237_v14  ;;  %1919 = vmatpush.bf16.msrb.mxu3 %v5336_v26 }
 0x3f5   :  { %1932 = vmatpush.bf16.msra.mxu0 %v5293_v31  ;;  %1945 = vmatpush.bf16.msra.mxu1 %v5302_v49 }
 0x454   :  { %v1680_v39 = vpop.f32.mrf.mxu0  ;;  %v1693_v51 = vpop.f32.mrf.mxu1 }
 0x455   :  { %v1700_v35 = vadd.f32 %v1693_v51, %v1150_v56  ;;  %v1699_v58 = vadd.f32 %v1680_v39, %v6285_v53 }
 0x457   :  { %v3855_v24 = vmul.f32 -1.442695, %v1700_v35 }
 0x459   :  { %4380 = vpow2.f32 %v3855_v24  ;;  %v1654_v29 = vpop.f32.mrf.mxu2  ;;  %v1667_v16 = vpop.f32.mrf.mxu3 }
 0x45a   :  { %v1697_v40 = vadd.f32 %v1654_v29, %v1063_v59  ;;  %v1698_v11 = vadd.f32 %v1667_v16, %v6284_v37 }
 0x45c   :  { %v3853_v20 = vmul.f32 -1.442695, %v1697_v40  ;;  %v3854_v32 = vmul.f32 -1.442695, %v1698_v11  ;;  %v1682_v27 = vpop.f32.mrf.mxu0  ;;  %v1695_v52 = vpop.f32.mrf.mxu1 }
 0x45e   :  { %4382 = vpow2.f32 %v3853_v20 }
 0x45f   :  { %v4381_v62 = vpop.eup %4380  ;;  %4384 = vpow2.f32 %v3854_v32 }
 0x460   :  { %v1743_v25 = vadd.f32 1.0, %v4381_v62 }
 0x461   :  { %v1656_v8 = vpop.f32.mrf.mxu2  ;;  %v1669_v38 = vpop.f32.mrf.mxu3 }
 0x462   :  { %4386 = vrcp.f32 %v1743_v25  ;;  %vm1749_vm10 = vweird.f32 %v1743_v25 }
 0x464   :  { %v4383_v13 = vpop.eup %4382 }
 0x465   :  { %v4385_v43 = vpop.eup %4384  ;;  %v1704_v6 = vadd.f32 1.0, %v4383_v13 }
 0x466   :  { %v1723_v60 = vadd.f32 1.0, %v4385_v43 }
 0x467   :  { %4388 = vrcp.f32 %v1704_v6  ;;  %v1716_v29 = vand.u32 2147483648, %v1704_v6  ;;  %v1714_v37 = vand.u32 2147483647, %v1704_v6  ;;  %vm1710_vm3 = vweird.f32 %v1704_v6 }
 0x468   :  { %4390 = vrcp.f32 %v1723_v60  ;;  %v4387_v57 = vpop.eup %4386  ;;  %v1735_v11 = vand.u32 2147483648, %v1723_v60  ;;  %v1733_v32 = vand.u32 2147483647, %v1723_v60  ;;  %vm1729_vm5 = vweird.f32 %v1723_v60 }
 0x469   :  { %v1745_v24 = vmul.f32 %v4387_v57, %v1743_v25  ;;  %4392 = vtanh.f32 %v1699_v58  ;;  %v1717_v39 = vor.u32 1.1754944e-38, %v1716_v29  ;;  %vm1715_vm6 = vcmp.eq.f32.partialorder %v1714_v37, 8.507059e+37 }
 0x46a   :  { %v1736_v38 = vor.u32 1.1754944e-38, %v1735_v11  ;;  %vm1734_vm8 = vcmp.eq.f32.partialorder %v1733_v32, 8.507059e+37  ;;  %vm1750_vm9 = vweird.f32 %v4387_v57  ;;  %v1755_v29 = vand.u32 2147483648, %v1743_v25  ;;  %v6287_v11 = vld [vmem:[#allocation40_spill] sm:$0xff] }
 0x46b   :  { %v1746_v27 = vsub.f32 1.0, %v1745_v24  ;;  %vm1751_vm11 = vmor %vm1749_vm10, %vm1750_vm9 }
 0x46d   :  { %v4389_v2 = vpop.eup %4388  ;;  %v1747_v58 = vmul.f32 %v4387_v57, %v1746_v27  ;;  %v6288_v27 = vld [vmem:[#allocation37_spill] sm:$0xff] }
 0x46e   :  { %v4391_v56 = vpop.eup %4390  ;;  %v1706_v51 = vmul.f32 %v4389_v2, %v1704_v6  ;;  %vm1711_vm1 = vweird.f32 %v4389_v2 }
 0x46f   :  { %v1725_v35 = vmul.f32 %v4391_v56, %v1723_v60  ;;  %vm1730_vm2 = vweird.f32 %v4391_v56  ;;  %vm1712_vm4 = vmor %vm1710_vm3, %vm1711_vm1  ;;  %v4393_v13 = vpop.eup %4392  ;;  %v1748_v6 = vadd.f32 %v4387_v57, %v1747_v58  ;;  %v1753_v60 = vand.u32 2147483647, %v1743_v25 }
 0x470   :  { %v1707_v59 = vsub.f32 1.0, %v1706_v51  ;;  %vm1731_vm7 = vmor %vm1729_vm5, %vm1730_vm2 }
 0x471   :  { %v1726_v16 = vsub.f32 1.0, %v1725_v35  ;;  %vm1754_vm12 = vcmp.eq.f32.partialorder %v1753_v60, 8.507059e+37 }
 0x472   :  { %v1708_v40 = vmul.f32 %v4389_v2, %v1707_v59 }
 0x473   :  { %v1727_v20 = vmul.f32 %v4391_v56, %v1726_v16  ;;  %v1756_v16 = vor.u32 1.1754944e-38, %v1755_v29 }
 0x474   :  { %v1709_v52 = vadd.f32 %v4389_v2, %v1708_v40 }
 0x475   :  { %v1728_v62 = vadd.f32 %v4391_v56, %v1727_v20 }
 0x476   :  { %v1713_v8 = vsel %vm1712_vm4, %v4389_v2, %v1709_v52  ;;  %v1752_v2 = vsel %vm1751_vm11, %v4387_v57, %v1748_v6  ;;  %v1094_v52 = vadd.f32 %v6288_v27, %v5406_v47 }
 0x477   :  { %v1718_v43 = vsel %vm1715_vm6, %v1717_v39, %v1713_v8  ;;  %v1732_v53 = vsel %vm1731_vm7, %v4391_v56, %v1728_v62  ;;  %v1757_v40 = vsel %vm1754_vm12, %v1756_v16, %v1752_v2  ;;  %v6289_v8 = vld [vmem:[#allocation39_spill] sm:$0xff] }
 0x478   :  { %v1760_v51 = vmul.f32 %v4393_v13, %v1718_v43  ;;  %v1737_v35 = vsel %vm1734_vm8, %v1736_v38, %v1732_v53 }
 0x479   :  { %v1759_v59 = vmul.f32 %v1737_v35, %v5527_v50 }
 0x47b   :  { %v5573_v24 = vadd.f32 %v1760_v51, %v1759_v59 }
 0x47d   :  { %4394 = vtanh.f32 %v5573_v24 }
 0x483   :  { %v4395_v56 = vpop.eup %4394 }
 0x484   :  { %v5576_v37 = vmul.f32 %v4395_v56, %v1757_v40  ;;  %v6290_v40 = vld [vmem:[#allocation34_spill] sm:$0xff] }
 0x486   :  { %6286 = vst [vmem:[#allocation35_spill] sm:$0xff] %v5576_v37  ;;  %v1771_v50 = vpack.c.bf16 %v5576_v37, %v5576_v37 }
 0x488   :  { %1780 = vmatmul.bf16.vlgmr.msrb.gmra.mxu2 %v1771_v50  ;;  %1793 = vmatmul.bf16.vlgmr.msra.gmra.mxu3 %v1771_v50 }
 0x489   :  { %1806 = vmatmul.bf16.vlgmr.msrb.gmra.mxu0 %v1771_v50  ;;  %1819 = vmatmul.bf16.vlgmr.msrb.gmra.mxu1 %v1771_v50  ;;  %v6291_v50 = vld [vmem:[#allocation38_spill] sm:$0xff] }
 0x48a   :  { %2026 = vmatpush.bf16.msrb.mxu2 %v5113_v22  ;;  %2039 = vmatpush.bf16.msra.mxu3 %v5240_v23 }
 0x48b   :  { %2052 = vmatpush.bf16.msrb.mxu0 %v5160_v3  ;;  %2065 = vmatpush.bf16.msrb.mxu1 %v5165_v9 }
 0x48e   :  { %2027 = vmatpush.bf16.msrb.mxu2 %v5128_v36  ;;  %2040 = vmatpush.bf16.msra.mxu3 %v5253_v18 }
 0x48f   :  { %2053 = vmatpush.bf16.msrb.mxu0 %v5179_v21  ;;  %2066 = vmatpush.bf16.msrb.mxu1 %v5185_v30 }
 0x492   :  { %2028 = vmatpush.bf16.msrb.mxu2 %v5137_v48  ;;  %2041 = vmatpush.bf16.msra.mxu3 %v5274_v5 }
 0x493   :  { %2054 = vmatpush.bf16.msrb.mxu0 %v5200_v41  ;;  %2067 = vmatpush.bf16.msrb.mxu1 %v5202_v46 }
 0x496   :  { %2029 = vmatpush.bf16.msrb.mxu2 %v5154_v61  ;;  %2042 = vmatpush.bf16.msra.mxu3 %v5291_v1 }
 0x497   :  { %2055 = vmatpush.bf16.msrb.mxu0 %v5218_v63  ;;  %2068 = vmatpush.bf16.msrb.mxu1 %v5224_v7 }
 0x49a   :  { %2030 = vmatpush.bf16.msrb.mxu2 %v5170_v15  ;;  %2043 = vmatpush.bf16.msra.mxu3 %v5311_v0 }
 0x49b   :  { %2056 = vmatpush.bf16.msrb.mxu0 %v5245_v28  ;;  %2069 = vmatpush.bf16.msrb.mxu1 %v5247_v34 }
 0x49e   :  { %2031 = vmatpush.bf16.msrb.mxu2 %v5195_v33  ;;  %2044 = vmatpush.bf16.msra.mxu3 %v5319_v10 }
 0x49f   :  { %2057 = vmatpush.bf16.msrb.mxu0 %v5255_v44  ;;  %2070 = vmatpush.bf16.msrb.mxu1 %v5263_v54 }
 0x4a2   :  { %2032 = vmatpush.bf16.msrb.mxu2 %v5209_v55  ;;  %2045 = vmatpush.bf16.msra.mxu3 %v5327_v19 }
 0x4a3   :  { %2058 = vmatpush.bf16.msrb.mxu0 %v5280_v12  ;;  %2071 = vmatpush.bf16.msrb.mxu1 %v5285_v17 }
 0x4a6   :  { %2033 = vmatpush.bf16.msrb.mxu2 %v5237_v14  ;;  %2046 = vmatpush.bf16.msra.mxu3 %v5336_v26 }
 0x4a7   :  { %2059 = vmatpush.bf16.msrb.mxu0 %v5293_v31  ;;  %2072 = vmatpush.bf16.msrb.mxu1 %v5302_v49 }
 0x506   :  { %v1807_v25 = vpop.f32.mrf.mxu0  ;;  %v1820_v57 = vpop.f32.mrf.mxu1 }
 0x507   :  { %v1827_v20 = vadd.f32 %v1820_v57, %v6287_v11  ;;  %v1123_v57 = vadd.f32 %v6291_v50, %v6290_v40 }
 0x509   :  { %v3858_v32 = vmul.f32 -1.442695, %v1827_v20 }
 0x50b   :  { %4396 = vpow2.f32 %v3858_v32  ;;  %v1781_v39 = vpop.f32.mrf.mxu2  ;;  %v1794_v62 = vpop.f32.mrf.mxu3  ;;  %v1826_v32 = vadd.f32 %v1807_v25, %v1123_v57 }
 0x50c   :  { %v1824_v38 = vadd.f32 %v1781_v39, %v6289_v8  ;;  %v1825_v13 = vadd.f32 %v1794_v62, %v1094_v52 }
 0x50e   :  { %v3856_v43 = vmul.f32 -1.442695, %v1824_v38  ;;  %v3857_v53 = vmul.f32 -1.442695, %v1825_v13  ;;  %v1809_v58 = vpop.f32.mrf.mxu0  ;;  %v1822_v51 = vpop.f32.mrf.mxu1 }
 0x510   :  { %4398 = vpow2.f32 %v3856_v43 }
 0x511   :  { %v4397_v35 = vpop.eup %4396  ;;  %4400 = vpow2.f32 %v3857_v53 }
 0x512   :  { %v1870_v29 = vadd.f32 1.0, %v4397_v35 }
 0x513   :  { %v1783_v59 = vpop.f32.mrf.mxu2  ;;  %v1796_v6 = vpop.f32.mrf.mxu3 }
 0x514   :  { %4402 = vrcp.f32 %v1870_v29  ;;  %vm1876_vm6 = vweird.f32 %v1870_v29 }
 0x516   :  { %v4399_v60 = vpop.eup %4398 }
 0x517   :  { %v4401_v2 = vpop.eup %4400  ;;  %v1831_v16 = vadd.f32 1.0, %v4399_v60 }
 0x518   :  { %v1850_v56 = vadd.f32 1.0, %v4401_v2 }
 0x519   :  { %4404 = vrcp.f32 %v1831_v16  ;;  %v1843_v38 = vand.u32 2147483648, %v1831_v16  ;;  %v1841_v53 = vand.u32 2147483647, %v1831_v16  ;;  %vm1837_vm15 = vweird.f32 %v1831_v16 }
 0x51a   :  { %4406 = vrcp.f32 %v1850_v56  ;;  %v4403_v11 = vpop.eup %4402  ;;  %v1862_v58 = vand.u32 2147483648, %v1850_v56  ;;  %v1860_v35 = vand.u32 2147483647, %v1850_v56  ;;  %vm1856_vm1 = vweird.f32 %v1850_v56 }
 0x51b   :  { %v1872_v62 = vmul.f32 %v4403_v11, %v1870_v29  ;;  %4408 = vtanh.f32 %v1826_v32  ;;  %v1844_v25 = vor.u32 1.1754944e-38, %v1843_v38  ;;  %vm1842_vm2 = vcmp.eq.f32.partialorder %v1841_v53, 8.507059e+37 }
 0x51c   :  { %v1863_v50 = vor.u32 1.1754944e-38, %v1862_v58  ;;  %vm1861_vm4 = vcmp.eq.f32.partialorder %v1860_v35, 8.507059e+37  ;;  %vm1877_vm5 = vweird.f32 %v4403_v11  ;;  %v1882_v38 = vand.u32 2147483648, %v1870_v29 }
 0x51d   :  { %v1873_v59 = vsub.f32 1.0, %v1872_v62  ;;  %vm1878_vm7 = vmor %vm1876_vm6, %vm1877_vm5 }
 0x51f   :  { %v4405_v20 = vpop.eup %4404 }
 0x520   :  { %v4407_v27 = vpop.eup %4406  ;;  %v1833_v52 = vmul.f32 %v4405_v20, %v1831_v16  ;;  %vm1838_vm13 = vweird.f32 %v4405_v20 }
 0x521   :  { %v1852_v39 = vmul.f32 %v4407_v27, %v1850_v56  ;;  %vm1857_vm14 = vweird.f32 %v4407_v27  ;;  %vm1839_vm0 = vmor %vm1837_vm15, %vm1838_vm13  ;;  %v4409_v57 = vpop.eup %4408  ;;  %v1880_v56 = vand.u32 2147483647, %v1870_v29 }
 0x522   :  { %v1834_v8 = vsub.f32 1.0, %v1833_v52  ;;  %vm1858_vm3 = vmor %vm1856_vm1, %vm1857_vm14 }
 0x523   :  { %v1853_v13 = vsub.f32 1.0, %v1852_v39  ;;  %v1874_v39 = vmul.f32 %v4403_v11, %v1873_v59  ;;  %vm1881_vm8 = vcmp.eq.f32.partialorder %v1880_v56, 8.507059e+37 }
 0x524   :  { %v1835_v43 = vmul.f32 %v4405_v20, %v1834_v8 }
 0x525   :  { %v1854_v51 = vmul.f32 %v4407_v27, %v1853_v13  ;;  %v1875_v16 = vadd.f32 %v4403_v11, %v1874_v39 }
 0x526   :  { %v1836_v6 = vadd.f32 %v4405_v20, %v1835_v43  ;;  %v1883_v43 = vor.u32 1.1754944e-38, %v1882_v38 }
 0x527   :  { %v1855_v60 = vadd.f32 %v4407_v27, %v1854_v51 }
 0x528   :  { %v1840_v2 = vsel %vm1839_vm0, %v4405_v20, %v1836_v6  ;;  %v1879_v20 = vsel %vm1878_vm7, %v4403_v11, %v1875_v16  ;;  %v6294_v6 = vld [vmem:[#allocation43_spill] sm:$0xff] }
 0x529   :  { %v1845_v32 = vsel %vm1842_vm2, %v1844_v25, %v1840_v2  ;;  %v1859_v52 = vsel %vm1858_vm3, %v4407_v27, %v1855_v60  ;;  %v1884_v53 = vsel %vm1881_vm8, %v1883_v43, %v1879_v20  ;;  %v1068_v25 = vadd.f32 %v6294_v6, %v5427_v45 }
 0x52a   :  { %v1887_v8 = vmul.f32 %v4409_v57, %v1845_v32  ;;  %v1864_v13 = vsel %vm1861_vm4, %v1863_v50, %v1859_v52  ;;  %v6295_v57 = vld [vmem:[#allocation41_spill] sm:$0xff] }
 0x52b   :  { %v1886_v37 = vmul.f32 %v1864_v13, %v5573_v24 }
 0x52d   :  { %v5619_v62 = vadd.f32 %v1887_v8, %v1886_v37  ;;  %v6293_v37 = vld [vmem:[#allocation44_spill] sm:$0xff] }
 0x52e   :  { %v1155_v29 = vadd.f32 %v6293_v37, %v5402_v42 }
 0x52f   :  { %4410 = vtanh.f32 %v5619_v62 }
 0x535   :  { %v4411_v27 = vpop.eup %4410 }
 0x536   :  { %v5622_v58 = vmul.f32 %v4411_v27, %v1884_v53 }
 0x538   :  { %6292 = vst [vmem:[#allocation36_spill] sm:$0xff] %v5622_v58  ;;  %v1898_v24 = vpack.c.bf16 %v5622_v58, %v5622_v58 }
 0x53a   :  { %1907 = vmatmul.bf16.vlgmr.msra.gmra.mxu2 %v1898_v24  ;;  %1920 = vmatmul.bf16.vlgmr.msrb.gmra.mxu3 %v1898_v24 }
 0x53b   :  { %1933 = vmatmul.bf16.vlgmr.msra.gmra.mxu0 %v1898_v24  ;;  %1946 = vmatmul.bf16.vlgmr.msra.gmra.mxu1 %v1898_v24 }
 0x53c   :  { %2153 = vmatpush.bf16.msra.mxu2 %v5113_v22  ;;  %2166 = vmatpush.bf16.msrb.mxu3 %v5240_v23 }
 0x53d   :  { %2179 = vmatpush.bf16.msra.mxu0 %v5160_v3  ;;  %2192 = vmatpush.bf16.msra.mxu1 %v5165_v9 }
 0x540   :  { %2154 = vmatpush.bf16.msra.mxu2 %v5128_v36  ;;  %2167 = vmatpush.bf16.msrb.mxu3 %v5253_v18 }
 0x541   :  { %2180 = vmatpush.bf16.msra.mxu0 %v5179_v21  ;;  %2193 = vmatpush.bf16.msra.mxu1 %v5185_v30 }
 0x544   :  { %2155 = vmatpush.bf16.msra.mxu2 %v5137_v48  ;;  %2168 = vmatpush.bf16.msrb.mxu3 %v5274_v5 }
 0x545   :  { %2181 = vmatpush.bf16.msra.mxu0 %v5200_v41  ;;  %2194 = vmatpush.bf16.msra.mxu1 %v5202_v46 }
 0x548   :  { %2156 = vmatpush.bf16.msra.mxu2 %v5154_v61  ;;  %2169 = vmatpush.bf16.msrb.mxu3 %v5291_v1 }
 0x549   :  { %2182 = vmatpush.bf16.msra.mxu0 %v5218_v63  ;;  %2195 = vmatpush.bf16.msra.mxu1 %v5224_v7 }
 0x54c   :  { %2157 = vmatpush.bf16.msra.mxu2 %v5170_v15  ;;  %2170 = vmatpush.bf16.msrb.mxu3 %v5311_v0 }
 0x54d   :  { %2183 = vmatpush.bf16.msra.mxu0 %v5245_v28  ;;  %2196 = vmatpush.bf16.msra.mxu1 %v5247_v34 }
 0x550   :  { %2158 = vmatpush.bf16.msra.mxu2 %v5195_v33  ;;  %2171 = vmatpush.bf16.msrb.mxu3 %v5319_v10 }
 0x551   :  { %2184 = vmatpush.bf16.msra.mxu0 %v5255_v44  ;;  %2197 = vmatpush.bf16.msra.mxu1 %v5263_v54 }
 0x554   :  { %2159 = vmatpush.bf16.msra.mxu2 %v5209_v55  ;;  %2172 = vmatpush.bf16.msrb.mxu3 %v5327_v19 }
 0x555   :  { %2185 = vmatpush.bf16.msra.mxu0 %v5280_v12  ;;  %2198 = vmatpush.bf16.msra.mxu1 %v5285_v17 }
 0x558   :  { %2160 = vmatpush.bf16.msra.mxu2 %v5237_v14  ;;  %2173 = vmatpush.bf16.msrb.mxu3 %v5336_v26 }
 0x559   :  { %2186 = vmatpush.bf16.msra.mxu0 %v5293_v31  ;;  %2199 = vmatpush.bf16.msra.mxu1 %v5302_v49 }
 0x5b8   :  { %v1934_v11 = vpop.f32.mrf.mxu0  ;;  %v1947_v51 = vpop.f32.mrf.mxu1 }
 0x5b9   :  { %v1954_v35 = vadd.f32 %v1947_v51, %v1155_v29  ;;  %v6296_v51 = vld [vmem:[#allocation42_spill] sm:$0xff] }
 0x5bb   :  { %v3861_v59 = vmul.f32 -1.442695, %v1954_v35  ;;  %v1953_v35 = vadd.f32 %v1934_v11, %v6296_v51 }
 0x5bd   :  { %4412 = vpow2.f32 %v3861_v59  ;;  %v1908_v60 = vpop.f32.mrf.mxu2  ;;  %v1921_v2 = vpop.f32.mrf.mxu3 }
 0x5be   :  { %v1951_v50 = vadd.f32 %v1908_v60, %v1068_v25  ;;  %v1952_v32 = vadd.f32 %v1921_v2, %v6295_v57 }
 0x5c0   :  { %v3859_v52 = vmul.f32 -1.442695, %v1951_v50  ;;  %v3860_v39 = vmul.f32 -1.442695, %v1952_v32  ;;  %v1936_v8 = vpop.f32.mrf.mxu0  ;;  %v1949_v13 = vpop.f32.mrf.mxu1 }
 0x5c2   :  { %4414 = vpow2.f32 %v3859_v52 }
 0x5c3   :  { %v4413_v16 = vpop.eup %4412  ;;  %4416 = vpow2.f32 %v3860_v39 }
 0x5c4   :  { %v1997_v20 = vadd.f32 1.0, %v4413_v16 }
 0x5c5   :  { %v1910_v38 = vpop.f32.mrf.mxu2  ;;  %v1923_v56 = vpop.f32.mrf.mxu3 }
 0x5c6   :  { %4418 = vrcp.f32 %v1997_v20  ;;  %vm2003_vm2 = vweird.f32 %v1997_v20 }
 0x5c8   :  { %v4415_v43 = vpop.eup %4414 }
 0x5c9   :  { %v4417_v27 = vpop.eup %4416  ;;  %v1958_v53 = vadd.f32 1.0, %v4415_v43 }
 0x5ca   :  { %v1977_v24 = vadd.f32 1.0, %v4417_v27 }
 0x5cb   :  { %4420 = vrcp.f32 %v1958_v53  ;;  %v1970_v50 = vand.u32 2147483648, %v1958_v53  ;;  %v1968_v52 = vand.u32 2147483647, %v1958_v53  ;;  %vm1964_vm11 = vweird.f32 %v1958_v53 }
 0x5cc   :  { %4422 = vrcp.f32 %v1977_v24  ;;  %v4419_v37 = vpop.eup %4418  ;;  %v1989_v39 = vand.u32 2147483648, %v1977_v24  ;;  %v1987_v13 = vand.u32 2147483647, %v1977_v24  ;;  %vm1983_vm13 = vweird.f32 %v1977_v24 }
 0x5cd   :  { %v1999_v60 = vmul.f32 %v4419_v37, %v1997_v20  ;;  %4424 = vtanh.f32 %v1953_v35  ;;  %v1971_v11 = vor.u32 1.1754944e-38, %v1970_v50  ;;  %vm1969_vm14 = vcmp.eq.f32.partialorder %v1968_v52, 8.507059e+37 }
 0x5ce   :  { %v1990_v27 = vor.u32 1.1754944e-38, %v1989_v39  ;;  %vm1988_vm0 = vcmp.eq.f32.partialorder %v1987_v13, 8.507059e+37  ;;  %vm2004_vm1 = vweird.f32 %v4419_v37  ;;  %v2009_v50 = vand.u32 2147483648, %v1997_v20 }
 0x5cf   :  { %v2000_v16 = vsub.f32 1.0, %v1999_v60  ;;  %vm2005_vm3 = vmor %vm2003_vm2, %vm2004_vm1 }
 0x5d1   :  { %v4421_v29 = vpop.eup %4420 }
 0x5d2   :  { %v4423_v59 = vpop.eup %4422  ;;  %v1960_v6 = vmul.f32 %v4421_v29, %v1958_v53  ;;  %vm1965_vm9 = vweird.f32 %v4421_v29 }
 0x5d3   :  { %v1979_v25 = vmul.f32 %v4423_v59, %v1977_v24  ;;  %vm1984_vm10 = vweird.f32 %v4423_v59  ;;  %vm1966_vm12 = vmor %vm1964_vm11, %vm1965_vm9  ;;  %v4425_v51 = vpop.eup %4424  ;;  %v2007_v24 = vand.u32 2147483647, %v1997_v20 }
 0x5d4   :  { %v1961_v2 = vsub.f32 1.0, %v1960_v6  ;;  %vm1985_vm15 = vmor %vm1983_vm13, %vm1984_vm10 }
 0x5d5   :  { %v1980_v57 = vsub.f32 1.0, %v1979_v25  ;;  %v2001_v25 = vmul.f32 %v4419_v37, %v2000_v16  ;;  %vm2008_vm4 = vcmp.eq.f32.partialorder %v2007_v24, 8.507059e+37 }
 0x5d6   :  { %v1962_v32 = vmul.f32 %v4421_v29, %v1961_v2 }
 0x5d7   :  { %v1981_v8 = vmul.f32 %v4423_v59, %v1980_v57  ;;  %v2002_v53 = vadd.f32 %v4419_v37, %v2001_v25 }
 0x5d8   :  { %v1963_v38 = vadd.f32 %v4421_v29, %v1962_v32  ;;  %v2010_v32 = vor.u32 1.1754944e-38, %v2009_v50 }
 0x5d9   :  { %v1982_v56 = vadd.f32 %v4423_v59, %v1981_v8 }
 0x5da   :  { %v1967_v43 = vsel %vm1966_vm12, %v4421_v29, %v1963_v38  ;;  %v2006_v29 = vsel %vm2005_vm3, %v4419_v37, %v2002_v53 }
 0x5db   :  { %v1972_v35 = vsel %vm1969_vm14, %v1971_v11, %v1967_v43  ;;  %v1986_v6 = vsel %vm1985_vm15, %v4423_v59, %v1982_v56  ;;  %v2011_v52 = vsel %vm2008_vm4, %v2010_v32, %v2006_v29 }
 0x5dc   :  { %v2014_v2 = vmul.f32 %v4425_v51, %v1972_v35  ;;  %v1991_v57 = vsel %vm1988_vm0, %v1990_v27, %v1986_v6 }
 0x5dd   :  { %v2013_v58 = vmul.f32 %v1991_v57, %v5619_v62 }
 0x5df   :  { %v5665_v60 = vadd.f32 %v2014_v2, %v2013_v58 }
 0x5e1   :  { %4426 = vtanh.f32 %v5665_v60 }
 0x5e7   :  { %v4427_v59 = vpop.eup %4426 }
 0x5e8   :  { %v5668_v39 = vmul.f32 %v4427_v59, %v2011_v52 }
 0x5ea   :  { %v2025_v62 = vpack.c.bf16 %v5668_v39, %v5668_v39 }
 0x5ec   :  { %2034 = vmatmul.bf16.vlgmr.msrb.gmra.mxu2 %v2025_v62  ;;  %2047 = vmatmul.bf16.vlgmr.msra.gmra.mxu3 %v2025_v62 }
 0x5ed   :  { %2060 = vmatmul.bf16.vlgmr.msrb.gmra.mxu0 %v2025_v62  ;;  %2073 = vmatmul.bf16.vlgmr.msrb.gmra.mxu1 %v2025_v62 }
 0x5ee   :  { %2280 = vmatpush.bf16.msrb.mxu2 %v5113_v22  ;;  %2293 = vmatpush.bf16.msra.mxu3 %v5240_v23 }
 0x5ef   :  { %2306 = vmatpush.bf16.msrb.mxu0 %v5160_v3  ;;  %2319 = vmatpush.bf16.msrb.mxu1 %v5165_v9  ;;  %v6298_v9 = vld [vmem:[#allocation45_spill] sm:$0xff] }
 0x5f2   :  { %2281 = vmatpush.bf16.msrb.mxu2 %v5128_v36  ;;  %2294 = vmatpush.bf16.msra.mxu3 %v5253_v18 }
 0x5f3   :  { %2307 = vmatpush.bf16.msrb.mxu0 %v5179_v21  ;;  %2320 = vmatpush.bf16.msrb.mxu1 %v5185_v30 }
 0x5f6   :  { %2282 = vmatpush.bf16.msrb.mxu2 %v5137_v48  ;;  %2295 = vmatpush.bf16.msra.mxu3 %v5274_v5  ;;  %v6297_v48 = vld [vmem:[#allocation48_spill] sm:$0xff] }
 0x5f7   :  { %2308 = vmatpush.bf16.msrb.mxu0 %v5200_v41  ;;  %2321 = vmatpush.bf16.msrb.mxu1 %v5202_v46 }
 0x5fa   :  { %2283 = vmatpush.bf16.msrb.mxu2 %v5154_v61  ;;  %2296 = vmatpush.bf16.msra.mxu3 %v5291_v1 }
 0x5fb   :  { %2309 = vmatpush.bf16.msrb.mxu0 %v5218_v63  ;;  %2322 = vmatpush.bf16.msrb.mxu1 %v5224_v7 }
 0x5fe   :  { %2284 = vmatpush.bf16.msrb.mxu2 %v5170_v15  ;;  %2297 = vmatpush.bf16.msra.mxu3 %v5311_v0  ;;  %v1099_v15 = vadd.f32 %v6298_v9, %v5406_v47 }
 0x5ff   :  { %2310 = vmatpush.bf16.msrb.mxu0 %v5245_v28  ;;  %2323 = vmatpush.bf16.msrb.mxu1 %v5247_v34 }
 0x602   :  { %2285 = vmatpush.bf16.msrb.mxu2 %v5195_v33  ;;  %2298 = vmatpush.bf16.msra.mxu3 %v5319_v10  ;;  %v6299_v33 = vld [vmem:[#allocation47_spill] sm:$0xff] }
 0x603   :  { %2311 = vmatpush.bf16.msrb.mxu0 %v5255_v44  ;;  %2324 = vmatpush.bf16.msrb.mxu1 %v5263_v54 }
 0x606   :  { %2286 = vmatpush.bf16.msrb.mxu2 %v5209_v55  ;;  %2299 = vmatpush.bf16.msra.mxu3 %v5327_v19 }
 0x607   :  { %2312 = vmatpush.bf16.msrb.mxu0 %v5280_v12  ;;  %2325 = vmatpush.bf16.msrb.mxu1 %v5285_v17  ;;  %v6300_v17 = vld [vmem:[#allocation46_spill] sm:$0xff] }
 0x608   :  { %v1128_v1 = vadd.f32 %v6300_v17, %v6290_v40 }
 0x60a   :  { %2287 = vmatpush.bf16.msrb.mxu2 %v5237_v14  ;;  %2300 = vmatpush.bf16.msra.mxu3 %v5336_v26 }
 0x60b   :  { %2313 = vmatpush.bf16.msrb.mxu0 %v5293_v31  ;;  %2326 = vmatpush.bf16.msrb.mxu1 %v5302_v49 }
 0x66a   :  { %v2061_v22 = vpop.f32.mrf.mxu0  ;;  %v2074_v36 = vpop.f32.mrf.mxu1 }
 0x66b   :  { %v2081_v61 = vadd.f32 %v2074_v36, %v6297_v48  ;;  %v2080_v0 = vadd.f32 %v2061_v22, %v1128_v1 }
 0x66d   :  { %v3864_v3 = vmul.f32 -1.442695, %v2081_v61 }
 0x66f   :  { %4428 = vpow2.f32 %v3864_v3  ;;  %v2035_v21 = vpop.f32.mrf.mxu2  ;;  %v2048_v30 = vpop.f32.mrf.mxu3 }
 0x670   :  { %v2078_v41 = vadd.f32 %v2035_v21, %v6299_v33  ;;  %v2079_v46 = vadd.f32 %v2048_v30, %v1099_v15  ;;  %v6301_v15 = vld [vmem:[#allocation56_spill] sm:$0xff] }
 0x671   :  { %v1160_v21 = vadd.f32 %v6301_v15, %v5402_v42 }
 0x672   :  { %v3862_v55 = vmul.f32 -1.442695, %v2078_v41  ;;  %v3863_v63 = vmul.f32 -1.442695, %v2079_v46  ;;  %v2063_v7 = vpop.f32.mrf.mxu0  ;;  %v2076_v14 = vpop.f32.mrf.mxu1 }
 0x674   :  { %4430 = vpow2.f32 %v3862_v55  ;;  %v6302_v55 = vld [vmem:[#allocation51_spill] sm:$0xff] }
 0x675   :  { %v4429_v23 = vpop.eup %4428  ;;  %4432 = vpow2.f32 %v3863_v63  ;;  %v1073_v63 = vadd.f32 %v6302_v55, %v5427_v45  ;;  %v2424_v55 = vld [vmem:[#allocation17 + $0x78] sm:$0xff] }
 0x676   :  { %v2124_v18 = vadd.f32 1.0, %v4429_v23 }
 0x677   :  { %v2037_v28 = vpop.f32.mrf.mxu2  ;;  %v2050_v34 = vpop.f32.mrf.mxu3 }
 0x678   :  { %4434 = vrcp.f32 %v2124_v18  ;;  %v2136_v62 = vand.u32 2147483648, %v2124_v18  ;;  %vm2130_vm14 = vweird.f32 %v2124_v18  ;;  %v2134_v22 = vand.u32 2147483647, %v2124_v18  ;;  %v6303_v28 = vld [vmem:[#allocation49_spill] sm:$0xff] }
 0x67a   :  { %v4431_v44 = vpop.eup %4430  ;;  %v2137_v48 = vor.u32 1.1754944e-38, %v2136_v62  ;;  %vm2135_vm0 = vcmp.eq.f32.partialorder %v2134_v22, 8.507059e+37 }
 0x67b   :  { %v4433_v54 = vpop.eup %4432  ;;  %v2085_v5 = vadd.f32 1.0, %v4431_v44 }
 0x67c   :  { %v2104_v12 = vadd.f32 1.0, %v4433_v54 }
 0x67d   :  { %4436 = vrcp.f32 %v2085_v5  ;;  %v2097_v37 = vand.u32 2147483648, %v2085_v5  ;;  %v2095_v16 = vand.u32 2147483647, %v2085_v5  ;;  %vm2091_vm7 = vweird.f32 %v2085_v5 }
 0x67e   :  { %4438 = vrcp.f32 %v2104_v12  ;;  %v4435_v31 = vpop.eup %4434  ;;  %v2116_v38 = vand.u32 2147483648, %v2104_v12  ;;  %v2114_v56 = vand.u32 2147483647, %v2104_v12  ;;  %vm2110_vm9 = vweird.f32 %v2104_v12 }
 0x67f   :  { %v2126_v58 = vmul.f32 %v4435_v31, %v2124_v18  ;;  %4440 = vtanh.f32 %v2080_v0  ;;  %v2098_v51 = vor.u32 1.1754944e-38, %v2097_v37  ;;  %vm2096_vm10 = vcmp.eq.f32.partialorder %v2095_v16, 8.507059e+37 }
 0x680   :  { %v2117_v25 = vor.u32 1.1754944e-38, %v2116_v38  ;;  %vm2115_vm12 = vcmp.eq.f32.partialorder %v2114_v56, 8.507059e+37  ;;  %vm2131_vm13 = vweird.f32 %v4435_v31 }
 0x681   :  { %v2127_v43 = vsub.f32 1.0, %v2126_v58  ;;  %vm2132_vm15 = vmor %vm2130_vm14, %vm2131_vm13  ;;  %v6304_v58 = vld [vmem:[#allocation50_spill] sm:$0xff] }
 0x683   :  { %v4437_v49 = vpop.eup %4436  ;;  %v2128_v50 = vmul.f32 %v4435_v31, %v2127_v43 }
 0x684   :  { %v4439_v10 = vpop.eup %4438  ;;  %v2087_v19 = vmul.f32 %v4437_v49, %v2085_v5  ;;  %vm2092_vm5 = vweird.f32 %v4437_v49 }
 0x685   :  { %v2106_v26 = vmul.f32 %v4439_v10, %v2104_v12  ;;  %vm2111_vm6 = vweird.f32 %v4439_v10  ;;  %vm2093_vm8 = vmor %vm2091_vm7, %vm2092_vm5  ;;  %v4441_v2 = vpop.eup %4440  ;;  %v2129_v52 = vadd.f32 %v4435_v31, %v2128_v50 }
 0x686   :  { %v2088_v20 = vsub.f32 1.0, %v2087_v19  ;;  %vm2112_vm11 = vmor %vm2110_vm9, %vm2111_vm6 }
 0x687   :  { %v2107_v8 = vsub.f32 1.0, %v2106_v26  ;;  %v2133_v36 = vsel %vm2132_vm15, %v4435_v31, %v2129_v52 }
 0x688   :  { %v2089_v13 = vmul.f32 %v4437_v49, %v2088_v20  ;;  %v2138_v3 = vsel %vm2135_vm0, %v2137_v48, %v2133_v36 }
 0x689   :  { %v2108_v11 = vmul.f32 %v4439_v10, %v2107_v8 }
 0x68a   :  { %v2090_v27 = vadd.f32 %v4437_v49, %v2089_v13 }
 0x68b   :  { %v2109_v35 = vadd.f32 %v4439_v10, %v2108_v11 }
 0x68c   :  { %v2094_v6 = vsel %vm2093_vm8, %v4437_v49, %v2090_v27 }
 0x68d   :  { %v2099_v57 = vsel %vm2096_vm10, %v2098_v51, %v2094_v6  ;;  %v2113_v53 = vsel %vm2112_vm11, %v4439_v10, %v2109_v35 }
 0x68e   :  { %v2141_v24 = vmul.f32 %v4441_v2, %v2099_v57  ;;  %v2118_v29 = vsel %vm2115_vm12, %v2117_v25, %v2113_v53 }
 0x68f   :  { %v2140_v32 = vmul.f32 %v2118_v29, %v5665_v60 }
 0x691   :  { %v5711_v59 = vadd.f32 %v2141_v24, %v2140_v32 }
 0x693   :  { %4442 = vtanh.f32 %v5711_v59 }
 0x699   :  { %v4443_v61 = vpop.eup %4442 }
 0x69a   :  { %v5714_v9 = vmul.f32 %v4443_v61, %v2138_v3 }
 0x69c   :  { %v2152_v60 = vpack.c.bf16 %v5714_v9, %v5714_v9 }
 0x69e   :  { %2161 = vmatmul.bf16.vlgmr.msra.gmra.mxu2 %v2152_v60  ;;  %2174 = vmatmul.bf16.vlgmr.msrb.gmra.mxu3 %v2152_v60 }
 0x69f   :  { %2187 = vmatmul.bf16.vlgmr.msra.gmra.mxu0 %v2152_v60  ;;  %2200 = vmatmul.bf16.vlgmr.msra.gmra.mxu1 %v2152_v60 }
 0x6a0   :  { %2440 = vmatpush.msra.mxu2 %v2424_v55  ;;  %2484 = vmatpush.msrb.mxu3 %v2424_v55 }
 0x71c   :  { %v2188_v30 = vpop.f32.mrf.mxu0  ;;  %v2201_v33 = vpop.f32.mrf.mxu1 }
 0x71d   :  { %v2208_v41 = vadd.f32 %v2201_v33, %v1160_v21  ;;  %v2207_v20 = vadd.f32 %v2188_v30, %v6304_v58 }
 0x71f   :  { %v3867_v46 = vmul.f32 -1.442695, %v2208_v41 }
 0x721   :  { %4444 = vpow2.f32 %v3867_v46  ;;  %v2162_v7 = vpop.f32.mrf.mxu2  ;;  %v2175_v14 = vpop.f32.mrf.mxu3 }
 0x722   :  { %v2205_v23 = vadd.f32 %v2162_v7, %v1073_v63  ;;  %v2206_v34 = vadd.f32 %v2175_v14, %v6303_v28  ;;  %v2423_v63 = vld [vmem:[#allocation17 + $0x70] sm:$0xff]  ;;  %v2422_v7 = vld [vmem:[#allocation17 + $0x68] sm:$0xff]  ;;  %v2421_v14 = vld [vmem:[#allocation17 + $0x60] sm:$0xff] }
 0x723   :  { %2441 = vmatpush.msra.mxu2 %v2423_v63  ;;  %2485 = vmatpush.msrb.mxu3 %v2423_v63  ;;  %v6305_v28 = vld [vmem:[#allocation57_spill] sm:$0xff] }
 0x724   :  { %v3865_v18 = vmul.f32 -1.442695, %v2205_v23  ;;  %v3866_v44 = vmul.f32 -1.442695, %v2206_v34  ;;  %v2190_v54 = vpop.f32.mrf.mxu0  ;;  %v2203_v5 = vpop.f32.mrf.mxu1  ;;  %v2420_v23 = vld [vmem:[#allocation17 + $0x58] sm:$0xff]  ;;  %v1162_v34 = vadd.f32 %v6305_v28, %v5402_v42 }
 0x725   :  { %2442 = vmatpush.msra.mxu2 %v2422_v7  ;;  %2486 = vmatpush.msrb.mxu3 %v2422_v7  ;;  %v2419_v54 = vld [vmem:[#allocation17 + $0x50] sm:$0xff] }
 0x726   :  { %4446 = vpow2.f32 %v3865_v18 }
 0x727   :  { %v4445_v12 = vpop.eup %4444  ;;  %4448 = vpow2.f32 %v3866_v44  ;;  %2443 = vmatpush.msra.mxu2 %v2421_v14  ;;  %2487 = vmatpush.msrb.mxu3 %v2421_v14 }
 0x728   :  { %v2251_v31 = vadd.f32 1.0, %v4445_v12  ;;  %v2418_v12 = vld [vmem:[#allocation17 + $0x48] sm:$0xff] }
 0x729   :  { %v2164_v17 = vpop.f32.mrf.mxu2  ;;  %v2177_v1 = vpop.f32.mrf.mxu3  ;;  %2444 = vmatpush.msra.mxu2 %v2420_v23  ;;  %2488 = vmatpush.msrb.mxu3 %v2420_v23 }
 0x72a   :  { %4450 = vrcp.f32 %v2251_v31  ;;  %v2263_v60 = vand.u32 2147483648, %v2251_v31  ;;  %vm2257_vm10 = vweird.f32 %v2251_v31  ;;  %v2261_v15 = vand.u32 2147483647, %v2251_v31  ;;  %v6306_v1 = vld [vmem:[#allocation52_spill] sm:$0xff] }
 0x72b   :  { %2445 = vmatpush.msra.mxu2 %v2419_v54  ;;  %2489 = vmatpush.msrb.mxu3 %v2419_v54 }
 0x72c   :  { %v4447_v49 = vpop.eup %4446  ;;  %v2264_v30 = vor.u32 1.1754944e-38, %v2263_v60  ;;  %vm2262_vm12 = vcmp.eq.f32.partialorder %v2261_v15, 8.507059e+37 }
 0x72d   :  { %v4449_v0 = vpop.eup %4448  ;;  %v2212_v10 = vadd.f32 1.0, %v4447_v49  ;;  %2446 = vmatpush.msra.mxu2 %v2418_v12  ;;  %2490 = vmatpush.msrb.mxu3 %v2418_v12  ;;  %v2417_v49 = vld [vmem:[#allocation17 + $0x40] sm:$0xff] }
 0x72e   :  { %v2231_v45 = vadd.f32 1.0, %v4449_v0 }
 0x72f   :  { %4452 = vrcp.f32 %v2212_v10  ;;  %v2224_v11 = vand.u32 2147483648, %v2212_v10  ;;  %v2222_v27 = vand.u32 2147483647, %v2212_v10  ;;  %vm2218_vm3 = vweird.f32 %v2212_v10  ;;  %2447 = vmatpush.msra.mxu2 %v2417_v49  ;;  %2491 = vmatpush.msrb.mxu3 %v2417_v49 }
 0x730   :  { %4454 = vrcp.f32 %v2231_v45  ;;  %v4451_v19 = vpop.eup %4450  ;;  %v2243_v51 = vand.u32 2147483648, %v2231_v45  ;;  %v2241_v6 = vand.u32 2147483647, %v2231_v45  ;;  %vm2237_vm5 = vweird.f32 %v2231_v45 }
 0x731   :  { %v2253_v16 = vmul.f32 %v4451_v19, %v2251_v31  ;;  %4456 = vtanh.f32 %v2207_v20  ;;  %v2225_v57 = vor.u32 1.1754944e-38, %v2224_v11  ;;  %vm2223_vm6 = vcmp.eq.f32.partialorder %v2222_v27, 8.507059e+37  ;;  %v2412_v11 = vld [vmem:[#allocation17 + $0x18] sm:$0xff] }
 0x732   :  { %v2244_v24 = vor.u32 1.1754944e-38, %v2243_v51  ;;  %vm2242_vm8 = vcmp.eq.f32.partialorder %v2241_v6, 8.507059e+37  ;;  %vm2258_vm9 = vweird.f32 %v4451_v19  ;;  %v1104_v31 = vadd.f32 %v6306_v1, %v5406_v47  ;;  %v2413_v47 = vld [vmem:[#allocation17 + $0x20] sm:$0xff]  ;;  %v2411_v51 = vld [vmem:[#allocation17 + $0x10] sm:$0xff]  ;;  %v2410_v6 = vld [vmem:[#allocation17 + $0x8] sm:$0xff] }
 0x733   :  { %v2254_v25 = vsub.f32 1.0, %v2253_v16  ;;  %vm2259_vm11 = vmor %vm2257_vm10, %vm2258_vm9  ;;  %v2414_v16 = vld [vmem:[#allocation17 + $0x28] sm:$0xff] }
 0x735   :  { %v4453_v26 = vpop.eup %4452  ;;  %v2255_v62 = vmul.f32 %v4451_v19, %v2254_v25 }
 0x736   :  { %v4455_v37 = vpop.eup %4454  ;;  %v2214_v8 = vmul.f32 %v4453_v26, %v2212_v10  ;;  %vm2219_vm1 = vweird.f32 %v4453_v26  ;;  %v6307_v10 = vld [vmem:[#allocation54_spill] sm:$0xff] }
 0x737   :  { %v2233_v13 = vmul.f32 %v4455_v37, %v2231_v45  ;;  %vm2238_vm2 = vweird.f32 %v4455_v37  ;;  %vm2220_vm4 = vmor %vm2218_vm3, %vm2219_vm1  ;;  %v4457_v29 = vpop.eup %4456  ;;  %v2256_v3 = vadd.f32 %v4451_v19, %v2255_v62 }
 0x738   :  { %v2215_v38 = vsub.f32 1.0, %v2214_v8  ;;  %vm2239_vm7 = vmor %vm2237_vm5, %vm2238_vm2 }
 0x739   :  { %v2234_v56 = vsub.f32 1.0, %v2233_v13  ;;  %v2260_v21 = vsel %vm2259_vm11, %v4451_v19, %v2256_v3  ;;  %v2415_v13 = vld [vmem:[#allocation17 + $0x30] sm:$0xff] }
 0x73a   :  { %v2216_v43 = vmul.f32 %v4453_v26, %v2215_v38  ;;  %v2265_v41 = vsel %vm2262_vm12, %v2264_v30, %v2260_v21 }
 0x73b   :  { %v2235_v35 = vmul.f32 %v4455_v37, %v2234_v56 }
 0x73c   :  { %v2217_v2 = vadd.f32 %v4453_v26, %v2216_v43 }
 0x73d   :  { %v2236_v53 = vadd.f32 %v4455_v37, %v2235_v35 }
 0x73e   :  { %v2221_v50 = vsel %vm2220_vm4, %v4453_v26, %v2217_v2  ;;  %v2416_v26 = vld [vmem:[#allocation17 + $0x38] sm:$0xff] }
 0x73f   :  { %v2226_v32 = vsel %vm2223_vm6, %v2225_v57, %v2221_v50  ;;  %v2240_v52 = vsel %vm2239_vm7, %v4455_v37, %v2236_v53  ;;  %2448 = vmatpush.msra.mxu2 %v2416_v26  ;;  %2492 = vmatpush.msrb.mxu3 %v2416_v26  ;;  %v2409_v53 = vld [vmem:[#allocation17] sm:$0xff]  ;;  %v6308_v50 = vld [vmem:[#allocation53_spill] sm:$0xff] }
 0x740   :  { %v2268_v22 = vmul.f32 %v4457_v29, %v2226_v32  ;;  %v2245_v36 = vsel %vm2242_vm8, %v2244_v24, %v2240_v52  ;;  %v1133_v24 = vadd.f32 %v6308_v50, %v6290_v40  ;;  %v4910_v32 = vmov 8.0  }
 0x741   :  { %v2267_v48 = vmul.f32 %v2245_v36, %v5711_v59  ;;  %2449 = vmatpush.msra.mxu2 %v2415_v13  ;;  %2493 = vmatpush.msrb.mxu3 %v2415_v13 }
 0x743   :  { %v5725_v61 = vadd.f32 %v2268_v22, %v2267_v48  ;;  %2450 = vmatpush.msra.mxu2 %v2414_v16  ;;  %2494 = vmatpush.msrb.mxu3 %v2414_v16 }
 0x745   :  { %4458 = vtanh.f32 %v5725_v61  ;;  %2451 = vmatpush.msra.mxu2 %v2413_v47  ;;  %2495 = vmatpush.msrb.mxu3 %v2413_v47 }
 0x747   :  { %2452 = vmatpush.msra.mxu2 %v2412_v11  ;;  %2496 = vmatpush.msrb.mxu3 %v2412_v11 }
 0x749   :  { %2453 = vmatpush.msra.mxu2 %v2411_v51  ;;  %2497 = vmatpush.msrb.mxu3 %v2411_v51 }
 0x74b   :  { %v4459_v33 = vpop.eup %4458  ;;  %2454 = vmatpush.msra.mxu2 %v2410_v6  ;;  %2498 = vmatpush.msrb.mxu3 %v2410_v6 }
 0x74c   :  { %v5728_v46 = vmul.f32 %v4459_v33, %v2265_v41 }
 0x74d   :  { %2455 = vmatpush.msra.mxu2 %v2409_v53  ;;  %2499 = vmatpush.msrb.mxu3 %v2409_v53  ;;  %v4192_v53 = vld [vmem:[#allocation19 + $0xac] sm:$0xf] }
 0x74e   :  { %v2279_v59 = vpack.c.bf16 %v5728_v46, %v5728_v46 }
 0x750   :  { %2288 = vmatmul.bf16.vlgmr.msrb.gmra.mxu2 %v2279_v59  ;;  %2301 = vmatmul.bf16.vlgmr.msra.gmra.mxu3 %v2279_v59 }
 0x751   :  { %2314 = vmatmul.bf16.vlgmr.msrb.gmra.mxu0 %v2279_v59  ;;  %2327 = vmatmul.bf16.vlgmr.msrb.gmra.mxu1 %v2279_v59 }
 0x7ce   :  { %v5734_v18 = vpop.f32.mrf.mxu0  ;;  %v2328_v44 = vpop.f32.mrf.mxu1 }
 0x7cf   :  { %v2335_v5 = vadd.f32 %v2328_v44, %v1162_v34  ;;  %v2334_v62 = vadd.f32 %v5734_v18, %v1133_v24  ;;  %v3959_v24 = vld [vmem:[#allocation19 + $0xb4] sm:$0xf0] }
 0x7d1   :  { %v3870_v17 = vmul.f32 -1.442695, %v2335_v5 }
 0x7d3   :  { %4460 = vpow2.f32 %v3870_v17  ;;  %v2289_v0 = vpop.f32.mrf.mxu2  ;;  %v2302_v42 = vpop.f32.mrf.mxu3 }
 0x7d4   :  { %v2332_v45 = vadd.f32 %v2289_v0, %v6307_v10  ;;  %v2333_v19 = vadd.f32 %v2302_v42, %v1104_v31  ;;  %v6309_v0 = vld [vmem:[#allocation55_spill] sm:$0xff] }
 0x7d5   :  { %v2425_v42 = vadd.f32 %v5530_v4, %v6309_v0 }
 0x7d6   :  { %v3868_v58 = vmul.f32 -1.442695, %v2332_v45  ;;  %v3869_v20 = vmul.f32 -1.442695, %v2333_v19  ;;  %v2317_v37 = vpop.f32.mrf.mxu0  ;;  %v2330_v8 = vpop.f32.mrf.mxu1  ;;  %v6310_v45 = vld [vmem:[#allocation35_spill] sm:$0xff] }
 0x7d7   :  { %v2426_v19 = vadd.f32 %v2425_v42, %v6310_v45  ;;  %v6311_v37 = vld [vmem:[#allocation36_spill] sm:$0xff] }
 0x7d8   :  { %4462 = vpow2.f32 %v3868_v58 }
 0x7d9   :  { %v4461_v38 = vpop.eup %4460  ;;  %4464 = vpow2.f32 %v3869_v20  ;;  %v2427_v8 = vadd.f32 %v2426_v19, %v6311_v37  ;;  %v4186_v19 = vld [vmem:[#allocation19 + $0x7c] sm:$0xf] }
 0x7da   :  { %v5739_v27 = vadd.f32 1.0, %v4461_v38 }
 0x7db   :  { %v2291_v56 = vpop.f32.mrf.mxu2  ;;  %v2304_v43 = vpop.f32.mrf.mxu3  ;;  %v2428_v16 = vadd.f32 %v2427_v8, %v5668_v39 }
 0x7dc   :  { %4466 = vrcp.f32 %v5739_v27  ;;  %v2390_v58 = vand.u32 2147483648, %v5739_v27  ;;  %vm2384_vm6 = vweird.f32 %v5739_v27 }
 0x7dd   :  { %v2429_v11 = vadd.f32 %v2428_v16, %v5714_v9  ;;  %v4184_v16 = vld [vmem:[#allocation19 + $0x68] sm:$0xf0] }
 0x7de   :  { %v4463_v35 = vpop.eup %4462  ;;  %v2391_v47 = vor.u32 1.1754944e-38, %v2390_v58  ;;  %v3935_v58 = vld [vmem:[#allocation19 + $0x84] sm:$0xf0] }
 0x7df   :  { %v4465_v25 = vpop.eup %4464  ;;  %v2339_v2 = vadd.f32 1.0, %v4463_v35  ;;  %v2430_v35 = vadd.f32 %v2429_v11, %v5728_v46  ;;  %v3938_v8 = vor.u32 %v4186_v19, %v3935_v58  ;;  %v3923_v11 = vld [vmem:[#allocation19 + $0x6c] sm:$0xf0] }
 0x7e0   :  { %v2358_v57 = vadd.f32 1.0, %v4465_v25 }
 0x7e1   :  { %4468 = vrcp.f32 %v2339_v2  ;;  %v2351_v15 = vand.u32 2147483648, %v2339_v2  ;;  %v2349_v40 = vand.u32 2147483647, %v2339_v2  ;;  %vm2345_vm15 = vweird.f32 %v2339_v2 }
 0x7e2   :  { %4470 = vrcp.f32 %v2358_v57  ;;  %v5744_v29 = vpop.eup %4466  ;;  %v2370_v41 = vand.u32 2147483648, %v2358_v57  ;;  %v2368_v55 = vand.u32 2147483647, %v2358_v57  ;;  %vm2364_vm1 = vweird.f32 %v2358_v57 }
 0x7e3   :  { %4472 = vrcp.f32 %v4910_v32  ;;  %v2380_v3 = vmul.f32 %v5744_v29, %v5739_v27  ;;  %v2352_v14 = vor.u32 1.1754944e-38, %v2351_v15  ;;  %vm2350_vm2 = vcmp.eq.f32.partialorder %v2349_v40, 8.507059e+37  ;;  %v4194_v32 = vld [vmem:[#allocation19 + $0xb8] sm:$0xf0] }
 0x7e4   :  { %4474 = vtanh.f32 %v2334_v62  ;;  %v2371_v18 = vor.u32 1.1754944e-38, %v2370_v41  ;;  %vm2369_vm4 = vcmp.eq.f32.partialorder %v2368_v55, 8.507059e+37  ;;  %vm2385_vm5 = vweird.f32 %v5744_v29 }
 0x7e5   :  { %v2381_v63 = vsub.f32 1.0, %v2380_v3  ;;  %vm2386_vm7 = vmor %vm2384_vm6, %vm2385_vm5 }
 0x7e7   :  { %v4469_v52 = vpop.eup %4468  ;;  %v2382_v12 = vmul.f32 %v5744_v29, %v2381_v63 }
 0x7e8   :  { %v4471_v22 = vpop.eup %4470  ;;  %v2341_v36 = vmul.f32 %v4469_v52, %v2339_v2  ;;  %vm2346_vm13 = vweird.f32 %v4469_v52 }
 0x7e9   :  { %v2360_v48 = vmul.f32 %v4471_v22, %v2358_v57  ;;  %v4473_v30 = vpop.eup %4472  ;;  %vm2365_vm14 = vweird.f32 %v4471_v22  ;;  %vm2347_vm0 = vmor %vm2345_vm15, %vm2346_vm13  ;;  %v2383_v26 = vadd.f32 %v5744_v29, %v2382_v12  ;;  %v4193_v57 = vld [vmem:[#allocation19 + $0xb0] sm:$0xf0] }
 0x7ea   :  { %v2342_v60 = vsub.f32 1.0, %v2341_v36  ;;  %v2433_v28 = vmul.f32 8.0, %v4473_v30  ;;  %vm2366_vm3 = vmor %vm2364_vm1, %vm2365_vm14  ;;  %v4475_v44 = vpop.eup %4474  ;;  %vm2437_vm9 = vweird.f32 %v4473_v30  ;;  %v4189_v12 = vld [vmem:[#allocation19 + $0x94] sm:$0xf] }
 0x7eb   :  { %v2361_v21 = vsub.f32 1.0, %v2360_v48  ;;  %v2387_v13 = vsel %vm2386_vm7, %v5744_v29, %v2383_v26  ;;  %v3965_v29 = vld [vmem:[#allocation19 + $0xb0] sm:$0xf] }
 0x7ec   :  { %v2343_v33 = vmul.f32 %v4469_v52, %v2342_v60  ;;  %v2434_v49 = vsub.f32 1.0, %v2433_v28  ;;  %v3966_v62 = vor.u32 %v4194_v32, %v3965_v29  ;;  %v3897_v32 = vld [vmem:[#allocation19 + $0x30] sm:$0xf] }
 0x7ed   :  { %v2362_v59 = vmul.f32 %v4471_v22, %v2361_v21 }
 0x7ee   :  { %v2344_v7 = vadd.f32 %v4469_v52, %v2343_v33  ;;  %v2435_v20 = vmul.f32 %v4473_v30, %v2434_v49  ;;  %2777 = vmatpush.bf16.msrb.mxu2 %v3966_v62  ;;  %v4191_v49 = vld [vmem:[#allocation19 + $0xa0] sm:$0xf0]  ;;  %v4177_v62 = vld [vmem:[#allocation19 + $0x34] sm:$0xf] }
 0x7ef   :  { %v2363_v23 = vadd.f32 %v4471_v22, %v2362_v59 }
 0x7f0   :  { %v2348_v34 = vsel %vm2347_vm0, %v4469_v52, %v2344_v7  ;;  %v2436_v38 = vadd.f32 %v4473_v30, %v2435_v20  ;;  %v3962_v52 = vor.u32 %v4192_v53, %v3959_v24  ;;  %v3941_v20 = vld [vmem:[#allocation19 + $0x80] sm:$0xf]  ;;  %v3917_v53 = vld [vmem:[#allocation19 + $0x50] sm:$0xf] }
 0x7f1   :  { %v2353_v54 = vsel %vm2350_vm2, %v2352_v14, %v2348_v34  ;;  %v2367_v5 = vsel %vm2366_vm3, %v4471_v22, %v2363_v23 }
 0x7f2   :  { %v2395_v17 = vmul.f32 %v4475_v44, %v2353_v54  ;;  %v2372_v1 = vsel %vm2369_vm4, %v2371_v18, %v2367_v5  ;;  %v2438_v6 = vsel %vm2437_vm9, %v4473_v30, %v2436_v38  ;;  %2748 = vmatpush.bf16.msra.mxu1 %v3962_v52  ;;  %v3945_v54 = vld [vmem:[#allocation19 + $0x90] sm:$0xf]  ;;  %v4190_v5 = vld [vmem:[#allocation19 + $0x98] sm:$0xf0] }
 0x7f3   :  { %v2394_v31 = vmul.f32 %v2372_v1, %v5725_v61  ;;  %v2388_v61 = vand.u32 2147483647, %v5739_v27  ;;  %v3957_v27 = vld [vmem:[#allocation19 + $0xa8] sm:$0xf]  ;;  %v3947_v1 = vld [vmem:[#allocation19 + $0x9c] sm:$0xf0] }
 0x7f4   :  { %v3958_v50 = vor.u32 %v4193_v57, %v3957_v27  ;;  %v3911_v57 = vld [vmem:[#allocation19 + $0x54] sm:$0xf0]  ;;  %v4178_v52 = vld [vmem:[#allocation19 + $0x38] sm:$0xf0] }
 0x7f5   :  { %v2396_v10 = vadd.f32 %v2395_v17, %v2394_v31  ;;  %vm2389_vm8 = vcmp.eq.f32.partialorder %v2388_v61, 8.507059e+37  ;;  %v3946_v17 = vor.u32 %v4190_v5, %v3945_v54  ;;  %v3953_v31 = vld [vmem:[#allocation19 + $0x98] sm:$0xf]  ;;  %v4171_v54 = vld [vmem:[#allocation19 + $0x4] sm:$0xf] }
 0x7f6   :  { %v2392_v43 = vsel %vm2389_vm8, %v2391_v47, %v2387_v13  ;;  %2719 = vmatpush.bf16.msra.mxu0 %v3958_v50  ;;  %v3954_v42 = vor.u32 %v4191_v49, %v3953_v31  ;;  %v3921_v13 = vld [vmem:[#allocation19 + $0x60] sm:$0xf]  ;;  %v4183_v47 = vld [vmem:[#allocation19 + $0x64] sm:$0xf]  ;;  %v4182_v50 = vld [vmem:[#allocation19 + $0x58] sm:$0xf0] }
 0x7f7   :  { %4476 = vtanh.f32 %v2396_v10  ;;  %v3933_v10 = vld [vmem:[#allocation19 + $0x78] sm:$0xf]  ;;  %v3922_v38 = vor.u32 %v4184_v16, %v3921_v13  ;;  %v3918_v29 = vor.u32 %v4182_v50, %v3917_v53  ;;  %v4328_v16 = vld [vmem:[%s6223_s10] ss:$0 sm:$0xff] }
 0x7f8   :  { %2778 = vmatpush.bf16.msrb.mxu2 %v3954_v42 }
 0x7fa   :  { %2720 = vmatpush.bf16.msra.mxu0 %v3946_v17  ;;  %v3881_v17 = vld [vmem:[#allocation19 + $0x8] sm:$0xf] }
 0x7fd   :  { %v4477_v56 = vpop.eup %4476 }
 0x7fe   :  { %v2398_v51 = vmul.f32 %v4477_v56, %v2392_v43  ;;  %v3929_v56 = vld [vmem:[#allocation19 + $0x68] sm:$0xf]  ;;  %v4185_v43 = vld [vmem:[#allocation19 + $0x70] sm:$0xf0] }
 0x800   :  { %v2431_v25 = vadd.f32 %v2430_v35, %v2398_v51  ;;  %v3930_v35 = vor.u32 %v4185_v43, %v3929_v56 }
 0x802   :  { %v2439_v2 = vmul.f32 %v2438_v6, %v2431_v25  ;;  %v4181_v25 = vld [vmem:[#allocation19 + $0x50] sm:$0xf0] }
 0x804   :  { %2456 = vmatmul.f32.vlgmr.msra.gmra.mxu2 %v2439_v2  ;;  %v4180_v2 = vld [vmem:[#allocation19 + $0x4c] sm:$0xf] }
 0x805   :  { %v3914_v24 = vor.u32 %v4180_v2, %v3911_v57 }
 0x887   :  { %v2457_v22 = vpop.f32.mrf.mxu2 }
 0x888   :  { %v5765_v36 = vsub.f32 %v6309_v0, %v2457_v22  ;;  %v5768_v48 = vsub.f32 %v5530_v4, %v2457_v22  ;;  %v5771_v3 = vsub.f32 %v6310_v45, %v2457_v22  ;;  %v5774_v60 = vsub.f32 %v6311_v37, %v2457_v22  ;;  %v4187_v45 = vld [vmem:[#allocation19 + $0x80] sm:$0xf0]  ;;  %v4188_v37 = vld [vmem:[#allocation19 + $0x88] sm:$0xf0] }
 0x889   :  { %v5781_v30 = vsub.f32 %v5668_v39, %v2457_v22  ;;  %v5786_v40 = vsub.f32 %v5714_v9, %v2457_v22  ;;  %v5791_v55 = vsub.f32 %v5728_v46, %v2457_v22  ;;  %v5795_v39 = vsub.f32 %v2398_v51, %v2457_v22 }
 0x88a   :  { %v2468_v15 = vmul.f32 %v5765_v36, %v5765_v36  ;;  %v2469_v21 = vmul.f32 %v5768_v48, %v5768_v48  ;;  %v2470_v33 = vmul.f32 %v5771_v3, %v5771_v3  ;;  %v2471_v41 = vmul.f32 %v5774_v60, %v5774_v60 }
 0x88b   :  { %v2472_v63 = vmul.f32 %v5781_v30, %v5781_v30  ;;  %v2473_v14 = vmul.f32 %v5786_v40, %v5786_v40  ;;  %v2474_v9 = vmul.f32 %v5791_v55, %v5791_v55  ;;  %v2475_v34 = vmul.f32 %v5795_v39, %v5795_v39 }
 0x88c   :  { %v2476_v4 = vadd.f32 %v2469_v21, %v2468_v15  ;;  %v3950_v0 = vor.u32 %v4189_v12, %v3947_v1  ;;  %v3934_v26 = vor.u32 %v4187_v45, %v3933_v10  ;;  %v3942_v61 = vor.u32 %v4188_v37, %v3941_v20  ;;  %v3899_v15 = vld [vmem:[#allocation19 + $0x3c] sm:$0xf0]  ;;  %v3905_v21 = vld [vmem:[#allocation19 + $0x38] sm:$0xf]  ;;  %v3875_v12 = vld [vmem:[#allocation19 + $0xc] sm:$0xf0] }
 0x88d   :  { %v3926_v51 = vor.u32 %v4183_v47, %v3923_v11  ;;  %v3898_v22 = vor.u32 %v4178_v52, %v3897_v32  ;;  %v4173_v1 = vld [vmem:[#allocation19 + $0x10] sm:$0xf0]  ;;  %v3878_v31 = vor.u32 %v4171_v54, %v3875_v12  ;;  %v4327_v37 = vld [vmem:[%s6222_s9] ss:$0 sm:$0xff]  ;;  %v4196_v12 = vld [vmem:[#allocation20 + $0x8] sm:$0xff] }
 0x88e   :  { %v2477_v59 = vadd.f32 %v2476_v4, %v2470_v33  ;;  %2749 = vmatpush.bf16.msra.mxu1 %v3950_v0  ;;  %2721 = vmatpush.bf16.msra.mxu0 %v3934_v26  ;;  %v4179_v33 = vld [vmem:[#allocation19 + $0x40] sm:$0xf0]  ;;  %v3902_v4 = vor.u32 %v4177_v62, %v3899_v15  ;;  %v3882_v49 = vor.u32 %v4173_v1, %v3881_v17  ;;  %v4202_v15 = vld [vmem:[#allocation20 + $0x38] sm:$0xff] }
 0x88f   :  { %2779 = vmatpush.bf16.msrb.mxu2 %v3942_v61  ;;  %3214 = vmatpush.bf16.msra.mxu3 %v4202_v15 }
 0x890   :  { %v2478_v7 = vadd.f32 %v2477_v59, %v2471_v41  ;;  %v3906_v41 = vor.u32 %v4179_v33, %v3905_v21  ;;  %v3885_v59 = vld [vmem:[#allocation19 + $0x18] sm:$0xf]  ;;  %v4201_v21 = vld [vmem:[#allocation20 + $0x30] sm:$0xff]  ;;  %v4200_v33 = vld [vmem:[#allocation20 + $0x28] sm:$0xff] }
 0x892   :  { %v2479_v23 = vadd.f32 %v2478_v7, %v2472_v63  ;;  %2750 = vmatpush.bf16.msra.mxu1 %v3938_v8  ;;  %2722 = vmatpush.bf16.msra.mxu0 %v3922_v38  ;;  %v4175_v63 = vld [vmem:[#allocation19 + $0x20] sm:$0xf0]  ;;  %v4174_v7 = vld [vmem:[#allocation19 + $0x1c] sm:$0xf] }
 0x893   :  { %2780 = vmatpush.bf16.msrb.mxu2 %v3930_v35  ;;  %3215 = vmatpush.bf16.msra.mxu3 %v4201_v21 }
 0x894   :  { %v2480_v28 = vadd.f32 %v2479_v23, %v2473_v14  ;;  %v3886_v14 = vor.u32 %v4175_v63, %v3885_v59  ;;  %v3887_v23 = vld [vmem:[#allocation19 + $0x24] sm:$0xf0] }
 0x896   :  { %v2481_v18 = vadd.f32 %v2480_v28, %v2474_v9  ;;  %2751 = vmatpush.bf16.msra.mxu1 %v3926_v51  ;;  %v3893_v9 = vld [vmem:[#allocation19 + $0x20] sm:$0xf]  ;;  %v4176_v28 = vld [vmem:[#allocation19 + $0x28] sm:$0xf0] }
 0x897   :  { %2781 = vmatpush.bf16.msrb.mxu2 %v3918_v29  ;;  %3216 = vmatpush.bf16.msra.mxu3 %v4200_v33 }
 0x898   :  { %v2482_v46 = vadd.f32 %v2481_v18, %v2475_v34  ;;  %v3890_v34 = vor.u32 %v4174_v7, %v3887_v23  ;;  %v3894_v18 = vor.u32 %v4176_v28, %v3893_v9  ;;  %v4198_v23 = vld [vmem:[#allocation20 + $0x18] sm:$0xff] }
 0x89a   :  { %v2483_v44 = vmul.f32 %v2482_v46, %v2438_v6  ;;  %v3909_v6 = vld [vmem:[#allocation19 + $0x48] sm:$0xf]  ;;  %2752 = vmatpush.bf16.msra.mxu1 %v3914_v24  ;;  %v3873_v46 = vld [vmem:[#allocation19] sm:$0xf] }
 0x89b   :  { %v3910_v27 = vor.u32 %v4181_v25, %v3909_v6  ;;  %2782 = vmatpush.bf16.msrb.mxu2 %v3906_v41  ;;  %v4199_v41 = vld [vmem:[#allocation20 + $0x20] sm:$0xff] }
 0x89c   :  { %2500 = vmatmul.f32.vlgmr.msrb.gmra.mxu3 %v2483_v44  ;;  %v4172_v44 = vld [vmem:[#allocation19 + $0x8] sm:$0xf0] }
 0x89d   :  { %2723 = vmatpush.bf16.msra.mxu0 %v3910_v27  ;;  %v3874_v5 = vor.u32 %v4172_v44, %v3873_v46  ;;  %3217 = vmatpush.bf16.msra.mxu3 %v4199_v41 }
 0x89e   :  { %2753 = vmatpush.bf16.msra.mxu1 %v3902_v4 }
 0x89f   :  { %2783 = vmatpush.bf16.msrb.mxu2 %v3894_v18 }
 0x8a1   :  { %2724 = vmatpush.bf16.msra.mxu0 %v3898_v22  ;;  %3218 = vmatpush.bf16.msra.mxu3 %v4198_v23 }
 0x8a2   :  { %2754 = vmatpush.bf16.msra.mxu1 %v3890_v34  ;;  %v4197_v34 = vld [vmem:[#allocation20 + $0x10] sm:$0xff] }
 0x8a3   :  { %2784 = vmatpush.bf16.msrb.mxu2 %v3882_v49 }
 0x8a5   :  { %2725 = vmatpush.bf16.msra.mxu0 %v3886_v14  ;;  %3219 = vmatpush.bf16.msra.mxu3 %v4197_v34 }
 0x8a6   :  { %2755 = vmatpush.bf16.msra.mxu1 %v3878_v31 }
 0x8a9   :  { %2726 = vmatpush.bf16.msra.mxu0 %v3874_v5  ;;  %3220 = vmatpush.bf16.msra.mxu3 %v4196_v12 }
 0x91f   :  { %v2501_v0 = vpop.f32.mrf.mxu3 }
 0x920   :  { %v2504_v42 = vadd.f32 1e-05, %v2501_v0 }
 0x922   :  { %4478 = vrsqrt.f32 %v2504_v42  ;;  %vm2511_vm11 = vweird.f32 %v2504_v42 }
 0x928   :  { %v4479_v10 = vpop.eup %4478 }
 0x929   :  { %v2506_v45 = vmul.f32 %v4479_v10, %v2504_v42  ;;  %vm2512_vm10 = vweird.f32 %v4479_v10 }
 0x92a   :  { %vm2513_vm12 = vmor %vm2511_vm11, %vm2512_vm10 }
 0x92b   :  { %v2507_v19 = vmul.f32 %v4479_v10, %v2506_v45  ;;  %v4195_v45 = vld [vmem:[#allocation20] sm:$0xff] }
 0x92c   :  { %3221 = vmatpush.bf16.msra.mxu3 %v4195_v45 }
 0x92d   :  { %v2508_v26 = vmul.f32 0.5, %v2507_v19 }
 0x92f   :  { %v2509_v58 = vsub.f32 1.5, %v2508_v26 }
 0x931   :  { %v2510_v20 = vmul.f32 %v4479_v10, %v2509_v58 }
 0x933   :  { %v2514_v8 = vsel %vm2513_vm12, %v4479_v10, %v2510_v20 }
 0x934   :  { %v2515_v61 = vmul.f32 %v2514_v8, %v5765_v36  ;;  %v2516_v13 = vmul.f32 %v2514_v8, %v5768_v48  ;;  %v2517_v36 = vmul.f32 %v2514_v8, %v5771_v3  ;;  %v2518_v48 = vmul.f32 %v2514_v8, %v5774_v60 }
 0x935   :  { %v2519_v27 = vmul.f32 %v2514_v8, %v5781_v30  ;;  %v2520_v57 = vmul.f32 %v2514_v8, %v5786_v40  ;;  %v2521_v29 = vmul.f32 %v2514_v8, %v5791_v55  ;;  %v2522_v32 = vmul.f32 %v2514_v8, %v5795_v39  ;;  %v2583_v55 = vld [vmem:[%s6225_s12] sm:$0x7] }
 0x936   :  { %v2527_v47 = vmul.f32 %v4327_v37, %v2515_v61  ;;  %v2528_v38 = vmul.f32 %v4327_v37, %v2516_v13  ;;  %v2529_v51 = vmul.f32 %v4327_v37, %v2517_v36  ;;  %v2530_v35 = vmul.f32 %v4327_v37, %v2518_v48 }
 0x937   :  { %v2531_v53 = vmul.f32 %v4327_v37, %v2519_v27  ;;  %v2532_v3 = vmul.f32 %v4327_v37, %v2520_v57  ;;  %v2533_v52 = vmul.f32 %v4327_v37, %v2521_v29  ;;  %v2534_v30 = vmul.f32 %v4327_v37, %v2522_v32 }
 0x938   :  { %v5811_v11 = vadd.f32 %v4328_v16, %v2527_v47  ;;  %v5813_v56 = vadd.f32 %v4328_v16, %v2528_v38  ;;  %v5819_v6 = vadd.f32 %v4328_v16, %v2529_v51  ;;  %v5821_v25 = vadd.f32 %v4328_v16, %v2530_v35 }
 0x939   :  { %v5827_v50 = vadd.f32 %v4328_v16, %v2531_v53  ;;  %v5829_v60 = vadd.f32 %v4328_v16, %v2532_v3  ;;  %v5835_v62 = vadd.f32 %v4328_v16, %v2533_v52  ;;  %v5837_v40 = vadd.f32 %v4328_v16, %v2534_v30 }
 0x93a   :  { %v2547_v43 = vpack.c.bf16 %v5813_v56, %v5811_v11  ;;  %v2548_v2 = vpack.c.bf16 %v5821_v25, %v5819_v6  ;;  %v5844_v39 = vperm.slane %v2583_v55, 0  ;;  %v5846_v4 = vperm.slane %v2583_v55, 1 }
 0x93b   :  { %v2549_v24 = vpack.c.bf16 %v5829_v60, %v5827_v50  ;;  %v2550_v22 = vpack.c.bf16 %v5837_v40, %v5835_v62  ;;  %v5852_v0 = vperm.slane %v2583_v55, 2 }
 0x93c   :  { %2727 = vmatmul.bf16.vlgmr.msra.gmra.mxu0 %v2547_v43  ;;  %2756 = vmatmul.bf16.vlgmr.msra.gmra.mxu1 %v2547_v43 }
 0x93d   :  { %2785 = vmatmul.bf16.vlgmr.msrb.gmra.mxu2 %v2547_v43 }
 0x94c   :  { %2732 = vmatmul.bf16.gmra.mxu0 %v2548_v2  ;;  %2761 = vmatmul.bf16.gmra.mxu1 %v2548_v2 }
 0x94d   :  { %2790 = vmatmul.bf16.gmra.mxu2 %v2548_v2 }
 0x95c   :  { %2737 = vmatmul.bf16.gmra.mxu0 %v2549_v24  ;;  %2766 = vmatmul.bf16.gmra.mxu1 %v2549_v24 }
 0x95d   :  { %2795 = vmatmul.bf16.gmra.mxu2 %v2549_v24 }
 0x96c   :  { %2742 = vmatmul.bf16.gmra.mxu0 %v2550_v22  ;;  %2771 = vmatmul.bf16.gmra.mxu1 %v2550_v22 }
 0x96d   :  { %2800 = vmatmul.bf16.gmra.mxu2 %v2550_v22 }
 0x9b9   :  { %v2728_v59 = vpop.f32.mrf.mxu0  ;;  %v2757_v63 = vpop.f32.mrf.mxu1 }
 0x9ba   :  { %v2729_v7 = vadd.f32 %v2728_v59, %v5844_v39  ;;  %v2758_v14 = vadd.f32 %v2757_v63, %v5846_v4 }
 0x9bc   :  { %v3967_v9 = vmul.f32 -1.442695, %v2729_v7  ;;  %v3975_v28 = vmul.f32 -1.442695, %v2758_v14 }
 0x9be   :  { %4480 = vpow2.f32 %v3967_v9 }
 0x9bf   :  { %4482 = vpow2.f32 %v3975_v28 }
 0x9c0   :  { %v2786_v18 = vpop.f32.mrf.mxu2 }
 0x9c1   :  { %v2730_v46 = vpop.f32.mrf.mxu0  ;;  %v2759_v44 = vpop.f32.mrf.mxu1  ;;  %v2787_v26 = vadd.f32 %v2786_v18, %v5852_v0 }
 0x9c2   :  { %v2731_v54 = vadd.f32 %v2730_v46, %v5844_v39  ;;  %v2760_v5 = vadd.f32 %v2759_v44, %v5846_v4 }
 0x9c4   :  { %v4481_v17 = vpop.eup %4480  ;;  %v3968_v1 = vmul.f32 -1.442695, %v2731_v54  ;;  %v3976_v42 = vmul.f32 -1.442695, %v2760_v5 }
 0x9c5   :  { %v4483_v31 = vpop.eup %4482  ;;  %v2830_v49 = vadd.f32 1.0, %v4481_v17 }
 0x9c6   :  { %v5854_v10 = vadd.f32 1.0, %v4483_v31  ;;  %4484 = vpow2.f32 %v3968_v1 }
 0x9c7   :  { %4486 = vrcp.f32 %v2830_v49  ;;  %v2847_v13 = vand.u32 2147483647, %v2830_v49  ;;  %v2849_v16 = vand.u32 2147483648, %v2830_v49  ;;  %vm2843_vm14 = vweird.f32 %v2830_v49 }
 0x9c8   :  { %4488 = vrcp.f32 %v5854_v10  ;;  %v2788_v19 = vpop.f32.mrf.mxu2  ;;  %v3001_v43 = vand.u32 2147483648, %v5854_v10  ;;  %vm2995_vm13 = vweird.f32 %v5854_v10  ;;  %v2999_v57 = vand.u32 2147483647, %v5854_v10 }
 0x9c9   :  { %4490 = vpow2.f32 %v3976_v42  ;;  %v2733_v58 = vpop.f32.mrf.mxu0  ;;  %v2762_v20 = vpop.f32.mrf.mxu1  ;;  %v2789_v53 = vadd.f32 %v2788_v19, %v5852_v0  ;;  %vm5868_vm15 = vcmp.eq.f32.partialorder %v2847_v13, 8.507059e+37  ;;  %v2850_v29 = vor.u32 1.1754944e-38, %v2849_v16 }
 0x9ca   :  { %v2734_v37 = vadd.f32 %v2733_v58, %v5844_v39  ;;  %v2763_v8 = vadd.f32 %v2762_v20, %v5846_v4  ;;  %4492 = vtanh.f32 %v2787_v26  ;;  %v3002_v22 = vor.u32 1.1754944e-38, %v3001_v43 }
 0x9cb   :  { %vm5877_vm2 = vcmp.eq.f32.partialorder %v2999_v57, 8.507059e+37 }
 0x9cc   :  { %v4485_v61 = vpop.eup %4484  ;;  %v3969_v47 = vmul.f32 -1.442695, %v2734_v37  ;;  %v3977_v48 = vmul.f32 -1.442695, %v2763_v8 }
 0x9cd   :  { %v4487_v38 = vpop.eup %4486  ;;  %v5861_v36 = vadd.f32 1.0, %v4485_v61 }
 0x9ce   :  { %v4489_v51 = vpop.eup %4488  ;;  %v2839_v35 = vmul.f32 %v4487_v38, %v2830_v49  ;;  %4494 = vpow2.f32 %v3969_v47  ;;  %vm2844_vm0 = vweird.f32 %v4487_v38 }
 0x9cf   :  { %v4491_v2 = vpop.eup %4490  ;;  %v2991_v27 = vmul.f32 %v4489_v51, %v5854_v10  ;;  %4496 = vrcp.f32 %v5861_v36  ;;  %v2862_v55 = vand.u32 2147483647, %v5861_v36  ;;  %v2864_v41 = vand.u32 2147483648, %v5861_v36  ;;  %vm2845_vm4 = vmor %vm2843_vm14, %vm2844_vm0 }
 0x9d0   :  { %v2840_v3 = vsub.f32 1.0, %v2839_v35  ;;  %v5872_v32 = vadd.f32 1.0, %v4491_v2  ;;  %v2791_v52 = vpop.f32.mrf.mxu2  ;;  %4498 = vpow2.f32 %v3977_v48  ;;  %v4493_v59 = vpop.eup %4492  ;;  %vm2996_vm1 = vweird.f32 %v4489_v51 }
 0x9d1   :  { %v2992_v30 = vsub.f32 1.0, %v2991_v27  ;;  %v2735_v15 = vpop.f32.mrf.mxu0  ;;  %v2764_v21 = vpop.f32.mrf.mxu1  ;;  %vm2858_vm3 = vweird.f32 %v5861_v36  ;;  %v2792_v9 = vadd.f32 %v2791_v52, %v5852_v0  ;;  %vm2997_vm5 = vmor %vm2995_vm13, %vm2996_vm1  ;;  %vm5893_vm6 = vcmp.eq.f32.partialorder %v2862_v55, 8.507059e+37 }
 0x9d2   :  { %v2841_v33 = vmul.f32 %v4487_v38, %v2840_v3  ;;  %4500 = vrcp.f32 %v5872_v32  ;;  %v2736_v28 = vadd.f32 %v2735_v15, %v5844_v39  ;;  %v3016_v46 = vand.u32 2147483648, %v5872_v32 }
 0x9d3   :  { %v2993_v63 = vmul.f32 %v4489_v51, %v2992_v30  ;;  %4502 = vtanh.f32 %v2789_v53  ;;  %v2765_v54 = vadd.f32 %v2764_v21, %v5846_v4  ;;  %v2865_v1 = vor.u32 1.1754944e-38, %v2864_v41 }
 0x9d4   :  { %v4495_v14 = vpop.eup %4494  ;;  %v2842_v23 = vadd.f32 %v4487_v38, %v2841_v33  ;;  %v3970_v31 = vmul.f32 -1.442695, %v2736_v28  ;;  %vm3010_vm7 = vweird.f32 %v5872_v32  ;;  %v3014_v20 = vand.u32 2147483647, %v5872_v32 }
 0x9d5   :  { %v4497_v34 = vpop.eup %4496  ;;  %v2994_v18 = vadd.f32 %v4489_v51, %v2993_v63  ;;  %v5887_v44 = vadd.f32 1.0, %v4495_v14  ;;  %v3978_v10 = vmul.f32 -1.442695, %v2765_v54  ;;  %v3017_v57 = vor.u32 1.1754944e-38, %v3016_v46 }
 0x9d6   :  { %v2846_v5 = vsel %vm2845_vm4, %v4487_v38, %v2842_v23  ;;  %v2854_v12 = vmul.f32 %v4497_v34, %v5861_v36  ;;  %v4499_v49 = vpop.eup %4498  ;;  %vm2859_vm8 = vweird.f32 %v4497_v34  ;;  %vm5917_vm11 = vcmp.eq.f32.partialorder %v3014_v20, 8.507059e+37 }
 0x9d7   :  { %v2851_v42 = vsel %vm5868_vm15, %v2850_v29, %v2846_v5  ;;  %v2998_v45 = vsel %vm2997_vm5, %v4489_v51, %v2994_v18  ;;  %4504 = vrcp.f32 %v5887_v44  ;;  %v5904_v37 = vadd.f32 1.0, %v4499_v49  ;;  %vm2860_vm10 = vmor %vm2858_vm3, %vm2859_vm8 }
 0x9d8   :  { %v4501_v19 = vpop.eup %4500  ;;  %v3003_v26 = vsel %vm5877_vm2, %v3002_v22, %v2998_v45  ;;  %v2855_v58 = vsub.f32 1.0, %v2854_v12  ;;  %v2793_v8 = vpop.f32.mrf.mxu2  ;;  %v3126_v13 = vmul.f32 %v4493_v59, %v2851_v42  ;;  %4506 = vpow2.f32 %v3970_v31 }
 0x9d9   :  { %v4503_v61 = vpop.eup %4502  ;;  %v3006_v16 = vmul.f32 %v4501_v19, %v5872_v32  ;;  %v2738_v47 = vpop.f32.mrf.mxu0  ;;  %4508 = vrcp.f32 %v5904_v37  ;;  %v2794_v48 = vadd.f32 %v2793_v8, %v5852_v0  ;;  %v3118_v35 = vmul.f32 %v3003_v26, %v5811_v11 }
 0x9da   :  { %v2767_v38 = vpop.f32.mrf.mxu1  ;;  %v2856_v43 = vmul.f32 %v4497_v34, %v2855_v58  ;;  %v2739_v51 = vadd.f32 %v2738_v47, %v5844_v39  ;;  %4510 = vpow2.f32 %v3978_v10  ;;  %vm3011_vm9 = vweird.f32 %v4501_v19 }
 0x9db   :  { %v3007_v2 = vsub.f32 1.0, %v3006_v16  ;;  %v2768_v27 = vadd.f32 %v2767_v38, %v5846_v4  ;;  %4512 = vtanh.f32 %v2792_v9  ;;  %v3134_v21 = vadd.f32 %v3126_v13, %v3118_v35  ;;  %vm3012_vm12 = vmor %vm3010_vm7, %vm3011_vm9 }
 0x9dc   :  { %v2857_v53 = vadd.f32 %v4497_v34, %v2856_v43  ;;  %v3971_v3 = vmul.f32 -1.442695, %v2739_v51  ;;  %4514 = vtanh.f32 %v2794_v48  ;;  %vm2873_vm13 = vweird.f32 %v5887_v44 }
 0x9dd   :  { %v5912_v24 = vpop.eup %4504  ;;  %v3008_v29 = vmul.f32 %v4501_v19, %v3007_v2  ;;  %v3979_v52 = vmul.f32 -1.442695, %v2768_v27  ;;  %v2877_v7 = vand.u32 2147483647, %v5887_v44  ;;  %v2879_v42 = vand.u32 2147483648, %v5887_v44 }
 0x9de   :  { %v2861_v30 = vsel %vm2860_vm10, %v4497_v34, %v2857_v53  ;;  %v2869_v22 = vmul.f32 %v5912_v24, %v5887_v44  ;;  %4516 = vpow2.f32 %v3971_v3  ;;  %v4507_v15 = vpop.eup %4506  ;;  %vm2874_vm14 = vweird.f32 %v5912_v24 }
 0x9df   :  { %v2866_v33 = vsel %vm5893_vm6, %v2865_v1, %v2861_v30  ;;  %v3009_v55 = vadd.f32 %v4501_v19, %v3008_v29  ;;  %4518 = vpow2.f32 %v3979_v52  ;;  %v5925_v36 = vpop.eup %4508  ;;  %v5929_v59 = vadd.f32 1.0, %v4507_v15  ;;  %vm5972_vm0 = vmor %vm2873_vm13, %vm2874_vm14 }
 0x9e0   :  { %v2870_v41 = vsub.f32 1.0, %v2869_v22  ;;  %v2796_v63 = vpop.f32.mrf.mxu2  ;;  %v4511_v14 = vpop.eup %4510  ;;  %v3127_v9 = vmul.f32 %v4503_v61, %v2866_v33  ;;  %v3021_v28 = vmul.f32 %v5925_v36, %v5904_v37  ;;  %vm5954_vm15 = vcmp.eq.f32.partialorder %v2877_v7, 8.507059e+37 }
 0x9e1   :  { %v3013_v23 = vsel %vm3012_vm12, %v4501_v19, %v3009_v55  ;;  %v2797_v34 = vadd.f32 %v2796_v63, %v5852_v0  ;;  %v2740_v18 = vpop.f32.mrf.mxu0  ;;  %v5936_v32 = vpop.eup %4512  ;;  %4520 = vrcp.f32 %v5929_v59  ;;  %v5941_v5 = vadd.f32 1.0, %v4511_v14 }
 0x9e2   :  { %v2769_v46 = vpop.f32.mrf.mxu1  ;;  %v3018_v54 = vsel %vm5917_vm11, %v3017_v57, %v3013_v23  ;;  %v2741_v12 = vadd.f32 %v2740_v18, %v5844_v39  ;;  %v5944_v17 = vpop.eup %4514  ;;  %v3022_v31 = vsub.f32 1.0, %v3021_v28  ;;  %v2871_v19 = vmul.f32 %v5912_v24, %v2870_v41 }
 0x9e3   :  { %v3119_v1 = vmul.f32 %v3018_v54, %v5813_v56  ;;  %v2770_v49 = vadd.f32 %v2769_v46, %v5846_v4  ;;  %4522 = vrcp.f32 %v5941_v5  ;;  %v2892_v16 = vand.u32 2147483647, %v5929_v59 }
 0x9e4   :  { %v4517_v45 = vpop.eup %4516  ;;  %v3972_v10 = vmul.f32 -1.442695, %v2741_v12  ;;  %4524 = vtanh.f32 %v2797_v34  ;;  %v2872_v13 = vadd.f32 %v5912_v24, %v2871_v19  ;;  %v2894_v38 = vand.u32 2147483648, %v5929_v59 }
 0x9e5   :  { %v4519_v26 = vpop.eup %4518  ;;  %v3135_v58 = vadd.f32 %v3127_v9, %v3119_v1  ;;  %v5952_v20 = vadd.f32 1.0, %v4517_v45  ;;  %v3980_v8 = vmul.f32 -1.442695, %v2770_v49  ;;  %v3023_v43 = vmul.f32 %v5925_v36, %v3022_v31 }
 0x9e6   :  { %v5958_v61 = vadd.f32 1.0, %v4519_v26  ;;  %4526 = vpow2.f32 %v3972_v10  ;;  %v2880_v2 = vor.u32 1.1754944e-38, %v2879_v42  ;;  %vm2888_vm1 = vweird.f32 %v5929_v59 }
 0x9e7   :  { %4528 = vrcp.f32 %v5952_v20  ;;  %v3142_v47 = vpack.c.bf16 %v3135_v58, %v3134_v21  ;;  %v5965_v48 = vpop.eup %4520  ;;  %vm3025_vm2 = vweird.f32 %v5904_v37  ;;  %v2876_v44 = vsel %vm5972_vm0, %v5912_v24, %v2872_v13 }
 0x9e8   :  { %4530 = vrcp.f32 %v5958_v61  ;;  %v2798_v51 = vpop.f32.mrf.mxu2  ;;  %v2884_v27 = vmul.f32 %v5965_v48, %v5929_v59  ;;  %vm5988_vm3 = vcmp.eq.f32.partialorder %v2892_v16, 8.507059e+37  ;;  %v3024_v22 = vadd.f32 %v5925_v36, %v3023_v43 }
 0x9e9   :  { %4532 = vpow2.f32 %v3980_v8  ;;  %3222 = vmatmul.bf16.vlgmr.msra.gmra.mxu3 %v3142_v47  ;;  %v2799_v57 = vadd.f32 %v2798_v51, %v5852_v0  ;;  %v2743_v53 = vpop.f32.mrf.mxu0  ;;  %v5984_v29 = vpop.eup %4522  ;;  %vm3026_vm4 = vweird.f32 %v5925_v36  ;;  %v2895_v33 = vor.u32 1.1754944e-38, %v2894_v38 }
 0x9ea   :  { %v2772_v3 = vpop.f32.mrf.mxu1  ;;  %v2744_v52 = vadd.f32 %v2743_v53, %v5844_v39  ;;  %v5994_v15 = vpop.eup %4524  ;;  %v2885_v21 = vsub.f32 1.0, %v2884_v27  ;;  %v3036_v24 = vmul.f32 %v5984_v29, %v5941_v5  ;;  %v3029_v55 = vand.u32 2147483647, %v5904_v37  ;;  %vm6010_vm6 = vmor %vm3025_vm2, %vm3026_vm4 }
 0x9eb   :  { %v2773_v30 = vadd.f32 %v2772_v3, %v5846_v4  ;;  %vm2889_vm5 = vweird.f32 %v5965_v48  ;;  %v3031_v14 = vand.u32 2147483648, %v5904_v37  ;;  %4534 = vtanh.f32 %v2799_v57 }
 0x9ec   :  { %v4527_v41 = vpop.eup %4526  ;;  %v3973_v63 = vmul.f32 -1.442695, %v2744_v52  ;;  %v3037_v9 = vsub.f32 1.0, %v3036_v24  ;;  %v2886_v34 = vmul.f32 %v5965_v48, %v2885_v21  ;;  %v2881_v12 = vsel %vm5954_vm15, %v2880_v2, %v2876_v44  ;;  %vm2890_vm7 = vmor %vm2888_vm1, %vm2889_vm5 }
 0x9ed   :  { %v3981_v7 = vmul.f32 -1.442695, %v2773_v30  ;;  %v6001_v23 = vpop.eup %4528  ;;  %v6003_v28 = vadd.f32 1.0, %v4527_v41  ;;  %v3028_v1 = vsel %vm6010_vm6, %v5925_v36, %v3024_v22  ;;  %v3032_v49 = vor.u32 1.1754944e-38, %v3031_v14 }
 0x9ee   :  { %v6014_v46 = vpop.eup %4530  ;;  %v2899_v54 = vmul.f32 %v6001_v23, %v5952_v20  ;;  %4536 = vpow2.f32 %v3973_v63  ;;  %v2887_v37 = vadd.f32 %v5965_v48, %v2886_v34  ;;  %v3038_v42 = vmul.f32 %v5984_v29, %v3037_v9 }
 0x9ef   :  { %v4533_v31 = vpop.eup %4532  ;;  %4538 = vrcp.f32 %v6003_v28  ;;  %vm3030_vm8 = vcmp.eq.f32.partialorder %v3029_v55, 8.507059e+37  ;;  %vm3040_vm9 = vweird.f32 %v5941_v5  ;;  %v6035_v36 = vmul.f32 %v6014_v46, %v5958_v61 }
 0x9f0   :  { %v6026_v45 = vadd.f32 1.0, %v4533_v31  ;;  %4540 = vpow2.f32 %v3981_v7  ;;  %v2801_v10 = vpop.f32.mrf.mxu2  ;;  %v2891_v58 = vsel %vm2890_vm7, %v5965_v48, %v2887_v37  ;;  %v3033_v8 = vsel %vm3030_vm8, %v3032_v49, %v3028_v1 }
 0x9f1   :  { %v2745_v19 = vpop.f32.mrf.mxu0  ;;  %v3039_v56 = vadd.f32 %v5984_v29, %v3038_v42  ;;  %v2900_v13 = vsub.f32 1.0, %v2899_v54  ;;  %v6042_v47 = vpop.eup %4534  ;;  %v2896_v38 = vsel %vm5988_vm3, %v2895_v33, %v2891_v58  ;;  %vm3041_vm10 = vweird.f32 %v5984_v29 }
 0x9f2   :  { %v2774_v26 = vpop.f32.mrf.mxu1  ;;  %4542 = vrcp.f32 %v6026_v45  ;;  %v2746_v59 = vadd.f32 %v2745_v19, %v5844_v39  ;;  %v3044_v43 = vand.u32 2147483647, %v5941_v5  ;;  %v3046_v48 = vand.u32 2147483648, %v5941_v5  ;;  %vm3042_vm11 = vmor %vm3040_vm9, %vm3041_vm10 }
 0x9f3   :  { %v2775_v16 = vadd.f32 %v2774_v26, %v5846_v4  ;;  %v2802_v35 = vadd.f32 %v2801_v10, %v5852_v0  ;;  %v3120_v39 = vmul.f32 %v3033_v8, %v5819_v6  ;;  %v3043_v53 = vsel %vm3042_vm11, %v5984_v29, %v3039_v56 }
 0x9f4   :  { %v4537_v51 = vpop.eup %4536  ;;  %v3974_v2 = vmul.f32 -1.442695, %v2746_v59  ;;  %v3047_v3 = vor.u32 1.1754944e-38, %v3046_v48  ;;  %v3128_v44 = vmul.f32 %v5936_v32, %v2881_v12  ;;  %vm3045_vm12 = vcmp.eq.f32.partialorder %v3044_v43, 8.507059e+37 }
 0x9f5   :  { %v3982_v27 = vmul.f32 -1.442695, %v2775_v16  ;;  %v6053_v4 = vpop.eup %4538  ;;  %v6055_v57 = vadd.f32 1.0, %v4537_v51  ;;  %v3129_v5 = vmul.f32 %v5944_v17, %v2896_v38  ;;  %v2901_v22 = vmul.f32 %v6001_v23, %v2900_v13  ;;  %v4210_v16 = vld [vmem:[#allocation22 + $0x38] sm:$0xff] }
 0x9f6   :  { %v4541_v52 = vpop.eup %4540  ;;  %v2914_v30 = vmul.f32 %v6053_v4, %v6003_v28  ;;  %4544 = vpow2.f32 %v3974_v2  ;;  %v3048_v11 = vsel %vm3045_vm12, %v3047_v3, %v3043_v53  ;;  %v3052_v29 = vsub.f32 1.0, %v6035_v36  ;;  %3315 = vmatpush.bf16.msrb.mxu0 %v4210_v16 }
 0x9f7   :  { %4546 = vrcp.f32 %v6055_v57  ;;  %v6063_v6 = vadd.f32 1.0, %v4541_v52  ;;  %v3121_v24 = vmul.f32 %v3048_v11, %v5821_v25  ;;  %v3136_v17 = vadd.f32 %v3128_v44, %v3120_v39  ;;  %v4209_v39 = vld [vmem:[#allocation22 + $0x30] sm:$0xff] }
 0x9f8   :  { %v6066_v21 = vpop.eup %4542  ;;  %v2915_v32 = vsub.f32 1.0, %v2914_v30  ;;  %4548 = vpow2.f32 %v3982_v27  ;;  %v2902_v55 = vadd.f32 %v6001_v23, %v2901_v22  ;;  %vm2903_vm13 = vweird.f32 %v5952_v20  ;;  %v2803_v48 = vpop.f32.mrf.mxu2 }
 0x9f9   :  { %v3066_v33 = vmul.f32 %v6066_v21, %v6026_v45  ;;  %4550 = vrcp.f32 %v6063_v6  ;;  %v3137_v41 = vadd.f32 %v3129_v5, %v3121_v24  ;;  %vm2904_vm14 = vweird.f32 %v6001_v23 }
 0x9fa   :  { %v2907_v63 = vand.u32 2147483647, %v5952_v20  ;;  %4552 = vtanh.f32 %v2802_v35  ;;  %vm6077_vm15 = vmor %vm2903_vm13, %vm2904_vm14  ;;  %v2909_v25 = vand.u32 2147483648, %v5952_v20  ;;  %v2916_v14 = vmul.f32 %v6053_v4, %v2915_v32  ;;  %3316 = vmatpush.bf16.msrb.mxu0 %v4209_v39  ;;  %v4205_v35 = vld [vmem:[#allocation22 + $0x10] sm:$0xff] }
 0x9fb   :  { %v3067_v34 = vsub.f32 1.0, %v3066_v33  ;;  %v3143_v18 = vpack.c.bf16 %v3137_v41, %v3136_v17  ;;  %v2906_v54 = vsel %vm6077_vm15, %v6001_v23, %v2902_v55  ;;  %vm2918_vm0 = vweird.f32 %v6003_v28  ;;  %v4208_v33 = vld [vmem:[#allocation22 + $0x28] sm:$0xff] }
 0x9fc   :  { %v4545_v9 = vpop.eup %4544  ;;  %vm6091_vm1 = vcmp.eq.f32.partialorder %v2907_v63, 8.507059e+37  ;;  %v2917_v20 = vadd.f32 %v6053_v4, %v2916_v14  ;;  %vm2919_vm2 = vweird.f32 %v6053_v4  ;;  %v2922_v42 = vand.u32 2147483647, %v6003_v28 }
 0x9fd   :  { %v6087_v12 = vpop.eup %4546  ;;  %v6089_v1 = vadd.f32 1.0, %v4545_v9  ;;  %3227 = vmatmul.bf16.gmra.mxu3 %v3143_v18  ;;  %vm6099_vm3 = vmor %vm2918_vm0, %vm2919_vm2  ;;  %v2924_v10 = vand.u32 2147483648, %v6003_v28  ;;  %v3053_v36 = vmul.f32 %v6014_v46, %v3052_v29  ;;  %v2910_v58 = vor.u32 1.1754944e-38, %v2909_v25 }
 0x9fe   :  { %v4549_v37 = vpop.eup %4548  ;;  %v2929_v49 = vmul.f32 %v6087_v12, %v6055_v57  ;;  %v2921_v8 = vsel %vm6099_vm3, %v6053_v4, %v2917_v20  ;;  %vm3055_vm4 = vweird.f32 %v5958_v61  ;;  %vm3056_vm5 = vweird.f32 %v6014_v46  ;;  %3317 = vmatpush.bf16.msrb.mxu0 %v4208_v33 }
 0x9ff   :  { %v6106_v19 = vpop.eup %4550  ;;  %4554 = vrcp.f32 %v6089_v1  ;;  %v6109_v26 = vadd.f32 1.0, %v4549_v37  ;;  %v2925_v59 = vor.u32 1.1754944e-38, %v2924_v10  ;;  %v3054_v28 = vadd.f32 %v6014_v46, %v3053_v36  ;;  %vm6127_vm7 = vmor %vm3055_vm4, %vm3056_vm5 }
 0xa00   :  { %v2930_v56 = vsub.f32 1.0, %v2929_v49  ;;  %v6116_v13 = vmul.f32 %v6106_v19, %v6063_v6  ;;  %v6119_v38 = vpop.eup %4552  ;;  %v3059_v43 = vand.u32 2147483647, %v5958_v61  ;;  %v2911_v51 = vsel %vm6091_vm1, %v2910_v58, %v2906_v54 }
 0xa01   :  { %4556 = vrcp.f32 %v6109_v26  ;;  %vm2923_vm6 = vcmp.eq.f32.partialorder %v2922_v42, 8.507059e+37  ;;  %v3061_v2 = vand.u32 2147483648, %v5958_v61  ;;  %v3068_v27 = vmul.f32 %v6066_v21, %v3067_v34  ;;  %v4207_v34 = vld [vmem:[#allocation22 + $0x20] sm:$0xff] }
 0xa02   :  { %v2926_v4 = vsel %vm2923_vm6, %v2925_v59, %v2921_v8  ;;  %v3058_v53 = vsel %vm6127_vm7, %v6014_v46, %v3054_v28  ;;  %vm3070_vm8 = vweird.f32 %v6026_v45  ;;  %vm3071_vm9 = vweird.f32 %v6066_v21  ;;  %3318 = vmatpush.bf16.msrb.mxu0 %v4207_v34  ;;  %v4212_v34 = vld [vmem:[#allocation23 + $0x8] sm:$0xff] }
 0xa03   :  { %v3062_v3 = vor.u32 1.1754944e-38, %v3061_v2  ;;  %v3069_v44 = vadd.f32 %v6066_v21, %v3068_v27  ;;  %v3074_v52 = vand.u32 2147483647, %v6026_v45  ;;  %v3076_v61 = vand.u32 2147483648, %v6026_v45  ;;  %vm6143_vm11 = vmor %vm3070_vm8, %vm3071_vm9 }
 0xa04   :  { %v3082_v5 = vsub.f32 1.0, %v6116_v13  ;;  %v2804_v11 = vadd.f32 %v2803_v48, %v5852_v0  ;;  %vm3060_vm10 = vcmp.eq.f32.partialorder %v3059_v43, 8.507059e+37  ;;  %v2931_v46 = vmul.f32 %v6087_v12, %v2930_v56 }
 0xa05   :  { %v4555_v30 = vpop.eup %4554  ;;  %v3063_v32 = vsel %vm3060_vm10, %v3062_v3, %v3058_v53  ;;  %v3073_v24 = vsel %vm6143_vm11, %v6066_v21, %v3069_v44  ;;  %v3130_v45 = vmul.f32 %v5994_v15, %v2911_v51  ;;  %vm3075_vm12 = vcmp.eq.f32.partialorder %v3074_v52, 8.507059e+37 }
 0xa06   :  { %v2944_v29 = vmul.f32 %v4555_v30, %v6089_v1  ;;  %v3077_v0 = vor.u32 1.1754944e-38, %v3076_v61  ;;  %v3122_v55 = vmul.f32 %v3063_v32, %v5827_v50  ;;  %v3131_v41 = vmul.f32 %v6042_v47, %v2926_v4 }
 0xa07   :  { %v6153_v17 = vpop.eup %4556  ;;  %v2932_v25 = vadd.f32 %v6087_v12, %v2931_v46  ;;  %vm2934_vm13 = vweird.f32 %v6087_v12  ;;  %4558 = vtanh.f32 %v2804_v11  ;;  %vm2933_vm14 = vweird.f32 %v6055_v57  ;;  %v4203_v11 = vld [vmem:[#allocation22] sm:$0xff]  ;;  %v4329_v46 = vld [vmem:[%s6227_s14] ss:$0 sm:$0xff] }
 0xa08   :  { %v2945_v63 = vsub.f32 1.0, %v2944_v29  ;;  %v3096_v7 = vmul.f32 %v6153_v17, %v6109_v26  ;;  %v3078_v15 = vsel %vm3075_vm12, %v3077_v0, %v3073_v24  ;;  %v2937_v21 = vand.u32 2147483647, %v6055_v57  ;;  %vm6165_vm15 = vmor %vm2933_vm14, %vm2934_vm13  ;;  %v4218_v0 = vld [vmem:[#allocation23 + $0x38] sm:$0xff] }
 0xa09   :  { %v3123_v9 = vmul.f32 %v3078_v15, %v5829_v60  ;;  %v3138_v50 = vadd.f32 %v3130_v45, %v3122_v55  ;;  %v2939_v47 = vand.u32 2147483648, %v6055_v57  ;;  %vm2949_vm0 = vweird.f32 %v4555_v30  ;;  %3416 = vmatpush.bf16.msrb.mxu1 %v4218_v0  ;;  %v4217_v55 = vld [vmem:[#allocation23 + $0x30] sm:$0xff] }
 0xa0a   :  { %v3097_v14 = vsub.f32 1.0, %v3096_v7  ;;  %v2946_v54 = vmul.f32 %v4555_v30, %v2945_v63  ;;  %v2952_v31 = vand.u32 2147483647, %v6089_v1  ;;  %v2954_v20 = vand.u32 2147483648, %v6089_v1  ;;  %v4216_v63 = vld [vmem:[#allocation23 + $0x28] sm:$0xff]  ;;  %v4215_v7 = vld [vmem:[#allocation23 + $0x20] sm:$0xff] }
 0xa0b   :  { %v3139_v37 = vadd.f32 %v3131_v41, %v3123_v9  ;;  %v2936_v60 = vsel %vm6165_vm15, %v6087_v12, %v2932_v25  ;;  %vm2948_vm1 = vweird.f32 %v6089_v1  ;;  %v3083_v57 = vmul.f32 %v6106_v19, %v3082_v5  ;;  %v4206_v12 = vld [vmem:[#allocation22 + $0x18] sm:$0xff] }
 0xa0c   :  { %v2947_v49 = vadd.f32 %v4555_v30, %v2946_v54  ;;  %v2955_v23 = vor.u32 1.1754944e-38, %v2954_v20  ;;  %vm3085_vm2 = vweird.f32 %v6063_v6  ;;  %vm3086_vm3 = vweird.f32 %v6106_v19  ;;  %vm2950_vm4 = vmor %vm2948_vm1, %vm2949_vm0  ;;  %3319 = vmatpush.bf16.msrb.mxu0 %v4206_v12  ;;  %v4214_v9 = vld [vmem:[#allocation23 + $0x18] sm:$0xff] }
 0xa0d   :  { %v3144_v42 = vpack.c.bf16 %v3139_v37, %v3138_v50  ;;  %v3084_v10 = vadd.f32 %v6106_v19, %v3083_v57  ;;  %v3089_v36 = vand.u32 2147483647, %v6063_v6  ;;  %v3091_v58 = vand.u32 2147483648, %v6063_v6  ;;  %v4559_v8 = vpop.eup %4558  ;;  %vm6181_vm6 = vmor %vm3085_vm2, %vm3086_vm3  ;;  %3417 = vmatpush.bf16.msrb.mxu1 %v4217_v55  ;;  %v4213_v50 = vld [vmem:[#allocation23 + $0x10] sm:$0xff]  ;;  %v4211_v37 = vld [vmem:[#allocation23] sm:$0xff] }
 0xa0e   :  { %v2951_v1 = vsel %vm2950_vm4, %v4555_v30, %v2947_v49  ;;  %vm2953_vm5 = vcmp.eq.f32.partialorder %v2952_v31, 8.507059e+37  ;;  %v3098_v13 = vmul.f32 %v6153_v17, %v3097_v14  ;;  %vm3101_vm7 = vweird.f32 %v6153_v17  ;;  %v4330_v57 = vld [vmem:[%s6229_s16] ss:$0 sm:$0xff] }
 0xa0f   :  { %3232 = vmatmul.bf16.gmra.mxu3 %v3144_v42  ;;  %v2940_v59 = vor.u32 1.1754944e-38, %v2939_v47  ;;  %v2956_v28 = vsel %vm2953_vm5, %v2955_v23, %v2951_v1  ;;  %v3088_v6 = vsel %vm6181_vm6, %v6106_v19, %v3084_v10  ;;  %vm3100_vm8 = vweird.f32 %v6109_v26 }
 0xa10   :  { %v3092_v16 = vor.u32 1.1754944e-38, %v3091_v58  ;;  %v3099_v43 = vadd.f32 %v6153_v17, %v3098_v13  ;;  %v3104_v48 = vand.u32 2147483647, %v6109_v26  ;;  %v3106_v51 = vand.u32 2147483648, %v6109_v26  ;;  %vm3102_vm11 = vmor %vm3100_vm8, %vm3101_vm7  ;;  %3320 = vmatpush.bf16.msrb.mxu0 %v4205_v35  ;;  %v4204_v26 = vld [vmem:[#allocation22 + $0x8] sm:$0xff] }
 0xa11   :  { %vm2938_vm9 = vcmp.eq.f32.partialorder %v2937_v21, 8.507059e+37  ;;  %vm3090_vm10 = vcmp.eq.f32.partialorder %v3089_v36, 8.507059e+37  ;;  %v3133_v19 = vmul.f32 %v4559_v8, %v2956_v28  ;;  %3418 = vmatpush.bf16.msrb.mxu1 %v4216_v63 }
 0xa12   :  { %v2941_v2 = vsel %vm2938_vm9, %v2940_v59, %v2936_v60  ;;  %v3093_v27 = vsel %vm3090_vm10, %v3092_v16, %v3088_v6  ;;  %v3103_v39 = vsel %vm3102_vm11, %v6153_v17, %v3099_v43  ;;  %v3107_v4 = vor.u32 1.1754944e-38, %v3106_v51 }
 0xa13   :  { %vm3105_vm12 = vcmp.eq.f32.partialorder %v3104_v48, 8.507059e+37  ;;  %v3124_v3 = vmul.f32 %v3093_v27, %v5835_v62  ;;  %v3132_v52 = vmul.f32 %v6119_v38, %v2941_v2  ;;  %v4331_v2 = vld [vmem:[%s6231_s18] ss:$0 sm:$0xff]  ;;  %s4911_s18 = smov [#allocation25]  }
 0xa14   :  { %v3108_v53 = vsel %vm3105_vm12, %v3107_v4, %v3103_v39  ;;  %3321 = vmatpush.bf16.msrb.mxu0 %v4204_v26  ;;  %s3457_s19 = sshll.u32 %s4911_s18, 4  ;;  %s3458_s19 = int_to_ptr.vmem [resolvable:$true] %s3457_s19 }
 0xa15   :  { %v3125_v44 = vmul.f32 %v3108_v53, %v5837_v40  ;;  %v3140_v30 = vadd.f32 %v3132_v52, %v3124_v3  ;;  %3419 = vmatpush.bf16.msrb.mxu1 %v4215_v7 }
 0xa17   :  { %v3141_v61 = vadd.f32 %v3133_v19, %v3125_v44 }
 0xa18   :  { %3322 = vmatpush.bf16.msrb.mxu0 %v4203_v11 }
 0xa19   :  { %v3145_v5 = vpack.c.bf16 %v3141_v61, %v3140_v30  ;;  %3420 = vmatpush.bf16.msrb.mxu1 %v4214_v9 }
 0xa1d   :  { %3421 = vmatpush.bf16.msrb.mxu1 %v4213_v50 }
 0xa1f   :  { %3237 = vmatmul.bf16.gmra.mxu3 %v3145_v5 }
 0xa21   :  { %3422 = vmatpush.bf16.msrb.mxu1 %v4212_v34 }
 0xa25   :  { %3423 = vmatpush.bf16.msrb.mxu1 %v4211_v37 }
 0xa6c   :  { %v3223_v22 = vpop.f32.mrf.mxu3 }
 0xa6d   :  { %v3224_v62 = vadd.f32 %v4329_v46, %v3223_v22 }
 0xa74   :  { %v3225_v29 = vpop.f32.mrf.mxu3 }
 0xa75   :  { %v3226_v32 = vadd.f32 %v4329_v46, %v3225_v29 }
 0xa77   :  { %v3243_v40 = vpack.c.bf16 %v3226_v32, %v3224_v62 }
 0xa79   :  { %3323 = vmatmul.bf16.vlgmr.msrb.gmra.mxu0 %v3243_v40 }
 0xa80   :  { %v3228_v38 = vpop.f32.mrf.mxu3 }
 0xa81   :  { %v3229_v45 = vadd.f32 %v4329_v46, %v3228_v38 }
 0xa88   :  { %v3230_v24 = vpop.f32.mrf.mxu3 }
 0xa89   :  { %v3231_v33 = vadd.f32 %v4329_v46, %v3230_v24 }
 0xa8b   :  { %v3244_v17 = vpack.c.bf16 %v3231_v33, %v3229_v45 }
 0xa8d   :  { %3328 = vmatmul.bf16.gmra.mxu0 %v3244_v17 }
 0xa92   :  { %v3233_v41 = vpop.f32.mrf.mxu3 }
 0xa93   :  { %v3234_v15 = vadd.f32 %v4329_v46, %v3233_v41 }
 0xa9a   :  { %v3235_v25 = vpop.f32.mrf.mxu3 }
 0xa9b   :  { %v3236_v21 = vadd.f32 %v4329_v46, %v3235_v25 }
 0xa9d   :  { %v3245_v14 = vpack.c.bf16 %v3236_v21, %v3234_v15 }
 0xa9f   :  { %3333 = vmatmul.bf16.gmra.mxu0 %v3245_v14 }
 0xaa2   :  { %v3238_v47 = vpop.f32.mrf.mxu3 }
 0xaa3   :  { %v3239_v54 = vadd.f32 %v4329_v46, %v3238_v47 }
 0xaaa   :  { %v3240_v18 = vpop.f32.mrf.mxu3 }
 0xaab   :  { %v3241_v31 = vadd.f32 %v4329_v46, %v3240_v18 }
 0xaad   :  { %v3246_v20 = vpack.c.bf16 %v3241_v31, %v3239_v54 }
 0xaaf   :  { %3338 = vmatmul.bf16.gmra.mxu0 %v3246_v20 }
 0xaf6   :  { %v3324_v60 = vpop.f32.mrf.mxu0 }
 0xaf7   :  { %v3325_v23 = vadd.f32 %v4330_v57, %v3324_v60 }
 0xafe   :  { %v3326_v49 = vpop.f32.mrf.mxu0 }
 0xaff   :  { %v3327_v42 = vadd.f32 %v4330_v57, %v3326_v49 }
 0xb01   :  { %v3344_v10 = vpack.c.bf16 %v3327_v42, %v3325_v23 }
 0xb03   :  { %3424 = vmatmul.bf16.vlgmr.msrb.gmra.mxu1 %v3344_v10 }
 0xb0a   :  { %v3329_v36 = vpop.f32.mrf.mxu0 }
 0xb0b   :  { %v3330_v12 = vadd.f32 %v4330_v57, %v3329_v36 }
 0xb12   :  { %v3331_v58 = vpop.f32.mrf.mxu0 }
 0xb13   :  { %v3332_v8 = vadd.f32 %v4330_v57, %v3331_v58 }
 0xb15   :  { %v3345_v1 = vpack.c.bf16 %v3332_v8, %v3330_v12 }
 0xb17   :  { %3429 = vmatmul.bf16.gmra.mxu1 %v3345_v1 }
 0xb1c   :  { %v3334_v56 = vpop.f32.mrf.mxu0 }
 0xb1d   :  { %v3335_v59 = vadd.f32 %v4330_v57, %v3334_v56 }
 0xb24   :  { %v3336_v13 = vpop.f32.mrf.mxu0 }
 0xb25   :  { %v3337_v28 = vadd.f32 %v4330_v57, %v3336_v13 }
 0xb27   :  { %v3346_v6 = vpack.c.bf16 %v3337_v28, %v3335_v59 }
 0xb29   :  { %3434 = vmatmul.bf16.gmra.mxu1 %v3346_v6 }
 0xb2c   :  { %v3339_v16 = vpop.f32.mrf.mxu0 }
 0xb2d   :  { %v3340_v48 = vadd.f32 %v4330_v57, %v3339_v16 }
 0xb34   :  { %v3341_v43 = vpop.f32.mrf.mxu0 }
 0xb35   :  { %v3342_v51 = vadd.f32 %v4330_v57, %v3341_v43 }
 0xb37   :  { %v3347_v35 = vpack.c.bf16 %v3342_v51, %v3340_v48 }
 0xb39   :  { %3439 = vmatmul.bf16.gmra.mxu1 %v3347_v35 }
 0xb80   :  { %v3425_v27 = vpop.f32.mrf.mxu1 }
 0xb81   :  { %v3426_v39 = vadd.f32 %v4331_v2, %v3425_v27 }
 0xb83   :  { %3445 = vst [vmem:[#allocation25] sm:$0xff] %v3426_v39 }
 0xb88   :  { %v3427_v4 = vpop.f32.mrf.mxu1 }
 0xb89   :  { %v3428_v19 = vadd.f32 %v4331_v2, %v3427_v4 }
 0xb8b   :  { %3446 = vst [vmem:[#allocation25 + $0x8] sm:$0xff] %v3428_v19 }
 0xb94   :  { %v3430_v53 = vpop.f32.mrf.mxu1 }
 0xb95   :  { %v3431_v3 = vadd.f32 %v4331_v2, %v3430_v53 }
 0xb97   :  { %3447 = vst [vmem:[#allocation25 + $0x10] sm:$0xff] %v3431_v3 }
 0xb9c   :  { %v3432_v44 = vpop.f32.mrf.mxu1 }
 0xb9d   :  { %v3433_v52 = vadd.f32 %v4331_v2, %v3432_v44 }
 0xb9f   :  { %3448 = vst [vmem:[#allocation25 + $0x18] sm:$0xff] %v3433_v52 }
 0xba6   :  { %v3435_v26 = vpop.f32.mrf.mxu1 }
 0xba7   :  { %v3436_v61 = vadd.f32 %v4331_v2, %v3435_v26 }
 0xba9   :  { %3449 = vst [vmem:[#allocation25 + $0x20] sm:$0xff] %v3436_v61 }
 0xbae   :  { %v3437_v30 = vpop.f32.mrf.mxu1 }
 0xbaf   :  { %v3438_v5 = vadd.f32 %v4331_v2, %v3437_v30 }
 0xbb1   :  { %3450 = vst [vmem:[#allocation25 + $0x28] sm:$0xff] %v3438_v5 }
 0xbb6   :  { %v3440_v11 = vpop.f32.mrf.mxu1 }
 0xbb7   :  { %v3441_v22 = vadd.f32 %v4331_v2, %v3440_v11 }
 0xbb9   :  { %3451 = vst [vmem:[#allocation25 + $0x30] sm:$0xff] %v3441_v22 }
 0xbbe   :  { %v3442_v46 = vpop.f32.mrf.mxu1 }
 0xbbf   :  { %v3443_v29 = vadd.f32 %v4331_v2, %v3442_v46 }
 0xbc1   :  { %3452 = vst [vmem:[#allocation25 + $0x38] sm:$0xff] %v3443_v29 }
 0xbc2   :  { %3465 = dma.vmem_to_hbm [thread:$0]  %s3458_s19, 1024, %s3460_s25, [#allocation7], %s4896_s28, %s4896_s28, %s4897_s20  }
 0xbc3   :  { %4886 = dma.done.wait [#allocation7], 1024  }
 0xbc4   :  { %4887 = vsyncadd [#allocation7], 4294966272 }
 0xbc5   :  { %3470 = vsyncpa [#allocation6], 1 }
 0xbc6   :  { %3471 = vsyncpa [#allocation9], 1 }
 0xbc7   :  { %3472 = vsyncpa [#allocation12], 1 }
 0xbc8   :  { %3473 = vsyncpa [#allocation15], 1 }
 0xbc9   :  { %3474 = vsyncpa [#allocation18], 1 }
 0xbca   :  { %3475 = vsyncpa [#allocation21], 1 }
 0xbcb   :  { %3476 = vsyncpa [#allocation24], 1 }
 0xbcc   :  { %3477 = vsyncpa [#allocation7], 1 }

</bundles_post_ra>
